<compile_context>
chip_gen: v6e
topology: v6e:2x2x1
jax: 0.10.0
libtpu: 0.0.40
codegen_flags: <defaults>
</compile_context>

<pallas_src>
import jax
import jax.numpy as jnp
from jax.experimental import pallas as pl
from jax.experimental.pallas import tpu as pltpu

NEG_SLOPE = 0.01      # F.leaky_relu default
_TILE_CAP = 512       # max rows per grid step (sized for v7x VMEM; fine on v5e/v6e)


# ----------------------------------------------------------------------------
# Row-tiling helpers
# ----------------------------------------------------------------------------
def _row_tiling(m):
    """Pick (tile_rows, padded_rows) for tiling a 2D op over its leading dim."""
    if m <= _TILE_CAP:
        return m, m                       # single full block (OK even if m % 8 != 0)
    tile = _TILE_CAP                      # multiple of 8
    mp = ((m + tile - 1) // tile) * tile
    return tile, mp


def _pad_rows(x, rows):
    m = x.shape[0]
    if rows == m:
        return x
    return jnp.pad(x, ((0, rows - m),) + ((0, 0),) * (x.ndim - 1))


# ----------------------------------------------------------------------------
# Fused conv + bias + leaky_relu + 2x2 max-pool kernel
# ----------------------------------------------------------------------------
def _conv_lrelu_pool_kernel(p_ref, w_ref, b_ref, o_ref):
    # p_ref: (4, tile, K) bf16 -- one im2col slab per 2x2 pooling quadrant.
    w = w_ref[...]  # (K, Cout) bf16

    # max-pool over the four quadrant matmuls (bias/leaky_relu commute with max)
    y = jnp.dot(p_ref[0], w, preferred_element_type=jnp.float32)
    for q in range(1, 4):
        y = jnp.maximum(y, jnp.dot(p_ref[q], w, preferred_element_type=jnp.float32))
    y = y + b_ref[...]
    o_ref[...] = jnp.where(y > 0.0, y, NEG_SLOPE * y)


def conv_lrelu_pool(x_nhwc, w_mat, b, kh, kw, pad, cout):
    """pool(leaky_relu(conv2d(x))) fused in one Pallas kernel.

    x_nhwc: (N, H, W, Cin) float32 -> (N, Hp, Wp, cout) float32,
    Hp = (H + 2*pad - kh + 1) // 2, Wp likewise.
    """
    n = x_nhwc.shape[0]
    x = x_nhwc.astype(jnp.bfloat16)
    if pad:
        x = jnp.pad(x, ((0, 0), (pad, pad), (pad, pad), (0, 0)))
    _, hh, ww, cin = x.shape
    ho, wo = hh - kh + 1, ww - kw + 1
    hp, wp = ho // 2, wo // 2
    k = kh * kw * cin
    m = n * hp * wp

    # One im2col patch matrix per 2x2 pooling quadrant, built directly from x
    # with stride-2 slices (rows ordered (n, hp, wp), columns (kh, kw, cin)),
    # then stacked into a single (4, M, K) input.
    quads = []
    for a in range(2):
        for bq in range(2):
            cols = [x[:, a + i: a + i + 2 * hp: 2, bq + j: bq + j + 2 * wp: 2, :]
                    for i in range(kh) for j in range(kw)]
            quads.append(jnp.concatenate(cols, axis=-1).reshape(m, k))
    patches = jnp.stack(quads, axis=0)            # (4, m, k) bf16

    tile, mp = _row_tiling(m)
    if mp != m:
        patches = jnp.pad(patches, ((0, 0), (0, mp - m), (0, 0)))
    grid = (mp // tile,)

    w_bf = w_mat.astype(jnp.bfloat16)
    b2 = b.reshape(1, cout).astype(jnp.float32)

    out = pl.pallas_call(
        _conv_lrelu_pool_kernel,
        out_shape=jax.ShapeDtypeStruct((mp, cout), jnp.float32),
        grid=grid,
        in_specs=[pl.BlockSpec((4, tile, k), lambda i: (0, i, 0)),
                  pl.BlockSpec((k, cout), lambda i: (0, 0)),
                  pl.BlockSpec((1, cout), lambda i: (0, 0))],
        out_specs=pl.BlockSpec((tile, cout), lambda i: (i, 0)),
        compiler_params=pltpu.CompilerParams(dimension_semantics=("parallel",)),
    )(patches, w_bf, b2)
    return out[:m].reshape(n, hp, wp, cout)


# ----------------------------------------------------------------------------
# Fused tail: fc1 -> (cls, proj1 -> relu -> proj2), intermediates stay in VMEM
# ----------------------------------------------------------------------------
def _tail_kernel(x_ref, wfc1_ref, bfc1_ref, wcls_ref, wp1_ref, wp2_ref, bp2_ref,
                 y_ref, f_ref):
    # fc1 (no activation in forward)
    h = jnp.dot(x_ref[...], wfc1_ref[...], preferred_element_type=jnp.float32)
    h = h + bfc1_ref[...]
    h_bf = h.astype(jnp.bfloat16)
    # y = cls(h)  (bias-free)
    y_ref[...] = jnp.dot(h_bf, wcls_ref[...], preferred_element_type=jnp.float32)
    # f = proj2(relu(proj1(h)))
    g = jnp.dot(h_bf, wp1_ref[...], preferred_element_type=jnp.float32)
    g = jnp.maximum(g, 0.0).astype(jnp.bfloat16)
    f = jnp.dot(g, wp2_ref[...], preferred_element_type=jnp.float32)
    f_ref[...] = f + bp2_ref[...]


def tail_fused(x_flat, params):
    n, kin = x_flat.shape
    tile, mp = _row_tiling(n)
    x = _pad_rows(x_flat.astype(jnp.bfloat16), mp)
    grid = (mp // tile,)

    wfc1 = params["fc1_w"].astype(jnp.bfloat16)
    bfc1 = params["fc1_b"].reshape(1, 128).astype(jnp.float32)
    wcls = params["cls_w"].astype(jnp.bfloat16)
    wp1 = params["proj1_w"].astype(jnp.bfloat16)
    wp2 = params["proj2_w"].astype(jnp.bfloat16)
    bp2 = params["proj2_b"].reshape(1, 128).astype(jnp.float32)

    y, f = pl.pallas_call(
        _tail_kernel,
        out_shape=(jax.ShapeDtypeStruct((mp, 10), jnp.float32),
                   jax.ShapeDtypeStruct((mp, 128), jnp.float32)),
        grid=grid,
        in_specs=[
            pl.BlockSpec((tile, kin), lambda i: (i, 0)),
            pl.BlockSpec((kin, 128), lambda i: (0, 0)),
            pl.BlockSpec((1, 128), lambda i: (0, 0)),
            pl.BlockSpec((128, 10), lambda i: (0, 0)),
            pl.BlockSpec((128, 256), lambda i: (0, 0)),
            pl.BlockSpec((256, 128), lambda i: (0, 0)),
            pl.BlockSpec((1, 128), lambda i: (0, 0)),
        ],
        out_specs=(pl.BlockSpec((tile, 10), lambda i: (i, 0)),
                   pl.BlockSpec((tile, 128), lambda i: (i, 0))),
        compiler_params=pltpu.CompilerParams(dimension_semantics=("parallel",)),
    )(x, wfc1, bfc1, wcls, wp1, wp2, bp2)
    return f[:n], y[:n]


# ----------------------------------------------------------------------------
# Parameters (deterministic synthetic init; shapes from CifarCNN.__init__)
# Conv weights stored pre-flattened (KH*KW*Cin, Cout) in im2col column order;
# loading real PyTorch conv weights (Cout,Cin,KH,KW) requires a transpose to
# (KH,KW,Cin,Cout) before flattening.  FC weights are stored (in, out).
# ----------------------------------------------------------------------------
def init_params(key):
    ks = jax.random.split(key, 12)

    def w(k, shape, fan_in):
        return jax.random.normal(k, shape, jnp.float32) / jnp.sqrt(float(fan_in))

    p = {}
    p["conv1_w"] = w(ks[0], (5 * 5 * 3, 16), 5 * 5 * 3)
    p["conv1_b"] = 0.01 * jax.random.normal(ks[1], (16,), jnp.float32)
    p["conv2_w"] = w(ks[2], (5 * 5 * 16, 32), 5 * 5 * 16)
    p["conv2_b"] = 0.01 * jax.random.normal(ks[3], (32,), jnp.float32)
    p["conv3_w"] = w(ks[4], (3 * 3 * 32, 64), 3 * 3 * 32)
    p["conv3_b"] = 0.01 * jax.random.normal(ks[5], (64,), jnp.float32)
    p["fc1_w"] = w(ks[6], (64 * 3 * 3, 128), 64 * 3 * 3)
    p["fc1_b"] = 0.01 * jax.random.normal(ks[7], (128,), jnp.float32)
    p["cls_w"] = w(ks[8], (128, 10), 128)                  # cls: bias=False
    p["proj1_w"] = w(ks[9], (128, 256), 128)               # proj[0]: bias=False
    p["proj2_w"] = w(ks[10], (256, 128), 256)              # proj[2]: bias=True
    p["proj2_b"] = 0.01 * jax.random.normal(ks[11], (128,), jnp.float32)
    return p


# ----------------------------------------------------------------------------
# Forward pass (mirrors CifarCNN.forward; returns (f, y))
# ----------------------------------------------------------------------------
def cifar_cnn_forward(params, x_nchw):
    n = x_nchw.shape[0]
    x = jnp.transpose(x_nchw, (0, 2, 3, 1))  # NCHW -> NHWC

    # pool(leaky_relu(conv1(x)))   : 3x32x32 -> 16x28x28 -> 16x14x14
    x = conv_lrelu_pool(x, params["conv1_w"], params["conv1_b"], 5, 5, 0, 16)
    # pool(leaky_relu(conv2(x)))   : 16x14x14 -> 32x12x12 -> 32x6x6
    x = conv_lrelu_pool(x, params["conv2_w"], params["conv2_b"], 5, 5, 1, 32)
    # pool(leaky_relu(conv3(x)))   : 32x6x6   -> 64x6x6   -> 64x3x3
    x = conv_lrelu_pool(x, params["conv3_w"], params["conv3_b"], 3, 3, 1, 64)

    # x.view(-1, 64*3*3) with PyTorch's NCHW (C, H, W) flatten order
    x = jnp.transpose(x, (0, 3, 1, 2)).reshape(n, 64 * 3 * 3)

    # fused fc1 / cls / proj tail
    return tail_fused(x, params)


# ----------------------------------------------------------------------------
# Pure-JAX reference (f32) for a loose sanity check (bf16 MXU inputs => tol)
# ----------------------------------------------------------------------------
def _reference_forward(params, x_nchw):
    x = jnp.transpose(x_nchw, (0, 2, 3, 1))

    def conv_block(x, w_mat, b, kh, kw, pad, cout):
        cin = x.shape[-1]
        w = w_mat.reshape(kh, kw, cin, cout)
        y = jax.lax.conv_general_dilated(
            x, w, window_strides=(1, 1),
            padding=((pad, pad), (pad, pad)),
            dimension_numbers=("NHWC", "HWIO", "NHWC"))
        y = y + b
        y = jnp.where(y > 0, y, NEG_SLOPE * y)
        return jax.lax.reduce_window(y, -jnp.inf, jax.lax.max,
                                     (1, 2, 2, 1), (1, 2, 2, 1), "VALID")

    x = conv_block(x, params["conv1_w"], params["conv1_b"], 5, 5, 0, 16)
    x = conv_block(x, params["conv2_w"], params["conv2_b"], 5, 5, 1, 32)
    x = conv_block(x, params["conv3_w"], params["conv3_b"], 3, 3, 1, 64)
    n = x.shape[0]
    x = jnp.transpose(x, (0, 3, 1, 2)).reshape(n, 64 * 3 * 3)
    x = x @ params["fc1_w"] + params["fc1_b"]
    y = x @ params["cls_w"]
    h = jnp.maximum(x @ params["proj1_w"], 0.0)
    f = h @ params["proj2_w"] + params["proj2_b"]
    return f, y


if __name__ == "__main__":
    key = jax.random.PRNGKey(0)
    pkey, xkey = jax.random.split(key)
    params = init_params(pkey)
    # Spatial size must be 32x32 so that the flatten matches 64*3*3 = 576.
    x = jax.random.normal(xkey, (2, 3, 32, 32), jnp.float32)

    f, y = jax.jit(cifar_cnn_forward)(params, x)
    jax.block_until_ready((f, y))

    assert f.shape == (2, 128), f.shape
    assert y.shape == (2, 10), y.shape
    assert f.dtype == jnp.float32 and y.dtype == jnp.float32

    # loose numerical sanity check vs. pure-JAX reference (bf16 matmul inputs)
    f_ref, y_ref = jax.jit(_reference_forward)(params, x)

    def relerr(a, b):
        return float(jnp.linalg.norm(a - b) / (jnp.linalg.norm(b) + 1e-6))

    assert relerr(f, f_ref) < 0.1, relerr(f, f_ref)
    assert relerr(y, y_ref) < 0.1, relerr(y, y_ref)

    print("KERNEL_OK")
</pallas_src>

<mosaic_0001>
module attributes {stable_mosaic.version = 11 : i64} {
  func.func @_conv_lrelu_pool_kernel(%arg0: i32, %arg1: memref<4x392x75xbf16, #tpu.memory_space<vmem>>, %arg2: memref<75x16xbf16, #tpu.memory_space<vmem>>, %arg3: memref<1x16xf32, #tpu.memory_space<vmem>>, %arg4: memref<392x16xf32, #tpu.memory_space<vmem>>) attributes {dimension_semantics = [#tpu.dimension_semantics<parallel>], iteration_bounds = array<i64: 1>, scalar_prefetch = 0 : i64, scratch_operands = 0 : i64, tpu.core_type = #tpu.core_type<tc>, window_params = [{transform_indices = @transform_0, window_bounds = array<i64: 4, 392, 75>}, {pipeline_mode = #tpu.pipeline_mode<synchronous>, transform_indices = @transform_1, window_bounds = array<i64: 75, 16>}, {pipeline_mode = #tpu.pipeline_mode<synchronous>, transform_indices = @transform_2, window_bounds = array<i64: 1, 16>}, {transform_indices = @transform_3, window_bounds = array<i64: 392, 16>}]} {
    %c0 = arith.constant 0 : index
    %c0_0 = arith.constant 0 : index
    %0 = vector.load %arg2[%c0, %c0_0] : memref<75x16xbf16, #tpu.memory_space<vmem>>, vector<75x16xbf16>
    %c0_1 = arith.constant 0 : index
    %c0_2 = arith.constant 0 : index
    %c0_3 = arith.constant 0 : index
    %1 = vector.load %arg1[%c0_1, %c0_2, %c0_3] : memref<4x392x75xbf16, #tpu.memory_space<vmem>>, vector<1x392x75xbf16>
    %2 = vector.shape_cast %1 : vector<1x392x75xbf16> to vector<392x75xbf16>
    %cst = arith.constant dense<0.000000e+00> : vector<392x16xf32>
    %3 = tpu.matmul %2, %0, %cst {dimension_numbers = #tpu.dot_dimension_numbers<[1], [0], [0], [1], [0, 0, 1, 1], [], []>} : vector<392x75xbf16>, vector<75x16xbf16>, vector<392x16xf32> -> vector<392x16xf32>
    %c1 = arith.constant 1 : index
    %c0_4 = arith.constant 0 : index
    %c0_5 = arith.constant 0 : index
    %4 = vector.load %arg1[%c1, %c0_4, %c0_5] : memref<4x392x75xbf16, #tpu.memory_space<vmem>>, vector<1x392x75xbf16>
    %5 = vector.shape_cast %4 : vector<1x392x75xbf16> to vector<392x75xbf16>
    %cst_6 = arith.constant dense<0.000000e+00> : vector<392x16xf32>
    %6 = tpu.matmul %5, %0, %cst_6 {dimension_numbers = #tpu.dot_dimension_numbers<[1], [0], [0], [1], [0, 0, 1, 1], [], []>} : vector<392x75xbf16>, vector<75x16xbf16>, vector<392x16xf32> -> vector<392x16xf32>
    %7 = arith.maximumf %3, %6 : vector<392x16xf32>
    %c2 = arith.constant 2 : index
    %c0_7 = arith.constant 0 : index
    %c0_8 = arith.constant 0 : index
    %8 = vector.load %arg1[%c2, %c0_7, %c0_8] : memref<4x392x75xbf16, #tpu.memory_space<vmem>>, vector<1x392x75xbf16>
    %9 = vector.shape_cast %8 : vector<1x392x75xbf16> to vector<392x75xbf16>
    %cst_9 = arith.constant dense<0.000000e+00> : vector<392x16xf32>
    %10 = tpu.matmul %9, %0, %cst_9 {dimension_numbers = #tpu.dot_dimension_numbers<[1], [0], [0], [1], [0, 0, 1, 1], [], []>} : vector<392x75xbf16>, vector<75x16xbf16>, vector<392x16xf32> -> vector<392x16xf32>
    %11 = arith.maximumf %7, %10 : vector<392x16xf32>
    %c3 = arith.constant 3 : index
    %c0_10 = arith.constant 0 : index
    %c0_11 = arith.constant 0 : index
    %12 = vector.load %arg1[%c3, %c0_10, %c0_11] : memref<4x392x75xbf16, #tpu.memory_space<vmem>>, vector<1x392x75xbf16>
    %13 = vector.shape_cast %12 : vector<1x392x75xbf16> to vector<392x75xbf16>
    %cst_12 = arith.constant dense<0.000000e+00> : vector<392x16xf32>
    %14 = tpu.matmul %13, %0, %cst_12 {dimension_numbers = #tpu.dot_dimension_numbers<[1], [0], [0], [1], [0, 0, 1, 1], [], []>} : vector<392x75xbf16>, vector<75x16xbf16>, vector<392x16xf32> -> vector<392x16xf32>
    %15 = arith.maximumf %11, %14 : vector<392x16xf32>
    %c0_13 = arith.constant 0 : index
    %c0_14 = arith.constant 0 : index
    %16 = vector.load %arg3[%c0_13, %c0_14] : memref<1x16xf32, #tpu.memory_space<vmem>>, vector<1x16xf32>
    %17 = vector.broadcast %16 : vector<1x16xf32> to vector<392x16xf32>
    %18 = arith.addf %15, %17 : vector<392x16xf32>
    %cst_15 = arith.constant 0.000000e+00 : f32
    %19 = vector.broadcast %cst_15 : f32 to vector<392x16xf32>
    %20 = arith.cmpf ogt, %18, %19 : vector<392x16xf32>
    %cst_16 = arith.constant 0.00999999977 : f32
    %21 = vector.broadcast %cst_16 : f32 to vector<392x16xf32>
    %22 = arith.mulf %21, %18 : vector<392x16xf32>
    %23 = arith.select %20, %18, %22 : vector<392x16xi1>, vector<392x16xf32>
    %c0_17 = arith.constant 0 : index
    %c0_18 = arith.constant 0 : index
    %24 = vector.load %arg4[%c0_17, %c0_18] : memref<392x16xf32, #tpu.memory_space<vmem>>, vector<392x16xf32>
    tpu.vector_store %arg4[%c0_17, %c0_18], %23 {strides = array<i32>} : memref<392x16xf32, #tpu.memory_space<vmem>>, vector<392x16xf32>,
    return
  }
  func.func @transform_0(%arg0: i32) -> (i32, i32, i32) {
    %c0_i32 = arith.constant 0 : i32
    %c0_i32_0 = arith.constant 0 : i32
    %c0_i32_1 = arith.constant 0 : i32
    return %c0_i32, %arg0, %c0_i32_0 : i32, i32, i32
  }
  func.func @transform_1(%arg0: i32) -> (i32, i32) {
    %c0_i32 = arith.constant 0 : i32
    %c0_i32_0 = arith.constant 0 : i32
    %c0_i32_1 = arith.constant 0 : i32
    return %c0_i32, %c0_i32_0 : i32, i32
  }
  func.func @transform_2(%arg0: i32) -> (i32, i32) {
    %c0_i32 = arith.constant 0 : i32
    %c0_i32_0 = arith.constant 0 : i32
    %c0_i32_1 = arith.constant 0 : i32
    return %c0_i32, %c0_i32_0 : i32, i32
  }
  func.func @transform_3(%arg0: i32) -> (i32, i32) {
    %c0_i32 = arith.constant 0 : i32
    %c0_i32_0 = arith.constant 0 : i32
    return %arg0, %c0_i32 : i32, i32
  }
}

module attributes {stable_mosaic.version = 11 : i64} {
  func.func @_conv_lrelu_pool_kernel(%arg0: i32, %arg1: memref<4x72x400xbf16, #tpu.memory_space<vmem>>, %arg2: memref<400x32xbf16, #tpu.memory_space<vmem>>, %arg3: memref<1x32xf32, #tpu.memory_space<vmem>>, %arg4: memref<72x32xf32, #tpu.memory_space<vmem>>) attributes {dimension_semantics = [#tpu.dimension_semantics<parallel>], iteration_bounds = array<i64: 1>, scalar_prefetch = 0 : i64, scratch_operands = 0 : i64, tpu.core_type = #tpu.core_type<tc>, window_params = [{transform_indices = @transform_0, window_bounds = array<i64: 4, 72, 400>}, {pipeline_mode = #tpu.pipeline_mode<synchronous>, transform_indices = @transform_1, window_bounds = array<i64: 400, 32>}, {pipeline_mode = #tpu.pipeline_mode<synchronous>, transform_indices = @transform_2, window_bounds = array<i64: 1, 32>}, {transform_indices = @transform_3, window_bounds = array<i64: 72, 32>}]} {
    %c0 = arith.constant 0 : index
    %c0_0 = arith.constant 0 : index
    %0 = vector.load %arg2[%c0, %c0_0] : memref<400x32xbf16, #tpu.memory_space<vmem>>, vector<400x32xbf16>
    %c0_1 = arith.constant 0 : index
    %c0_2 = arith.constant 0 : index
    %c0_3 = arith.constant 0 : index
    %1 = vector.load %arg1[%c0_1, %c0_2, %c0_3] : memref<4x72x400xbf16, #tpu.memory_space<vmem>>, vector<1x72x400xbf16>
    %2 = vector.shape_cast %1 : vector<1x72x400xbf16> to vector<72x400xbf16>
    %cst = arith.constant dense<0.000000e+00> : vector<72x32xf32>
    %3 = tpu.matmul %2, %0, %cst {dimension_numbers = #tpu.dot_dimension_numbers<[1], [0], [0], [1], [0, 0, 1, 1], [], []>} : vector<72x400xbf16>, vector<400x32xbf16>, vector<72x32xf32> -> vector<72x32xf32>
    %c1 = arith.constant 1 : index
    %c0_4 = arith.constant 0 : index
    %c0_5 = arith.constant 0 : index
    %4 = vector.load %arg1[%c1, %c0_4, %c0_5] : memref<4x72x400xbf16, #tpu.memory_space<vmem>>, vector<1x72x400xbf16>
    %5 = vector.shape_cast %4 : vector<1x72x400xbf16> to vector<72x400xbf16>
    %cst_6 = arith.constant dense<0.000000e+00> : vector<72x32xf32>
    %6 = tpu.matmul %5, %0, %cst_6 {dimension_numbers = #tpu.dot_dimension_numbers<[1], [0], [0], [1], [0, 0, 1, 1], [], []>} : vector<72x400xbf16>, vector<400x32xbf16>, vector<72x32xf32> -> vector<72x32xf32>
    %7 = arith.maximumf %3, %6 : vector<72x32xf32>
    %c2 = arith.constant 2 : index
    %c0_7 = arith.constant 0 : index
    %c0_8 = arith.constant 0 : index
    %8 = vector.load %arg1[%c2, %c0_7, %c0_8] : memref<4x72x400xbf16, #tpu.memory_space<vmem>>, vector<1x72x400xbf16>
    %9 = vector.shape_cast %8 : vector<1x72x400xbf16> to vector<72x400xbf16>
    %cst_9 = arith.constant dense<0.000000e+00> : vector<72x32xf32>
    %10 = tpu.matmul %9, %0, %cst_9 {dimension_numbers = #tpu.dot_dimension_numbers<[1], [0], [0], [1], [0, 0, 1, 1], [], []>} : vector<72x400xbf16>, vector<400x32xbf16>, vector<72x32xf32> -> vector<72x32xf32>
    %11 = arith.maximumf %7, %10 : vector<72x32xf32>
    %c3 = arith.constant 3 : index
    %c0_10 = arith.constant 0 : index
    %c0_11 = arith.constant 0 : index
    %12 = vector.load %arg1[%c3, %c0_10, %c0_11] : memref<4x72x400xbf16, #tpu.memory_space<vmem>>, vector<1x72x400xbf16>
    %13 = vector.shape_cast %12 : vector<1x72x400xbf16> to vector<72x400xbf16>
    %cst_12 = arith.constant dense<0.000000e+00> : vector<72x32xf32>
    %14 = tpu.matmul %13, %0, %cst_12 {dimension_numbers = #tpu.dot_dimension_numbers<[1], [0], [0], [1], [0, 0, 1, 1], [], []>} : vector<72x400xbf16>, vector<400x32xbf16>, vector<72x32xf32> -> vector<72x32xf32>
    %15 = arith.maximumf %11, %14 : vector<72x32xf32>
    %c0_13 = arith.constant 0 : index
    %c0_14 = arith.constant 0 : index
    %16 = vector.load %arg3[%c0_13, %c0_14] : memref<1x32xf32, #tpu.memory_space<vmem>>, vector<1x32xf32>
    %17 = vector.broadcast %16 : vector<1x32xf32> to vector<72x32xf32>
    %18 = arith.addf %15, %17 : vector<72x32xf32>
    %cst_15 = arith.constant 0.000000e+00 : f32
    %19 = vector.broadcast %cst_15 : f32 to vector<72x32xf32>
    %20 = arith.cmpf ogt, %18, %19 : vector<72x32xf32>
    %cst_16 = arith.constant 0.00999999977 : f32
    %21 = vector.broadcast %cst_16 : f32 to vector<72x32xf32>
    %22 = arith.mulf %21, %18 : vector<72x32xf32>
    %23 = arith.select %20, %18, %22 : vector<72x32xi1>, vector<72x32xf32>
    %c0_17 = arith.constant 0 : index
    %c0_18 = arith.constant 0 : index
    %24 = vector.load %arg4[%c0_17, %c0_18] : memref<72x32xf32, #tpu.memory_space<vmem>>, vector<72x32xf32>
    tpu.vector_store %arg4[%c0_17, %c0_18], %23 {strides = array<i32>} : memref<72x32xf32, #tpu.memory_space<vmem>>, vector<72x32xf32>,
    return
  }
  func.func @transform_0(%arg0: i32) -> (i32, i32, i32) {
    %c0_i32 = arith.constant 0 : i32
    %c0_i32_0 = arith.constant 0 : i32
    %c0_i32_1 = arith.constant 0 : i32
    return %c0_i32, %arg0, %c0_i32_0 : i32, i32, i32
  }
  func.func @transform_1(%arg0: i32) -> (i32, i32) {
    %c0_i32 = arith.constant 0 : i32
    %c0_i32_0 = arith.constant 0 : i32
    %c0_i32_1 = arith.constant 0 : i32
    return %c0_i32, %c0_i32_0 : i32, i32
  }
  func.func @transform_2(%arg0: i32) -> (i32, i32) {
    %c0_i32 = arith.constant 0 : i32
    %c0_i32_0 = arith.constant 0 : i32
    %c0_i32_1 = arith.constant 0 : i32
    return %c0_i32, %c0_i32_0 : i32, i32
  }
  func.func @transform_3(%arg0: i32) -> (i32, i32) {
    %c0_i32 = arith.constant 0 : i32
    %c0_i32_0 = arith.constant 0 : i32
    return %arg0, %c0_i32 : i32, i32
  }
}

module attributes {stable_mosaic.version = 11 : i64} {
  func.func @_conv_lrelu_pool_kernel(%arg0: i32, %arg1: memref<4x18x288xbf16, #tpu.memory_space<vmem>>, %arg2: memref<288x64xbf16, #tpu.memory_space<vmem>>, %arg3: memref<1x64xf32, #tpu.memory_space<vmem>>, %arg4: memref<18x64xf32, #tpu.memory_space<vmem>>) attributes {dimension_semantics = [#tpu.dimension_semantics<parallel>], iteration_bounds = array<i64: 1>, scalar_prefetch = 0 : i64, scratch_operands = 0 : i64, tpu.core_type = #tpu.core_type<tc>, window_params = [{transform_indices = @transform_0, window_bounds = array<i64: 4, 18, 288>}, {pipeline_mode = #tpu.pipeline_mode<synchronous>, transform_indices = @transform_1, window_bounds = array<i64: 288, 64>}, {pipeline_mode = #tpu.pipeline_mode<synchronous>, transform_indices = @transform_2, window_bounds = array<i64: 1, 64>}, {transform_indices = @transform_3, window_bounds = array<i64: 18, 64>}]} {
    %c0 = arith.constant 0 : index
    %c0_0 = arith.constant 0 : index
    %0 = vector.load %arg2[%c0, %c0_0] : memref<288x64xbf16, #tpu.memory_space<vmem>>, vector<288x64xbf16>
    %c0_1 = arith.constant 0 : index
    %c0_2 = arith.constant 0 : index
    %c0_3 = arith.constant 0 : index
    %1 = vector.load %arg1[%c0_1, %c0_2, %c0_3] : memref<4x18x288xbf16, #tpu.memory_space<vmem>>, vector<1x18x288xbf16>
    %2 = vector.shape_cast %1 : vector<1x18x288xbf16> to vector<18x288xbf16>
    %cst = arith.constant dense<0.000000e+00> : vector<18x64xf32>
    %3 = tpu.matmul %2, %0, %cst {dimension_numbers = #tpu.dot_dimension_numbers<[1], [0], [0], [1], [0, 0, 1, 1], [], []>} : vector<18x288xbf16>, vector<288x64xbf16>, vector<18x64xf32> -> vector<18x64xf32>
    %c1 = arith.constant 1 : index
    %c0_4 = arith.constant 0 : index
    %c0_5 = arith.constant 0 : index
    %4 = vector.load %arg1[%c1, %c0_4, %c0_5] : memref<4x18x288xbf16, #tpu.memory_space<vmem>>, vector<1x18x288xbf16>
    %5 = vector.shape_cast %4 : vector<1x18x288xbf16> to vector<18x288xbf16>
    %cst_6 = arith.constant dense<0.000000e+00> : vector<18x64xf32>
    %6 = tpu.matmul %5, %0, %cst_6 {dimension_numbers = #tpu.dot_dimension_numbers<[1], [0], [0], [1], [0, 0, 1, 1], [], []>} : vector<18x288xbf16>, vector<288x64xbf16>, vector<18x64xf32> -> vector<18x64xf32>
    %7 = arith.maximumf %3, %6 : vector<18x64xf32>
    %c2 = arith.constant 2 : index
    %c0_7 = arith.constant 0 : index
    %c0_8 = arith.constant 0 : index
    %8 = vector.load %arg1[%c2, %c0_7, %c0_8] : memref<4x18x288xbf16, #tpu.memory_space<vmem>>, vector<1x18x288xbf16>
    %9 = vector.shape_cast %8 : vector<1x18x288xbf16> to vector<18x288xbf16>
    %cst_9 = arith.constant dense<0.000000e+00> : vector<18x64xf32>
    %10 = tpu.matmul %9, %0, %cst_9 {dimension_numbers = #tpu.dot_dimension_numbers<[1], [0], [0], [1], [0, 0, 1, 1], [], []>} : vector<18x288xbf16>, vector<288x64xbf16>, vector<18x64xf32> -> vector<18x64xf32>
    %11 = arith.maximumf %7, %10 : vector<18x64xf32>
    %c3 = arith.constant 3 : index
    %c0_10 = arith.constant 0 : index
    %c0_11 = arith.constant 0 : index
    %12 = vector.load %arg1[%c3, %c0_10, %c0_11] : memref<4x18x288xbf16, #tpu.memory_space<vmem>>, vector<1x18x288xbf16>
    %13 = vector.shape_cast %12 : vector<1x18x288xbf16> to vector<18x288xbf16>
    %cst_12 = arith.constant dense<0.000000e+00> : vector<18x64xf32>
    %14 = tpu.matmul %13, %0, %cst_12 {dimension_numbers = #tpu.dot_dimension_numbers<[1], [0], [0], [1], [0, 0, 1, 1], [], []>} : vector<18x288xbf16>, vector<288x64xbf16>, vector<18x64xf32> -> vector<18x64xf32>
    %15 = arith.maximumf %11, %14 : vector<18x64xf32>
    %c0_13 = arith.constant 0 : index
    %c0_14 = arith.constant 0 : index
    %16 = vector.load %arg3[%c0_13, %c0_14] : memref<1x64xf32, #tpu.memory_space<vmem>>, vector<1x64xf32>
    %17 = vector.broadcast %16 : vector<1x64xf32> to vector<18x64xf32>
    %18 = arith.addf %15, %17 : vector<18x64xf32>
    %cst_15 = arith.constant 0.000000e+00 : f32
    %19 = vector.broadcast %cst_15 : f32 to vector<18x64xf32>
    %20 = arith.cmpf ogt, %18, %19 : vector<18x64xf32>
    %cst_16 = arith.constant 0.00999999977 : f32
    %21 = vector.broadcast %cst_16 : f32 to vector<18x64xf32>
    %22 = arith.mulf %21, %18 : vector<18x64xf32>
    %23 = arith.select %20, %18, %22 : vector<18x64xi1>, vector<18x64xf32>
    %c0_17 = arith.constant 0 : index
    %c0_18 = arith.constant 0 : index
    %24 = vector.load %arg4[%c0_17, %c0_18] : memref<18x64xf32, #tpu.memory_space<vmem>>, vector<18x64xf32>
    tpu.vector_store %arg4[%c0_17, %c0_18], %23 {strides = array<i32>} : memref<18x64xf32, #tpu.memory_space<vmem>>, vector<18x64xf32>,
    return
  }
  func.func @transform_0(%arg0: i32) -> (i32, i32, i32) {
    %c0_i32 = arith.constant 0 : i32
    %c0_i32_0 = arith.constant 0 : i32
    %c0_i32_1 = arith.constant 0 : i32
    return %c0_i32, %arg0, %c0_i32_0 : i32, i32, i32
  }
  func.func @transform_1(%arg0: i32) -> (i32, i32) {
    %c0_i32 = arith.constant 0 : i32
    %c0_i32_0 = arith.constant 0 : i32
    %c0_i32_1 = arith.constant 0 : i32
    return %c0_i32, %c0_i32_0 : i32, i32
  }
  func.func @transform_2(%arg0: i32) -> (i32, i32) {
    %c0_i32 = arith.constant 0 : i32
    %c0_i32_0 = arith.constant 0 : i32
    %c0_i32_1 = arith.constant 0 : i32
    return %c0_i32, %c0_i32_0 : i32, i32
  }
  func.func @transform_3(%arg0: i32) -> (i32, i32) {
    %c0_i32 = arith.constant 0 : i32
    %c0_i32_0 = arith.constant 0 : i32
    return %arg0, %c0_i32 : i32, i32
  }
}

module attributes {stable_mosaic.version = 11 : i64} {
  func.func @_tail_kernel(%arg0: i32, %arg1: memref<2x576xbf16, #tpu.memory_space<vmem>>, %arg2: memref<576x128xbf16, #tpu.memory_space<vmem>>, %arg3: memref<1x128xf32, #tpu.memory_space<vmem>>, %arg4: memref<128x10xbf16, #tpu.memory_space<vmem>>, %arg5: memref<128x256xbf16, #tpu.memory_space<vmem>>, %arg6: memref<256x128xbf16, #tpu.memory_space<vmem>>, %arg7: memref<1x128xf32, #tpu.memory_space<vmem>>, %arg8: memref<2x10xf32, #tpu.memory_space<vmem>>, %arg9: memref<2x128xf32, #tpu.memory_space<vmem>>) attributes {dimension_semantics = [#tpu.dimension_semantics<parallel>], iteration_bounds = array<i64: 1>, scalar_prefetch = 0 : i64, scratch_operands = 0 : i64, tpu.core_type = #tpu.core_type<tc>, window_params = [{transform_indices = @transform_0, window_bounds = array<i64: 2, 576>}, {pipeline_mode = #tpu.pipeline_mode<synchronous>, transform_indices = @transform_1, window_bounds = array<i64: 576, 128>}, {pipeline_mode = #tpu.pipeline_mode<synchronous>, transform_indices = @transform_2, window_bounds = array<i64: 1, 128>}, {pipeline_mode = #tpu.pipeline_mode<synchronous>, transform_indices = @transform_3, window_bounds = array<i64: 128, 10>}, {pipeline_mode = #tpu.pipeline_mode<synchronous>, transform_indices = @transform_4, window_bounds = array<i64: 128, 256>}, {pipeline_mode = #tpu.pipeline_mode<synchronous>, transform_indices = @transform_5, window_bounds = array<i64: 256, 128>}, {pipeline_mode = #tpu.pipeline_mode<synchronous>, transform_indices = @transform_6, window_bounds = array<i64: 1, 128>}, {transform_indices = @transform_7, window_bounds = array<i64: 2, 10>}, {transform_indices = @transform_8, window_bounds = array<i64: 2, 128>}]} {
    %c0 = arith.constant 0 : index
    %c0_0 = arith.constant 0 : index
    %0 = vector.load %arg1[%c0, %c0_0] : memref<2x576xbf16, #tpu.memory_space<vmem>>, vector<2x576xbf16>
    %c0_1 = arith.constant 0 : index
    %c0_2 = arith.constant 0 : index
    %1 = vector.load %arg2[%c0_1, %c0_2] : memref<576x128xbf16, #tpu.memory_space<vmem>>, vector<576x128xbf16>
    %cst = arith.constant dense<0.000000e+00> : vector<2x128xf32>
    %2 = tpu.matmul %0, %1, %cst {dimension_numbers = #tpu.dot_dimension_numbers<[1], [0], [0], [1], [0, 0, 1, 1], [], []>} : vector<2x576xbf16>, vector<576x128xbf16>, vector<2x128xf32> -> vector<2x128xf32>
    %c0_3 = arith.constant 0 : index
    %c0_4 = arith.constant 0 : index
    %3 = vector.load %arg3[%c0_3, %c0_4] : memref<1x128xf32, #tpu.memory_space<vmem>>, vector<1x128xf32>
    %4 = vector.broadcast %3 : vector<1x128xf32> to vector<2x128xf32>
    %5 = arith.addf %2, %4 : vector<2x128xf32>
    %6 = arith.truncf %5 : vector<2x128xf32> to vector<2x128xbf16>
    %c0_5 = arith.constant 0 : index
    %c0_6 = arith.constant 0 : index
    %7 = vector.load %arg4[%c0_5, %c0_6] : memref<128x10xbf16, #tpu.memory_space<vmem>>, vector<128x10xbf16>
    %cst_7 = arith.constant dense<0.000000e+00> : vector<2x10xf32>
    %8 = tpu.matmul %6, %7, %cst_7 {dimension_numbers = #tpu.dot_dimension_numbers<[1], [0], [0], [1], [0, 0, 1, 1], [], []>} : vector<2x128xbf16>, vector<128x10xbf16>, vector<2x10xf32> -> vector<2x10xf32>
    %c0_8 = arith.constant 0 : index
    %c0_9 = arith.constant 0 : index
    %9 = vector.load %arg8[%c0_8, %c0_9] : memref<2x10xf32, #tpu.memory_space<vmem>>, vector<2x10xf32>
    tpu.vector_store %arg8[%c0_8, %c0_9], %8 {strides = array<i32>} : memref<2x10xf32, #tpu.memory_space<vmem>>, vector<2x10xf32>,
    %c0_10 = arith.constant 0 : index
    %c0_11 = arith.constant 0 : index
    %10 = vector.load %arg5[%c0_10, %c0_11] : memref<128x256xbf16, #tpu.memory_space<vmem>>, vector<128x256xbf16>
    %cst_12 = arith.constant dense<0.000000e+00> : vector<2x256xf32>
    %11 = tpu.matmul %6, %10, %cst_12 {dimension_numbers = #tpu.dot_dimension_numbers<[1], [0], [0], [1], [0, 0, 1, 1], [], []>} : vector<2x128xbf16>, vector<128x256xbf16>, vector<2x256xf32> -> vector<2x256xf32>
    %cst_13 = arith.constant 0.000000e+00 : f32
    %12 = vector.broadcast %cst_13 : f32 to vector<2x256xf32>
    %13 = arith.maximumf %11, %12 : vector<2x256xf32>
    %14 = arith.truncf %13 : vector<2x256xf32> to vector<2x256xbf16>
    %c0_14 = arith.constant 0 : index
    %c0_15 = arith.constant 0 : index
    %15 = vector.load %arg6[%c0_14, %c0_15] : memref<256x128xbf16, #tpu.memory_space<vmem>>, vector<256x128xbf16>
    %cst_16 = arith.constant dense<0.000000e+00> : vector<2x128xf32>
    %16 = tpu.matmul %14, %15, %cst_16 {dimension_numbers = #tpu.dot_dimension_numbers<[1], [0], [0], [1], [0, 0, 1, 1], [], []>} : vector<2x256xbf16>, vector<256x128xbf16>, vector<2x128xf32> -> vector<2x128xf32>
    %c0_17 = arith.constant 0 : index
    %c0_18 = arith.constant 0 : index
    %17 = vector.load %arg7[%c0_17, %c0_18] : memref<1x128xf32, #tpu.memory_space<vmem>>, vector<1x128xf32>
    %18 = vector.broadcast %17 : vector<1x128xf32> to vector<2x128xf32>
    %19 = arith.addf %16, %18 : vector<2x128xf32>
    %c0_19 = arith.constant 0 : index
    %c0_20 = arith.constant 0 : index
    %20 = vector.load %arg9[%c0_19, %c0_20] : memref<2x128xf32, #tpu.memory_space<vmem>>, vector<2x128xf32>
    tpu.vector_store %arg9[%c0_19, %c0_20], %19 {strides = array<i32>} : memref<2x128xf32, #tpu.memory_space<vmem>>, vector<2x128xf32>,
    return
  }
  func.func @transform_0(%arg0: i32) -> (i32, i32) {
    %c0_i32 = arith.constant 0 : i32
    %c0_i32_0 = arith.constant 0 : i32
    return %arg0, %c0_i32 : i32, i32
  }
  func.func @transform_1(%arg0: i32) -> (i32, i32) {
    %c0_i32 = arith.constant 0 : i32
    %c0_i32_0 = arith.constant 0 : i32
    %c0_i32_1 = arith.constant 0 : i32
    return %c0_i32, %c0_i32_0 : i32, i32
  }
  func.func @transform_2(%arg0: i32) -> (i32, i32) {
    %c0_i32 = arith.constant 0 : i32
    %c0_i32_0 = arith.constant 0 : i32
    %c0_i32_1 = arith.constant 0 : i32
    return %c0_i32, %c0_i32_0 : i32, i32
  }
  func.func @transform_3(%arg0: i32) -> (i32, i32) {
    %c0_i32 = arith.constant 0 : i32
    %c0_i32_0 = arith.constant 0 : i32
    %c0_i32_1 = arith.constant 0 : i32
    return %c0_i32, %c0_i32_0 : i32, i32
  }
  func.func @transform_4(%arg0: i32) -> (i32, i32) {
    %c0_i32 = arith.constant 0 : i32
    %c0_i32_0 = arith.constant 0 : i32
    %c0_i32_1 = arith.constant 0 : i32
    return %c0_i32, %c0_i32_0 : i32, i32
  }
  func.func @transform_5(%arg0: i32) -> (i32, i32) {
    %c0_i32 = arith.constant 0 : i32
    %c0_i32_0 = arith.constant 0 : i32
    %c0_i32_1 = arith.constant 0 : i32
    return %c0_i32, %c0_i32_0 : i32, i32
  }
  func.func @transform_6(%arg0: i32) -> (i32, i32) {
    %c0_i32 = arith.constant 0 : i32
    %c0_i32_0 = arith.constant 0 : i32
    %c0_i32_1 = arith.constant 0 : i32
    return %c0_i32, %c0_i32_0 : i32, i32
  }
  func.func @transform_7(%arg0: i32) -> (i32, i32) {
    %c0_i32 = arith.constant 0 : i32
    %c0_i32_0 = arith.constant 0 : i32
    return %arg0, %c0_i32 : i32, i32
  }
  func.func @transform_8(%arg0: i32) -> (i32, i32) {
    %c0_i32 = arith.constant 0 : i32
    %c0_i32_0 = arith.constant 0 : i32
    return %arg0, %c0_i32 : i32, i32
  }
}

</mosaic_0001>

<bundles_post_ra>
// kernel: cifar_cnn_forward.4
= control target key start
LH: loop header
LB: loop body
LE: loop exit
PB: predicated region body
PF: predicated region fallthrough
CT: control target
= control target key end

     0   :  { %vm302_vm0 = vcmask 1044480   ;;  %vm303_vm1 = vcmask 1045504   ;;  %v4760_v0 = vmov 0.0   ;;  %v3408_v2 = vmov 65535   ;;  %s4756_s1 = inlined_call_operand.vmem [shape: bf16[75,16], index: 1, kind: input, shape index: {}]   ;;  %s4757_s0 = inlined_call_operand.vmem [shape: bf16[4,392,75], index: 0, kind: input, shape index: {}]   ;;  %s4758_s2 = inlined_call_operand.vmem [shape: f32[1,16], index: 2, kind: input, shape index: {}]   ;;  %s4759_s3 = inlined_call_operand.vmem [shape: f32[392,16], index: 3, kind: output, shape index: {}]  }
   0x1   :  { %2858 = vmatprep.subr.bf16.mxu0 %v4760_v0  ;;  %2968 = vmatprep.subr.bf16.mxu1 %v4760_v0  ;;  %v3301_v1 = vld [vmem:[%s4756_s1 + $0x20] sm:$0x3f]   ;;  %v304_v3 = vsel %vm302_vm0, 4294967295, %v3408_v2  ;;  %vm3409_vm2 = vmmov 0   ;;  %v3302_v6 = vld [vmem:[%s4756_s1 + $0x18] sm:$0xff]   ;;  %v3303_v7 = vld [vmem:[%s4756_s1 + $0x10] sm:$0xff]  }
   0x2   :  { %v305_v4 = vsel %vm303_vm1, %v304_v3, 0  ;;  %2868 = vmatprep.mubr.msk.bf16.mxu0 %vm3409_vm2, %v4760_v0  ;;  %2978 = vmatprep.mubr.msk.bf16.mxu1 %vm3409_vm2, %v4760_v0  ;;  %v3304_v8 = vld [vmem:[%s4756_s1 + $0x8] sm:$0xff]   ;;  %v3305_v9 = vld [vmem:[%s4756_s1] sm:$0xff]   ;;  %vm226_vm3 = vcmask 613376   ;;  %v3310_v14 = vld [vmem:[%s4757_s0 + $0x10] sm:$0xff]   ;;  %vm2331_vm5 = vcmask 130048  }
   0x3   :  { %v307_v5 = vand.u32 %v3301_v1, %v305_v4  ;;  %v3306_v10 = vld [vmem:[%s4757_s0] sm:$0xff]   ;;  %v3308_v12 = vld [vmem:[%s4757_s0 + $0x8] sm:$0xff]   ;;  %v3311_v15 = vld [vmem:[%s4757_s0 + $0xd4] sm:$0xff]  }
   0x4   :  { %v3307_v11 = vld [vmem:[%s4757_s0 + $0xc4] sm:$0xff]   ;;  %v3309_v13 = vld [vmem:[%s4757_s0 + $0xcc] sm:$0xff]   ;;  %v3312_v16 = vld [vmem:[%s4757_s0 + $0x18] sm:$0xff]  }
   0x5   :  { %2859 = vmatpush3.bf16.msra.mxu0 %v307_v5  ;;  %2969 = vmatpush3.bf16.msra.mxu1 %v307_v5  ;;  %v3313_v17 = vld [vmem:[%s4757_s0 + $0xdc] sm:$0xff]   ;;  %v3315_v19 = vld [vmem:[%s4757_s0 + $0xe4] sm:$0xff]   ;;  %v3317_v21 = vld [vmem:[%s4757_s0 + $0xec] sm:$0xff]  }
   0x6   :  { %2860 = vmatprep.subr.bf16.mxu0 %v4760_v0  ;;  %2970 = vmatprep.subr.bf16.mxu1 %v4760_v0  ;;  %v3314_v18 = vld [vmem:[%s4757_s0 + $0x20] sm:$0xff]   ;;  %v3316_v20 = vld [vmem:[%s4757_s0 + $0x28] sm:$0xff]   ;;  %v3318_v22 = vld [vmem:[%s4757_s0 + $0x30] sm:$0xff]  }
   0x7   :  { %v3319_v23 = vld [vmem:[%s4757_s0 + $0xf4] sm:$0xff]   ;;  %v3321_v25 = vld [vmem:[%s4757_s0 + $0xfc] sm:$0xff]   ;;  %v3323_v27 = vld [vmem:[%s4757_s0 + $0x104] sm:$0xff]  }
   0x8   :  { %v3320_v24 = vld [vmem:[%s4757_s0 + $0x38] sm:$0xff]   ;;  %v3322_v26 = vld [vmem:[%s4757_s0 + $0x40] sm:$0xff]   ;;  %v3324_v28 = vld [vmem:[%s4757_s0 + $0x48] sm:$0xff]  }
   0x9   :  { %2861 = vmatpush3.bf16.msra.mxu0 %v3302_v6  ;;  %2971 = vmatpush3.bf16.msra.mxu1 %v3302_v6  ;;  %v3325_v29 = vld [vmem:[%s4757_s0 + $0x10c] sm:$0xff]   ;;  %v3327_v31 = vld [vmem:[%s4757_s0 + $0x114] sm:$0xff]   ;;  %v3329_v33 = vld [vmem:[%s4757_s0 + $0x11c] sm:$0xff]  }
   0xa   :  { %2862 = vmatprep.subr.bf16.mxu0 %v4760_v0  ;;  %2972 = vmatprep.subr.bf16.mxu1 %v4760_v0  ;;  %v3326_v30 = vld [vmem:[%s4757_s0 + $0x50] sm:$0xff]   ;;  %v3328_v32 = vld [vmem:[%s4757_s0 + $0x58] sm:$0xff]   ;;  %v3330_v34 = vld [vmem:[%s4757_s0 + $0x60] sm:$0xff]  }
   0xb   :  { %v3331_v35 = vld [vmem:[%s4757_s0 + $0x124] sm:$0xff]   ;;  %v3333_v37 = vld [vmem:[%s4757_s0 + $0x12c] sm:$0xff]   ;;  %v3335_v39 = vld [vmem:[%s4757_s0 + $0x134] sm:$0xff]  }
   0xc   :  { %v3332_v36 = vld [vmem:[%s4757_s0 + $0x68] sm:$0xff]   ;;  %v3334_v38 = vld [vmem:[%s4757_s0 + $0x70] sm:$0xff]   ;;  %v3336_v40 = vld [vmem:[%s4757_s0 + $0x78] sm:$0xff]  }
   0xd   :  { %2863 = vmatpush3.bf16.msra.mxu0 %v3303_v7  ;;  %2973 = vmatpush3.bf16.msra.mxu1 %v3303_v7  ;;  %v3337_v41 = vld [vmem:[%s4757_s0 + $0x13c] sm:$0xff]   ;;  %v3339_v43 = vld [vmem:[%s4757_s0 + $0x144] sm:$0xff]   ;;  %v3341_v45 = vld [vmem:[%s4757_s0 + $0x14c] sm:$0xff]  }
   0xe   :  { %2864 = vmatprep.subr.bf16.mxu0 %v4760_v0  ;;  %2974 = vmatprep.subr.bf16.mxu1 %v4760_v0  ;;  %v3338_v42 = vld [vmem:[%s4757_s0 + $0x80] sm:$0xff]   ;;  %v3340_v44 = vld [vmem:[%s4757_s0 + $0x88] sm:$0xff]   ;;  %v3342_v46 = vld [vmem:[%s4757_s0 + $0x90] sm:$0xff]  }
   0xf   :  { %v3343_v47 = vld [vmem:[%s4757_s0 + $0x154] sm:$0xff]   ;;  %v3345_v49 = vld [vmem:[%s4757_s0 + $0x15c] sm:$0xff]   ;;  %v3347_v51 = vld [vmem:[%s4757_s0 + $0x164] sm:$0xff]  }
  0x10   :  { %v3344_v48 = vld [vmem:[%s4757_s0 + $0x98] sm:$0xff]   ;;  %v3346_v50 = vld [vmem:[%s4757_s0 + $0xa0] sm:$0xff]   ;;  %v3348_v52 = vld [vmem:[%s4757_s0 + $0xa8] sm:$0xff]  }
  0x11   :  { %2865 = vmatpush3.bf16.msra.mxu0 %v3304_v8  ;;  %2975 = vmatpush3.bf16.msra.mxu1 %v3304_v8  ;;  %v3349_v53 = vld [vmem:[%s4757_s0 + $0x16c] sm:$0xff]   ;;  %v3351_v55 = vld [vmem:[%s4757_s0 + $0x174] sm:$0xff]   ;;  %v3353_v57 = vld [vmem:[%s4757_s0 + $0x17c] sm:$0xff]  }
  0x12   :  { %2866 = vmatprep.subr.bf16.mxu0 %v4760_v0  ;;  %2976 = vmatprep.subr.bf16.mxu1 %v4760_v0  ;;  %v3350_v54 = vld [vmem:[%s4757_s0 + $0xb0] sm:$0xff]   ;;  %v3352_v56 = vld [vmem:[%s4757_s0 + $0xb8] sm:$0xff]   ;;  %v3354_v58 = vld [vmem:[%s4757_s0 + $0xc0] ss:$0 sps:$4 sm:$0xff]  }
  0x13   :  { %v3355_v59 = vld [vmem:[%s4757_s0 + $0x184] ss:$0 sps:$4 sm:$0xff]   ;;  %v3356_v4 = vld [vmem:[%s4757_s0 + $0x188] sm:$0xff]  }
  0x15   :  { %2867 = vmatpush3.bf16.msra.mxu0 %v3305_v9  ;;  %2977 = vmatpush3.bf16.msra.mxu1 %v3305_v9 }
  0x16   :  { %3078 = vmatprep.subr.bf16.mxu0 %v4760_v0  ;;  %3188 = vmatprep.subr.bf16.mxu1 %v4760_v0 }
  0x18   :  { %2869 = vmatmul.mubr.msk.bf16.vlgmr.msra.gmra.mxu0 %vm226_vm3, %v3306_v10  ;;  %2979 = vmatmul.mubr.msk.bf16.vlgmr.msra.gmra.mxu1 %vm226_vm3, %v3307_v11 }
  0x19   :  { %3079 = vmatpush3.bf16.msra.mxu0 %v307_v5  ;;  %3189 = vmatpush3.bf16.msra.mxu1 %v307_v5  ;;  %v3357_v5 = vld [vmem:[%s4757_s0 + $0x24c] sm:$0xff]  }
  0x1a   :  { %2872 = vmatprep.mubr.msk.bf16.mxu0 %vm3409_vm2, %v4760_v0  ;;  %2982 = vmatprep.mubr.msk.bf16.mxu1 %vm3409_vm2, %v4760_v0 }
  0x1b   :  { %3080 = vmatprep.subr.bf16.mxu0 %v4760_v0  ;;  %3190 = vmatprep.subr.bf16.mxu1 %v4760_v0 }
  0x1d   :  { %3081 = vmatpush3.bf16.msra.mxu0 %v3302_v6  ;;  %3191 = vmatpush3.bf16.msra.mxu1 %v3302_v6 }
  0x1e   :  { %3082 = vmatprep.subr.bf16.mxu0 %v4760_v0  ;;  %3192 = vmatprep.subr.bf16.mxu1 %v4760_v0 }
  0x20   :  { %2873 = vmatmul.mubr.msk.bf16.gmra.mxu0 %vm226_vm3, %v3308_v12  ;;  %2983 = vmatmul.mubr.msk.bf16.gmra.mxu1 %vm226_vm3, %v3309_v13 }
  0x21   :  { %2876 = vmatprep.mubr.msk.bf16.mxu0 %vm3409_vm2, %v4760_v0  ;;  %2986 = vmatprep.mubr.msk.bf16.mxu1 %vm3409_vm2, %v4760_v0 }
  0x22   :  { %3083 = vmatpush3.bf16.msra.mxu0 %v3303_v7  ;;  %3193 = vmatpush3.bf16.msra.mxu1 %v3303_v7 }
  0x23   :  { %3084 = vmatprep.subr.bf16.mxu0 %v4760_v0  ;;  %3194 = vmatprep.subr.bf16.mxu1 %v4760_v0 }
  0x26   :  { %3085 = vmatpush3.bf16.msra.mxu0 %v3304_v8  ;;  %3195 = vmatpush3.bf16.msra.mxu1 %v3304_v8 }
  0x27   :  { %3086 = vmatprep.subr.bf16.mxu0 %v4760_v0  ;;  %3196 = vmatprep.subr.bf16.mxu1 %v4760_v0 }
  0x28   :  { %2877 = vmatmul.mubr.msk.bf16.gmra.mxu0 %vm226_vm3, %v3310_v14  ;;  %2987 = vmatmul.mubr.msk.bf16.gmra.mxu1 %vm226_vm3, %v3311_v15 }
  0x29   :  { %2880 = vmatprep.mubr.msk.bf16.mxu0 %vm3409_vm2, %v4760_v0  ;;  %2990 = vmatprep.mubr.msk.bf16.mxu1 %vm3409_vm2, %v4760_v0 }
  0x2a   :  { %3087 = vmatpush3.bf16.msra.mxu0 %v3305_v9  ;;  %3197 = vmatpush3.bf16.msra.mxu1 %v3305_v9 }
  0x30   :  { %2881 = vmatmul.mubr.msk.bf16.gmra.mxu0 %vm226_vm3, %v3312_v16  ;;  %2991 = vmatmul.mubr.msk.bf16.gmra.mxu1 %vm226_vm3, %v3313_v17  ;;  %v3358_v16 = vld [vmem:[%s4757_s0 + $0x190] sm:$0xff]  }
  0x31   :  { %2884 = vmatprep.mubr.msk.bf16.mxu0 %vm3409_vm2, %v4760_v0  ;;  %2994 = vmatprep.mubr.msk.bf16.mxu1 %vm3409_vm2, %v4760_v0  ;;  %v3359_v17 = vld [vmem:[%s4757_s0 + $0x254] sm:$0xff]  }
  0x38   :  { %2885 = vmatmul.mubr.msk.bf16.gmra.mxu0 %vm226_vm3, %v3314_v18  ;;  %2995 = vmatmul.mubr.msk.bf16.gmra.mxu1 %vm226_vm3, %v3315_v19 }
  0x39   :  { %2888 = vmatprep.mubr.msk.bf16.mxu0 %vm3409_vm2, %v4760_v0  ;;  %2998 = vmatprep.mubr.msk.bf16.mxu1 %vm3409_vm2, %v4760_v0 }
  0x40   :  { %2889 = vmatmul.mubr.msk.bf16.gmra.mxu0 %vm226_vm3, %v3316_v20  ;;  %2999 = vmatmul.mubr.msk.bf16.gmra.mxu1 %vm226_vm3, %v3317_v21 }
  0x41   :  { %2892 = vmatprep.mubr.msk.bf16.mxu0 %vm3409_vm2, %v4760_v0  ;;  %3002 = vmatprep.mubr.msk.bf16.mxu1 %vm3409_vm2, %v4760_v0 }
  0x48   :  { %2893 = vmatmul.mubr.msk.bf16.gmra.mxu0 %vm226_vm3, %v3318_v22  ;;  %3003 = vmatmul.mubr.msk.bf16.gmra.mxu1 %vm226_vm3, %v3319_v23 }
  0x49   :  { %2896 = vmatprep.mubr.msk.bf16.mxu0 %vm3409_vm2, %v4760_v0  ;;  %3006 = vmatprep.mubr.msk.bf16.mxu1 %vm3409_vm2, %v4760_v0 }
  0x50   :  { %2897 = vmatmul.mubr.msk.bf16.gmra.mxu0 %vm226_vm3, %v3320_v24  ;;  %3007 = vmatmul.mubr.msk.bf16.gmra.mxu1 %vm226_vm3, %v3321_v25 }
  0x51   :  { %2900 = vmatprep.mubr.msk.bf16.mxu0 %vm3409_vm2, %v4760_v0  ;;  %3010 = vmatprep.mubr.msk.bf16.mxu1 %vm3409_vm2, %v4760_v0 }
  0x58   :  { %2901 = vmatmul.mubr.msk.bf16.gmra.mxu0 %vm226_vm3, %v3322_v26  ;;  %3011 = vmatmul.mubr.msk.bf16.gmra.mxu1 %vm226_vm3, %v3323_v27 }
  0x59   :  { %2904 = vmatprep.mubr.msk.bf16.mxu0 %vm3409_vm2, %v4760_v0  ;;  %3014 = vmatprep.mubr.msk.bf16.mxu1 %vm3409_vm2, %v4760_v0 }
  0x60   :  { %2905 = vmatmul.mubr.msk.bf16.gmra.mxu0 %vm226_vm3, %v3324_v28  ;;  %3015 = vmatmul.mubr.msk.bf16.gmra.mxu1 %vm226_vm3, %v3325_v29  ;;  %v3360_v28 = vld [vmem:[%s4757_s0 + $0x198] sm:$0xff]  }
  0x61   :  { %2908 = vmatprep.mubr.msk.bf16.mxu0 %vm3409_vm2, %v4760_v0  ;;  %3018 = vmatprep.mubr.msk.bf16.mxu1 %vm3409_vm2, %v4760_v0  ;;  %v3361_v29 = vld [vmem:[%s4757_s0 + $0x25c] sm:$0xff]  }
  0x68   :  { %2909 = vmatmul.mubr.msk.bf16.gmra.mxu0 %vm226_vm3, %v3326_v30  ;;  %3019 = vmatmul.mubr.msk.bf16.gmra.mxu1 %vm226_vm3, %v3327_v31 }
  0x69   :  { %2912 = vmatprep.mubr.msk.bf16.mxu0 %vm3409_vm2, %v4760_v0  ;;  %3022 = vmatprep.mubr.msk.bf16.mxu1 %vm3409_vm2, %v4760_v0 }
  0x70   :  { %2913 = vmatmul.mubr.msk.bf16.gmra.mxu0 %vm226_vm3, %v3328_v32  ;;  %3023 = vmatmul.mubr.msk.bf16.gmra.mxu1 %vm226_vm3, %v3329_v33 }
  0x71   :  { %2916 = vmatprep.mubr.msk.bf16.mxu0 %vm3409_vm2, %v4760_v0  ;;  %3026 = vmatprep.mubr.msk.bf16.mxu1 %vm3409_vm2, %v4760_v0 }
  0x78   :  { %2917 = vmatmul.mubr.msk.bf16.gmra.mxu0 %vm226_vm3, %v3330_v34  ;;  %3027 = vmatmul.mubr.msk.bf16.gmra.mxu1 %vm226_vm3, %v3331_v35 }
  0x79   :  { %2920 = vmatprep.mubr.msk.bf16.mxu0 %vm3409_vm2, %v4760_v0  ;;  %3030 = vmatprep.mubr.msk.bf16.mxu1 %vm3409_vm2, %v4760_v0 }
  0x80   :  { %2921 = vmatmul.mubr.msk.bf16.gmra.mxu0 %vm226_vm3, %v3332_v36  ;;  %3031 = vmatmul.mubr.msk.bf16.gmra.mxu1 %vm226_vm3, %v3333_v37 }
  0x81   :  { %2924 = vmatprep.mubr.msk.bf16.mxu0 %vm3409_vm2, %v4760_v0  ;;  %3034 = vmatprep.mubr.msk.bf16.mxu1 %vm3409_vm2, %v4760_v0 }
  0x88   :  { %2925 = vmatmul.mubr.msk.bf16.gmra.mxu0 %vm226_vm3, %v3334_v38  ;;  %3035 = vmatmul.mubr.msk.bf16.gmra.mxu1 %vm226_vm3, %v3335_v39 }
  0x89   :  { %2928 = vmatprep.mubr.msk.bf16.mxu0 %vm3409_vm2, %v4760_v0  ;;  %3038 = vmatprep.mubr.msk.bf16.mxu1 %vm3409_vm2, %v4760_v0 }
  0x90   :  { %2929 = vmatmul.mubr.msk.bf16.gmra.mxu0 %vm226_vm3, %v3336_v40  ;;  %3039 = vmatmul.mubr.msk.bf16.gmra.mxu1 %vm226_vm3, %v3337_v41  ;;  %v3362_v40 = vld [vmem:[%s4757_s0 + $0x1a0] sm:$0xff]  }
  0x91   :  { %2932 = vmatprep.mubr.msk.bf16.mxu0 %vm3409_vm2, %v4760_v0  ;;  %3042 = vmatprep.mubr.msk.bf16.mxu1 %vm3409_vm2, %v4760_v0  ;;  %v3363_v41 = vld [vmem:[%s4757_s0 + $0x264] sm:$0xff]  }
  0x98   :  { %2933 = vmatmul.mubr.msk.bf16.gmra.mxu0 %vm226_vm3, %v3338_v42  ;;  %3043 = vmatmul.mubr.msk.bf16.gmra.mxu1 %vm226_vm3, %v3339_v43 }
  0x99   :  { %2936 = vmatprep.mubr.msk.bf16.mxu0 %vm3409_vm2, %v4760_v0  ;;  %3046 = vmatprep.mubr.msk.bf16.mxu1 %vm3409_vm2, %v4760_v0 }
  0xa0   :  { %2937 = vmatmul.mubr.msk.bf16.gmra.mxu0 %vm226_vm3, %v3340_v44  ;;  %3047 = vmatmul.mubr.msk.bf16.gmra.mxu1 %vm226_vm3, %v3341_v45 }
  0xa1   :  { %2940 = vmatprep.mubr.msk.bf16.mxu0 %vm3409_vm2, %v4760_v0  ;;  %3050 = vmatprep.mubr.msk.bf16.mxu1 %vm3409_vm2, %v4760_v0 }
  0xa8   :  { %2941 = vmatmul.mubr.msk.bf16.gmra.mxu0 %vm226_vm3, %v3342_v46  ;;  %3051 = vmatmul.mubr.msk.bf16.gmra.mxu1 %vm226_vm3, %v3343_v47 }
  0xa9   :  { %2944 = vmatprep.mubr.msk.bf16.mxu0 %vm3409_vm2, %v4760_v0  ;;  %3054 = vmatprep.mubr.msk.bf16.mxu1 %vm3409_vm2, %v4760_v0 }
  0xb0   :  { %2945 = vmatmul.mubr.msk.bf16.gmra.mxu0 %vm226_vm3, %v3344_v48  ;;  %3055 = vmatmul.mubr.msk.bf16.gmra.mxu1 %vm226_vm3, %v3345_v49 }
  0xb1   :  { %2948 = vmatprep.mubr.msk.bf16.mxu0 %vm3409_vm2, %v4760_v0  ;;  %3058 = vmatprep.mubr.msk.bf16.mxu1 %vm3409_vm2, %v4760_v0 }
  0xb8   :  { %2949 = vmatmul.mubr.msk.bf16.gmra.mxu0 %vm226_vm3, %v3346_v50  ;;  %3059 = vmatmul.mubr.msk.bf16.gmra.mxu1 %vm226_vm3, %v3347_v51 }
  0xb9   :  { %2952 = vmatprep.mubr.msk.bf16.mxu0 %vm3409_vm2, %v4760_v0  ;;  %3062 = vmatprep.mubr.msk.bf16.mxu1 %vm3409_vm2, %v4760_v0 }
  0xc0   :  { %2953 = vmatmul.mubr.msk.bf16.gmra.mxu0 %vm226_vm3, %v3348_v52  ;;  %3063 = vmatmul.mubr.msk.bf16.gmra.mxu1 %vm226_vm3, %v3349_v53  ;;  %v3364_v52 = vld [vmem:[%s4757_s0 + $0x1a8] sm:$0xff]  }
  0xc1   :  { %2956 = vmatprep.mubr.msk.bf16.mxu0 %vm3409_vm2, %v4760_v0  ;;  %3066 = vmatprep.mubr.msk.bf16.mxu1 %vm3409_vm2, %v4760_v0  ;;  %v3365_v53 = vld [vmem:[%s4757_s0 + $0x26c] sm:$0xff]  }
  0xc8   :  { %2957 = vmatmul.mubr.msk.bf16.gmra.mxu0 %vm226_vm3, %v3350_v54  ;;  %3067 = vmatmul.mubr.msk.bf16.gmra.mxu1 %vm226_vm3, %v3351_v55 }
  0xc9   :  { %2960 = vmatprep.mubr.msk.bf16.mxu0 %vm3409_vm2, %v4760_v0  ;;  %3070 = vmatprep.mubr.msk.bf16.mxu1 %vm3409_vm2, %v4760_v0 }
  0xd0   :  { %2961 = vmatmul.mubr.msk.bf16.gmra.mxu0 %vm226_vm3, %v3352_v56  ;;  %3071 = vmatmul.mubr.msk.bf16.gmra.mxu1 %vm226_vm3, %v3353_v57 }
  0xd1   :  { %2964 = vmatprep.mubr.msk.bf16.mxu0 %vm3409_vm2, %v4760_v0  ;;  %3074 = vmatprep.mubr.msk.bf16.mxu1 %vm3409_vm2, %v4760_v0 }
  0xd8   :  { %v3763_v60 = vpop.f32.mrf.mxu0  ;;  %2965 = vmatmul.mubr.msk.bf16.gmra.mxu0 %vm226_vm3, %v3354_v58  ;;  %v3766_v61 = vpop.f32.mrf.mxu1  ;;  %3075 = vmatmul.mubr.msk.bf16.gmra.mxu1 %vm226_vm3, %v3355_v59 }
  0xd9   :  { %3088 = vmatprep.mubr.msk.bf16.mxu0 %vm3409_vm2, %v4760_v0  ;;  %3198 = vmatprep.mubr.msk.bf16.mxu1 %vm3409_vm2, %v4760_v0 }
  0xda   :  { %v2870_v63 = vpop.f32.mrf.mxu0  ;;  %v2980_v1 = vpop.f32.mrf.mxu1 }
  0xdc   :  { %v3775_v2 = vpop.f32.mrf.mxu0  ;;  %v3777_v3 = vpop.f32.mrf.mxu1 }
  0xde   :  { %v2871_v7 = vpop.f32.mrf.mxu0  ;;  %v2981_v8 = vpop.f32.mrf.mxu1 }
  0xdf   :  { %v3366_v7 = vld [vmem:[%s4757_s0 + $0x1b0] sm:$0xff]  }
  0xe0   :  { %v3787_v9 = vpop.f32.mrf.mxu0  ;;  %v3789_v10 = vpop.f32.mrf.mxu1  ;;  %3089 = vmatmul.mubr.msk.bf16.vlgmr.msra.gmra.mxu0 %vm226_vm3, %v3356_v4  ;;  %3199 = vmatmul.mubr.msk.bf16.vlgmr.msra.gmra.mxu1 %vm226_vm3, %v3357_v5  ;;  %v3367_v8 = vld [vmem:[%s4757_s0 + $0x274] sm:$0xff]  }
  0xe1   :  { %3092 = vmatprep.mubr.msk.bf16.mxu0 %vm3409_vm2, %v4760_v0  ;;  %3202 = vmatprep.mubr.msk.bf16.mxu1 %vm3409_vm2, %v4760_v0 }
  0xe2   :  { %v2874_v12 = vpop.f32.mrf.mxu0  ;;  %v2984_v13 = vpop.f32.mrf.mxu1 }
  0xe4   :  { %v3799_v14 = vpop.f32.mrf.mxu0  ;;  %v3801_v15 = vpop.f32.mrf.mxu1 }
  0xe6   :  { %v2875_v19 = vpop.f32.mrf.mxu0  ;;  %v2985_v20 = vpop.f32.mrf.mxu1 }
  0xe8   :  { %v3811_v21 = vpop.f32.mrf.mxu0  ;;  %v3813_v22 = vpop.f32.mrf.mxu1  ;;  %3093 = vmatmul.mubr.msk.bf16.gmra.mxu0 %vm226_vm3, %v3358_v16  ;;  %3203 = vmatmul.mubr.msk.bf16.gmra.mxu1 %vm226_vm3, %v3359_v17 }
  0xe9   :  { %3096 = vmatprep.mubr.msk.bf16.mxu0 %vm3409_vm2, %v4760_v0  ;;  %3206 = vmatprep.mubr.msk.bf16.mxu1 %vm3409_vm2, %v4760_v0 }
  0xea   :  { %v2878_v24 = vpop.f32.mrf.mxu0  ;;  %v2988_v25 = vpop.f32.mrf.mxu1 }
  0xec   :  { %v3823_v26 = vpop.f32.mrf.mxu0  ;;  %v3825_v27 = vpop.f32.mrf.mxu1 }
  0xee   :  { %v2879_v31 = vpop.f32.mrf.mxu0  ;;  %v2989_v32 = vpop.f32.mrf.mxu1 }
  0xef   :  { %v3368_v31 = vld [vmem:[%s4757_s0 + $0x1b8] sm:$0xff]  }
  0xf0   :  { %v3835_v33 = vpop.f32.mrf.mxu0  ;;  %v3837_v34 = vpop.f32.mrf.mxu1  ;;  %3097 = vmatmul.mubr.msk.bf16.gmra.mxu0 %vm226_vm3, %v3360_v28  ;;  %3207 = vmatmul.mubr.msk.bf16.gmra.mxu1 %vm226_vm3, %v3361_v29  ;;  %v3369_v32 = vld [vmem:[%s4757_s0 + $0x27c] sm:$0xff]  }
  0xf1   :  { %3100 = vmatprep.mubr.msk.bf16.mxu0 %vm3409_vm2, %v4760_v0  ;;  %3210 = vmatprep.mubr.msk.bf16.mxu1 %vm3409_vm2, %v4760_v0 }
  0xf2   :  { %v2882_v36 = vpop.f32.mrf.mxu0  ;;  %v2992_v37 = vpop.f32.mrf.mxu1 }
  0xf4   :  { %v3847_v38 = vpop.f32.mrf.mxu0  ;;  %v3849_v39 = vpop.f32.mrf.mxu1 }
  0xf6   :  { %v2883_v43 = vpop.f32.mrf.mxu0  ;;  %v2993_v44 = vpop.f32.mrf.mxu1 }
  0xf8   :  { %v3859_v45 = vpop.f32.mrf.mxu0  ;;  %v3861_v46 = vpop.f32.mrf.mxu1  ;;  %3101 = vmatmul.mubr.msk.bf16.gmra.mxu0 %vm226_vm3, %v3362_v40  ;;  %3211 = vmatmul.mubr.msk.bf16.gmra.mxu1 %vm226_vm3, %v3363_v41 }
  0xf9   :  { %3104 = vmatprep.mubr.msk.bf16.mxu0 %vm3409_vm2, %v4760_v0  ;;  %3214 = vmatprep.mubr.msk.bf16.mxu1 %vm3409_vm2, %v4760_v0 }
  0xfa   :  { %v2886_v48 = vpop.f32.mrf.mxu0  ;;  %v2996_v49 = vpop.f32.mrf.mxu1 }
  0xfc   :  { %v3871_v50 = vpop.f32.mrf.mxu0  ;;  %v3873_v51 = vpop.f32.mrf.mxu1 }
  0xfe   :  { %v2887_v55 = vpop.f32.mrf.mxu0  ;;  %v2997_v56 = vpop.f32.mrf.mxu1 }
  0xff   :  { %v3370_v55 = vld [vmem:[%s4757_s0 + $0x1c0] sm:$0xff]  }
 0x100   :  { %v3883_v57 = vpop.f32.mrf.mxu0  ;;  %v3885_v58 = vpop.f32.mrf.mxu1  ;;  %3105 = vmatmul.mubr.msk.bf16.gmra.mxu0 %vm226_vm3, %v3364_v52  ;;  %3215 = vmatmul.mubr.msk.bf16.gmra.mxu1 %vm226_vm3, %v3365_v53  ;;  %v3371_v56 = vld [vmem:[%s4757_s0 + $0x284] sm:$0xff]  }
 0x101   :  { %3108 = vmatprep.mubr.msk.bf16.mxu0 %vm3409_vm2, %v4760_v0  ;;  %3218 = vmatprep.mubr.msk.bf16.mxu1 %vm3409_vm2, %v4760_v0 }
 0x102   :  { %v2890_v63 = vpop.f32.mrf.mxu0  ;;  %v3000_v1 = vpop.f32.mrf.mxu1 }
 0x104   :  { %v3895_v4 = vpop.f32.mrf.mxu0  ;;  %v3897_v5 = vpop.f32.mrf.mxu1 }
 0x106   :  { %v2891_v13 = vpop.f32.mrf.mxu0  ;;  %v3001_v16 = vpop.f32.mrf.mxu1 }
 0x108   :  { %v3907_v17 = vpop.f32.mrf.mxu0  ;;  %v3909_v19 = vpop.f32.mrf.mxu1  ;;  %3109 = vmatmul.mubr.msk.bf16.gmra.mxu0 %vm226_vm3, %v3366_v7  ;;  %3219 = vmatmul.mubr.msk.bf16.gmra.mxu1 %vm226_vm3, %v3367_v8 }
 0x109   :  { %3112 = vmatprep.mubr.msk.bf16.mxu0 %vm3409_vm2, %v4760_v0  ;;  %3222 = vmatprep.mubr.msk.bf16.mxu1 %vm3409_vm2, %v4760_v0 }
 0x10a   :  { %v2894_v24 = vpop.f32.mrf.mxu0  ;;  %v3004_v25 = vpop.f32.mrf.mxu1 }
 0x10c   :  { %v3919_v28 = vpop.f32.mrf.mxu0  ;;  %v3921_v29 = vpop.f32.mrf.mxu1 }
 0x10e   :  { %v2895_v37 = vpop.f32.mrf.mxu0  ;;  %v3005_v40 = vpop.f32.mrf.mxu1 }
 0x10f   :  { %v3372_v37 = vld [vmem:[%s4757_s0 + $0x1c8] sm:$0xff]  }
 0x110   :  { %v3931_v41 = vpop.f32.mrf.mxu0  ;;  %v3933_v43 = vpop.f32.mrf.mxu1  ;;  %3113 = vmatmul.mubr.msk.bf16.gmra.mxu0 %vm226_vm3, %v3368_v31  ;;  %3223 = vmatmul.mubr.msk.bf16.gmra.mxu1 %vm226_vm3, %v3369_v32  ;;  %v3373_v40 = vld [vmem:[%s4757_s0 + $0x28c] sm:$0xff]  }
 0x111   :  { %3116 = vmatprep.mubr.msk.bf16.mxu0 %vm3409_vm2, %v4760_v0  ;;  %3226 = vmatprep.mubr.msk.bf16.mxu1 %vm3409_vm2, %v4760_v0 }
 0x112   :  { %v2898_v48 = vpop.f32.mrf.mxu0  ;;  %v3008_v49 = vpop.f32.mrf.mxu1 }
 0x114   :  { %v3943_v52 = vpop.f32.mrf.mxu0  ;;  %v3945_v53 = vpop.f32.mrf.mxu1 }
 0x116   :  { %v2899_v1 = vpop.f32.mrf.mxu0  ;;  %v3009_v7 = vpop.f32.mrf.mxu1 }
 0x118   :  { %v3955_v8 = vpop.f32.mrf.mxu0  ;;  %v3957_v13 = vpop.f32.mrf.mxu1  ;;  %3117 = vmatmul.mubr.msk.bf16.gmra.mxu0 %vm226_vm3, %v3370_v55  ;;  %3227 = vmatmul.mubr.msk.bf16.gmra.mxu1 %vm226_vm3, %v3371_v56 }
 0x119   :  { %3120 = vmatprep.mubr.msk.bf16.mxu0 %vm3409_vm2, %v4760_v0  ;;  %3230 = vmatprep.mubr.msk.bf16.mxu1 %vm3409_vm2, %v4760_v0 }
 0x11a   :  { %v2902_v24 = vpop.f32.mrf.mxu0  ;;  %v3012_v25 = vpop.f32.mrf.mxu1 }
 0x11c   :  { %v3967_v31 = vpop.f32.mrf.mxu0  ;;  %v3969_v32 = vpop.f32.mrf.mxu1 }
 0x11e   :  { %v2903_v49 = vpop.f32.mrf.mxu0  ;;  %v3013_v55 = vpop.f32.mrf.mxu1 }
 0x120   :  { %v3979_v56 = vpop.f32.mrf.mxu0  ;;  %v3981_v1 = vpop.f32.mrf.mxu1  ;;  %3121 = vmatmul.mubr.msk.bf16.gmra.mxu0 %vm226_vm3, %v3372_v37  ;;  %3231 = vmatmul.mubr.msk.bf16.gmra.mxu1 %vm226_vm3, %v3373_v40  ;;  %v3374_v37 = vld [vmem:[%s4757_s0 + $0x1d0] sm:$0xff]  }
 0x121   :  { %3124 = vmatprep.mubr.msk.bf16.mxu0 %vm3409_vm2, %v4760_v0  ;;  %3234 = vmatprep.mubr.msk.bf16.mxu1 %vm3409_vm2, %v4760_v0  ;;  %v3375_v40 = vld [vmem:[%s4757_s0 + $0x294] sm:$0xff]  }
 0x122   :  { %v2906_v24 = vpop.f32.mrf.mxu0  ;;  %v3016_v25 = vpop.f32.mrf.mxu1 }
 0x124   :  { %v3991_v49 = vpop.f32.mrf.mxu0  ;;  %v3993_v55 = vpop.f32.mrf.mxu1 }
 0x126   :  { %v2907_v48 = vpop.f32.mrf.mxu0  ;;  %v3017_v16 = vpop.f32.mrf.mxu1 }
 0x128   :  { %v4003_v63 = vpop.f32.mrf.mxu0  ;;  %v4005_v24 = vpop.f32.mrf.mxu1  ;;  %3125 = vmatmul.mubr.msk.bf16.gmra.mxu0 %vm226_vm3, %v3374_v37  ;;  %3235 = vmatmul.mubr.msk.bf16.gmra.mxu1 %vm226_vm3, %v3375_v40  ;;  %v3376_v37 = vld [vmem:[%s4757_s0 + $0x1d8] sm:$0xff]  }
 0x129   :  { %3128 = vmatprep.mubr.msk.bf16.mxu0 %vm3409_vm2, %v4760_v0  ;;  %3238 = vmatprep.mubr.msk.bf16.mxu1 %vm3409_vm2, %v4760_v0  ;;  %v3377_v40 = vld [vmem:[%s4757_s0 + $0x29c] sm:$0xff]  }
 0x12a   :  { %v2910_v7 = vpop.f32.mrf.mxu0  ;;  %v3020_v48 = vpop.f32.mrf.mxu1 }
 0x12c   :  { %v4015_v16 = vpop.f32.mrf.mxu0  ;;  %v4017_v44 = vpop.f32.mrf.mxu1 }
 0x12e   :  { %v2911_v36 = vpop.f32.mrf.mxu0  ;;  %v3021_v20 = vpop.f32.mrf.mxu1 }
 0x130   :  { %v4027_v12 = vpop.f32.mrf.mxu0  ;;  %v4029_v7 = vpop.f32.mrf.mxu1  ;;  %3129 = vmatmul.mubr.msk.bf16.gmra.mxu0 %vm226_vm3, %v3376_v37  ;;  %3239 = vmatmul.mubr.msk.bf16.gmra.mxu1 %vm226_vm3, %v3377_v40  ;;  %v3378_v37 = vld [vmem:[%s4757_s0 + $0x1e0] sm:$0xff]  }
 0x131   :  { %3132 = vmatprep.mubr.msk.bf16.mxu0 %vm3409_vm2, %v4760_v0  ;;  %3242 = vmatprep.mubr.msk.bf16.mxu1 %vm3409_vm2, %v4760_v0  ;;  %v3379_v40 = vld [vmem:[%s4757_s0 + $0x2a4] sm:$0xff]  }
 0x132   :  { %v2914_v25 = vpop.f32.mrf.mxu0  ;;  %v3024_v36 = vpop.f32.mrf.mxu1 }
 0x134   :  { %v4039_v20 = vpop.f32.mrf.mxu0  ;;  %v4041_v59 = vpop.f32.mrf.mxu1 }
 0x136   :  { %v2915_v54 = vpop.f32.mrf.mxu0  ;;  %v3025_v47 = vpop.f32.mrf.mxu1 }
 0x138   :  { %v4051_v42 = vpop.f32.mrf.mxu0  ;;  %v4053_v25 = vpop.f32.mrf.mxu1  ;;  %3133 = vmatmul.mubr.msk.bf16.gmra.mxu0 %vm226_vm3, %v3378_v37  ;;  %3243 = vmatmul.mubr.msk.bf16.gmra.mxu1 %vm226_vm3, %v3379_v40  ;;  %v3380_v37 = vld [vmem:[%s4757_s0 + $0x1e8] sm:$0xff]  }
 0x139   :  { %4812 = vst [vmem:[#allocation2_spill] sm:$0xff] %v4051_v42  ;;  %4813 = vst [vmem:[#allocation3_spill] sm:$0xff] %v4053_v25  ;;  %3136 = vmatprep.mubr.msk.bf16.mxu0 %vm3409_vm2, %v4760_v0  ;;  %3246 = vmatprep.mubr.msk.bf16.mxu1 %vm3409_vm2, %v4760_v0  ;;  %v3381_v40 = vld [vmem:[%s4757_s0 + $0x2ac] sm:$0xff]  }
 0x13a   :  { %v2918_v48 = vpop.f32.mrf.mxu0  ;;  %v3028_v54 = vpop.f32.mrf.mxu1 }
 0x13c   :  { %v4063_v47 = vpop.f32.mrf.mxu0  ;;  %v4065_v35 = vpop.f32.mrf.mxu1 }
 0x13d   :  { %4814 = vst [vmem:[#allocation4_spill] sm:$0xff] %v4063_v47  ;;  %4815 = vst [vmem:[#allocation5_spill] sm:$0xff] %v4065_v35 }
 0x13e   :  { %v2919_v30 = vpop.f32.mrf.mxu0  ;;  %v3029_v23 = vpop.f32.mrf.mxu1 }
 0x140   :  { %v4075_v18 = vpop.f32.mrf.mxu0  ;;  %v4077_v48 = vpop.f32.mrf.mxu1  ;;  %3137 = vmatmul.mubr.msk.bf16.gmra.mxu0 %vm226_vm3, %v3380_v37  ;;  %3247 = vmatmul.mubr.msk.bf16.gmra.mxu1 %vm226_vm3, %v3381_v40  ;;  %v3382_v37 = vld [vmem:[%s4757_s0 + $0x1f0] sm:$0xff]  }
 0x141   :  { %4816 = vst [vmem:[#allocation6_spill] sm:$0xff] %v4075_v18  ;;  %4817 = vst [vmem:[#allocation7_spill] sm:$0xff] %v4077_v48  ;;  %3140 = vmatprep.mubr.msk.bf16.mxu0 %vm3409_vm2, %v4760_v0  ;;  %3250 = vmatprep.mubr.msk.bf16.mxu1 %vm3409_vm2, %v4760_v0  ;;  %v3383_v40 = vld [vmem:[%s4757_s0 + $0x2b4] sm:$0xff]   ;;  %v4822_v48 = vmov 0.0  }
 0x142   :  { %v2922_v36 = vpop.f32.mrf.mxu0  ;;  %v3032_v30 = vpop.f32.mrf.mxu1 }
 0x144   :  { %v4087_v23 = vpop.f32.mrf.mxu0  ;;  %v4089_v11 = vpop.f32.mrf.mxu1 }
 0x145   :  { %4818 = vst [vmem:[#allocation8_spill] sm:$0xff] %v4087_v23  ;;  %4819 = vst [vmem:[#allocation9_spill] sm:$0xff] %v4089_v11 }
 0x146   :  { %v2923_v6 = vpop.f32.mrf.mxu0  ;;  %v3033_v62 = vpop.f32.mrf.mxu1 }
 0x148   :  { %v4099_v0 = vpop.f32.mrf.mxu0  ;;  %v4101_v36 = vpop.f32.mrf.mxu1  ;;  %3141 = vmatmul.mubr.msk.bf16.gmra.mxu0 %vm226_vm3, %v3382_v37  ;;  %3251 = vmatmul.mubr.msk.bf16.gmra.mxu1 %vm226_vm3, %v3383_v40  ;;  %v3384_v37 = vld [vmem:[%s4757_s0 + $0x1f8] sm:$0xff]  }
 0x149   :  { %4820 = vst [vmem:[#allocation10_spill] sm:$0xff] %v4099_v0  ;;  %4821 = vst [vmem:[#allocation11_spill] sm:$0xff] %v4101_v36  ;;  %3144 = vmatprep.mubr.msk.bf16.mxu0 %vm3409_vm2, %v4822_v48  ;;  %3254 = vmatprep.mubr.msk.bf16.mxu1 %vm3409_vm2, %v4822_v48  ;;  %v3385_v40 = vld [vmem:[%s4757_s0 + $0x2bc] sm:$0xff]  }
 0x14a   :  { %v2926_v54 = vpop.f32.mrf.mxu0  ;;  %v3036_v6 = vpop.f32.mrf.mxu1 }
 0x14c   :  { %v4111_v62 = vpop.f32.mrf.mxu0  ;;  %v4113_v11 = vpop.f32.mrf.mxu1 }
 0x14d   :  { %4823 = vst [vmem:[#allocation12_spill] sm:$0xff] %v4111_v62  ;;  %4824 = vst [vmem:[#allocation13_spill] sm:$0xff] %v4113_v11 }
 0x14e   :  { %v2927_v36 = vpop.f32.mrf.mxu0  ;;  %v3037_v0 = vpop.f32.mrf.mxu1 }
 0x150   :  { %v4123_v23 = vpop.f32.mrf.mxu0  ;;  %v4125_v54 = vpop.f32.mrf.mxu1  ;;  %3145 = vmatmul.mubr.msk.bf16.gmra.mxu0 %vm226_vm3, %v3384_v37  ;;  %3255 = vmatmul.mubr.msk.bf16.gmra.mxu1 %vm226_vm3, %v3385_v40  ;;  %v3386_v37 = vld [vmem:[%s4757_s0 + $0x200] sm:$0xff]  }
 0x151   :  { %4825 = vst [vmem:[#allocation14_spill] sm:$0xff] %v4123_v23  ;;  %4826 = vst [vmem:[#allocation15_spill] sm:$0xff] %v4125_v54  ;;  %3148 = vmatprep.mubr.msk.bf16.mxu0 %vm3409_vm2, %v4822_v48  ;;  %3258 = vmatprep.mubr.msk.bf16.mxu1 %vm3409_vm2, %v4822_v48  ;;  %v3387_v40 = vld [vmem:[%s4757_s0 + $0x2c4] sm:$0xff]  }
 0x152   :  { %v2930_v30 = vpop.f32.mrf.mxu0  ;;  %v3040_v36 = vpop.f32.mrf.mxu1 }
 0x154   :  { %v4135_v0 = vpop.f32.mrf.mxu0  ;;  %v4137_v11 = vpop.f32.mrf.mxu1 }
 0x155   :  { %4827 = vst [vmem:[#allocation16_spill] sm:$0xff] %v4135_v0  ;;  %4828 = vst [vmem:[#allocation17_spill] sm:$0xff] %v4137_v11 }
 0x156   :  { %v2931_v54 = vpop.f32.mrf.mxu0  ;;  %v3041_v23 = vpop.f32.mrf.mxu1 }
 0x158   :  { %v4147_v62 = vpop.f32.mrf.mxu0  ;;  %v4149_v30 = vpop.f32.mrf.mxu1  ;;  %3149 = vmatmul.mubr.msk.bf16.gmra.mxu0 %vm226_vm3, %v3386_v37  ;;  %3259 = vmatmul.mubr.msk.bf16.gmra.mxu1 %vm226_vm3, %v3387_v40  ;;  %v3388_v37 = vld [vmem:[%s4757_s0 + $0x208] sm:$0xff]  }
 0x159   :  { %4829 = vst [vmem:[#allocation18_spill] sm:$0xff] %v4147_v62  ;;  %4830 = vst [vmem:[#allocation19_spill] sm:$0xff] %v4149_v30  ;;  %3152 = vmatprep.mubr.msk.bf16.mxu0 %vm3409_vm2, %v4822_v48  ;;  %3262 = vmatprep.mubr.msk.bf16.mxu1 %vm3409_vm2, %v4822_v48  ;;  %v3389_v40 = vld [vmem:[%s4757_s0 + $0x2cc] sm:$0xff]  }
 0x15a   :  { %v2934_v6 = vpop.f32.mrf.mxu0  ;;  %v3044_v54 = vpop.f32.mrf.mxu1 }
 0x15c   :  { %v4159_v23 = vpop.f32.mrf.mxu0  ;;  %v4161_v11 = vpop.f32.mrf.mxu1 }
 0x15d   :  { %4831 = vst [vmem:[#allocation20_spill] sm:$0xff] %v4159_v23  ;;  %4832 = vst [vmem:[#allocation21_spill] sm:$0xff] %v4161_v11 }
 0x15e   :  { %v2935_v30 = vpop.f32.mrf.mxu0  ;;  %v3045_v62 = vpop.f32.mrf.mxu1 }
 0x160   :  { %v4171_v0 = vpop.f32.mrf.mxu0  ;;  %v4173_v6 = vpop.f32.mrf.mxu1  ;;  %3153 = vmatmul.mubr.msk.bf16.gmra.mxu0 %vm226_vm3, %v3388_v37  ;;  %3263 = vmatmul.mubr.msk.bf16.gmra.mxu1 %vm226_vm3, %v3389_v40  ;;  %v3390_v37 = vld [vmem:[%s4757_s0 + $0x210] sm:$0xff]  }
 0x161   :  { %4833 = vst [vmem:[#allocation22_spill] sm:$0xff] %v4171_v0  ;;  %4834 = vst [vmem:[#allocation23_spill] sm:$0xff] %v4173_v6  ;;  %3156 = vmatprep.mubr.msk.bf16.mxu0 %vm3409_vm2, %v4822_v48  ;;  %3266 = vmatprep.mubr.msk.bf16.mxu1 %vm3409_vm2, %v4822_v48  ;;  %v3391_v40 = vld [vmem:[%s4757_s0 + $0x2d4] sm:$0xff]  }
 0x162   :  { %v2938_v36 = vpop.f32.mrf.mxu0  ;;  %v3048_v30 = vpop.f32.mrf.mxu1 }
 0x164   :  { %v4183_v62 = vpop.f32.mrf.mxu0  ;;  %v4185_v11 = vpop.f32.mrf.mxu1 }
 0x165   :  { %4835 = vst [vmem:[#allocation24_spill] sm:$0xff] %v4183_v62  ;;  %4836 = vst [vmem:[#allocation25_spill] sm:$0xff] %v4185_v11 }
 0x166   :  { %v2939_v6 = vpop.f32.mrf.mxu0  ;;  %v3049_v0 = vpop.f32.mrf.mxu1 }
 0x168   :  { %v4195_v23 = vpop.f32.mrf.mxu0  ;;  %v4197_v36 = vpop.f32.mrf.mxu1  ;;  %3157 = vmatmul.mubr.msk.bf16.gmra.mxu0 %vm226_vm3, %v3390_v37  ;;  %3267 = vmatmul.mubr.msk.bf16.gmra.mxu1 %vm226_vm3, %v3391_v40  ;;  %v3392_v37 = vld [vmem:[%s4757_s0 + $0x218] sm:$0xff]  }
 0x169   :  { %4837 = vst [vmem:[#allocation26_spill] sm:$0xff] %v4195_v23  ;;  %4838 = vst [vmem:[#allocation27_spill] sm:$0xff] %v4197_v36  ;;  %3160 = vmatprep.mubr.msk.bf16.mxu0 %vm3409_vm2, %v4822_v48  ;;  %3270 = vmatprep.mubr.msk.bf16.mxu1 %vm3409_vm2, %v4822_v48  ;;  %v3393_v40 = vld [vmem:[%s4757_s0 + $0x2dc] sm:$0xff]  }
 0x16a   :  { %v2942_v54 = vpop.f32.mrf.mxu0  ;;  %v3052_v6 = vpop.f32.mrf.mxu1 }
 0x16c   :  { %v4207_v0 = vpop.f32.mrf.mxu0  ;;  %v4209_v11 = vpop.f32.mrf.mxu1 }
 0x16d   :  { %4839 = vst [vmem:[#allocation28_spill] sm:$0xff] %v4207_v0  ;;  %4840 = vst [vmem:[#allocation29_spill] sm:$0xff] %v4209_v11 }
 0x16e   :  { %v2943_v36 = vpop.f32.mrf.mxu0  ;;  %v3053_v23 = vpop.f32.mrf.mxu1 }
 0x170   :  { %v4219_v62 = vpop.f32.mrf.mxu0  ;;  %v4221_v54 = vpop.f32.mrf.mxu1  ;;  %3161 = vmatmul.mubr.msk.bf16.gmra.mxu0 %vm226_vm3, %v3392_v37  ;;  %3271 = vmatmul.mubr.msk.bf16.gmra.mxu1 %vm226_vm3, %v3393_v40  ;;  %v3394_v37 = vld [vmem:[%s4757_s0 + $0x220] sm:$0xff]  }
 0x171   :  { %4841 = vst [vmem:[#allocation30_spill] sm:$0xff] %v4219_v62  ;;  %4842 = vst [vmem:[#allocation31_spill] sm:$0xff] %v4221_v54  ;;  %3164 = vmatprep.mubr.msk.bf16.mxu0 %vm3409_vm2, %v4822_v48  ;;  %3274 = vmatprep.mubr.msk.bf16.mxu1 %vm3409_vm2, %v4822_v48  ;;  %v3395_v40 = vld [vmem:[%s4757_s0 + $0x2e4] sm:$0xff]  }
 0x172   :  { %v2946_v30 = vpop.f32.mrf.mxu0  ;;  %v3056_v36 = vpop.f32.mrf.mxu1 }
 0x174   :  { %v4231_v23 = vpop.f32.mrf.mxu0  ;;  %v4233_v11 = vpop.f32.mrf.mxu1 }
 0x175   :  { %4843 = vst [vmem:[#allocation32_spill] sm:$0xff] %v4231_v23  ;;  %4844 = vst [vmem:[#allocation33_spill] sm:$0xff] %v4233_v11 }
 0x176   :  { %v2947_v54 = vpop.f32.mrf.mxu0  ;;  %v3057_v62 = vpop.f32.mrf.mxu1 }
 0x178   :  { %v4243_v0 = vpop.f32.mrf.mxu0  ;;  %v4245_v30 = vpop.f32.mrf.mxu1  ;;  %3165 = vmatmul.mubr.msk.bf16.gmra.mxu0 %vm226_vm3, %v3394_v37  ;;  %3275 = vmatmul.mubr.msk.bf16.gmra.mxu1 %vm226_vm3, %v3395_v40  ;;  %v3396_v37 = vld [vmem:[%s4757_s0 + $0x228] sm:$0xff]  }
 0x179   :  { %4845 = vst [vmem:[#allocation34_spill] sm:$0xff] %v4243_v0  ;;  %4846 = vst [vmem:[#allocation35_spill] sm:$0xff] %v4245_v30  ;;  %3168 = vmatprep.mubr.msk.bf16.mxu0 %vm3409_vm2, %v4822_v48  ;;  %3278 = vmatprep.mubr.msk.bf16.mxu1 %vm3409_vm2, %v4822_v48  ;;  %v3397_v40 = vld [vmem:[%s4757_s0 + $0x2ec] sm:$0xff]  }
 0x17a   :  { %v2950_v6 = vpop.f32.mrf.mxu0  ;;  %v3060_v54 = vpop.f32.mrf.mxu1 }
 0x17c   :  { %v4255_v62 = vpop.f32.mrf.mxu0  ;;  %v4257_v11 = vpop.f32.mrf.mxu1 }
 0x17d   :  { %4847 = vst [vmem:[#allocation36_spill] sm:$0xff] %v4255_v62  ;;  %4848 = vst [vmem:[#allocation37_spill] sm:$0xff] %v4257_v11 }
 0x17e   :  { %v2951_v30 = vpop.f32.mrf.mxu0  ;;  %v3061_v0 = vpop.f32.mrf.mxu1 }
 0x180   :  { %v4267_v23 = vpop.f32.mrf.mxu0  ;;  %v4269_v6 = vpop.f32.mrf.mxu1  ;;  %3169 = vmatmul.mubr.msk.bf16.gmra.mxu0 %vm226_vm3, %v3396_v37  ;;  %3279 = vmatmul.mubr.msk.bf16.gmra.mxu1 %vm226_vm3, %v3397_v40  ;;  %v3398_v37 = vld [vmem:[%s4757_s0 + $0x230] sm:$0xff]  }
 0x181   :  { %4849 = vst [vmem:[#allocation38_spill] sm:$0xff] %v4267_v23  ;;  %4850 = vst [vmem:[#allocation39_spill] sm:$0xff] %v4269_v6  ;;  %3172 = vmatprep.mubr.msk.bf16.mxu0 %vm3409_vm2, %v4822_v48  ;;  %3282 = vmatprep.mubr.msk.bf16.mxu1 %vm3409_vm2, %v4822_v48  ;;  %v3399_v40 = vld [vmem:[%s4757_s0 + $0x2f4] sm:$0xff]  }
 0x182   :  { %v2954_v36 = vpop.f32.mrf.mxu0  ;;  %v3064_v30 = vpop.f32.mrf.mxu1 }
 0x184   :  { %v4279_v0 = vpop.f32.mrf.mxu0  ;;  %v4281_v11 = vpop.f32.mrf.mxu1 }
 0x185   :  { %4851 = vst [vmem:[#allocation40_spill] sm:$0xff] %v4279_v0  ;;  %4852 = vst [vmem:[#allocation41_spill] sm:$0xff] %v4281_v11 }
 0x186   :  { %v2955_v6 = vpop.f32.mrf.mxu0  ;;  %v3065_v23 = vpop.f32.mrf.mxu1 }
 0x188   :  { %v4291_v62 = vpop.f32.mrf.mxu0  ;;  %v4293_v36 = vpop.f32.mrf.mxu1  ;;  %3173 = vmatmul.mubr.msk.bf16.gmra.mxu0 %vm226_vm3, %v3398_v37  ;;  %3283 = vmatmul.mubr.msk.bf16.gmra.mxu1 %vm226_vm3, %v3399_v40  ;;  %v3400_v37 = vld [vmem:[%s4757_s0 + $0x238] sm:$0xff]  }
 0x189   :  { %4853 = vst [vmem:[#allocation42_spill] sm:$0xff] %v4291_v62  ;;  %4854 = vst [vmem:[#allocation43_spill] sm:$0xff] %v4293_v36  ;;  %3176 = vmatprep.mubr.msk.bf16.mxu0 %vm3409_vm2, %v4822_v48  ;;  %3286 = vmatprep.mubr.msk.bf16.mxu1 %vm3409_vm2, %v4822_v48  ;;  %v3401_v40 = vld [vmem:[%s4757_s0 + $0x2fc] sm:$0xff]  }
 0x18a   :  { %v2958_v54 = vpop.f32.mrf.mxu0  ;;  %v3068_v6 = vpop.f32.mrf.mxu1 }
 0x18c   :  { %v4303_v23 = vpop.f32.mrf.mxu0  ;;  %v4305_v11 = vpop.f32.mrf.mxu1 }
 0x18d   :  { %4855 = vst [vmem:[#allocation44_spill] sm:$0xff] %v4303_v23  ;;  %4856 = vst [vmem:[#allocation45_spill] sm:$0xff] %v4305_v11 }
 0x18e   :  { %v2959_v36 = vpop.f32.mrf.mxu0  ;;  %v3069_v62 = vpop.f32.mrf.mxu1 }
 0x190   :  { %v4315_v0 = vpop.f32.mrf.mxu0  ;;  %v4317_v54 = vpop.f32.mrf.mxu1  ;;  %3177 = vmatmul.mubr.msk.bf16.gmra.mxu0 %vm226_vm3, %v3400_v37  ;;  %3287 = vmatmul.mubr.msk.bf16.gmra.mxu1 %vm226_vm3, %v3401_v40  ;;  %v3402_v37 = vld [vmem:[%s4757_s0 + $0x240] sm:$0xff]  }
 0x191   :  { %4857 = vst [vmem:[#allocation46_spill] sm:$0xff] %v4315_v0  ;;  %4858 = vst [vmem:[#allocation47_spill] sm:$0xff] %v4317_v54  ;;  %3180 = vmatprep.mubr.msk.bf16.mxu0 %vm3409_vm2, %v4822_v48  ;;  %3290 = vmatprep.mubr.msk.bf16.mxu1 %vm3409_vm2, %v4822_v48  ;;  %v3403_v40 = vld [vmem:[%s4757_s0 + $0x304] sm:$0xff]  }
 0x192   :  { %v2962_v30 = vpop.f32.mrf.mxu0  ;;  %v3072_v36 = vpop.f32.mrf.mxu1 }
 0x194   :  { %v4327_v62 = vpop.f32.mrf.mxu0  ;;  %v4329_v11 = vpop.f32.mrf.mxu1 }
 0x195   :  { %4859 = vst [vmem:[#allocation48_spill] sm:$0xff] %v4327_v62  ;;  %4860 = vst [vmem:[#allocation49_spill] sm:$0xff] %v4329_v11  ;;  %v3404_v62 = vld [vmem:[%s4757_s0 + $0x248] ss:$0 sps:$4 sm:$0xff]  }
 0x196   :  { %v2963_v54 = vpop.f32.mrf.mxu0  ;;  %v3073_v0 = vpop.f32.mrf.mxu1 }
 0x198   :  { %v4339_v23 = vpop.f32.mrf.mxu0  ;;  %v4341_v30 = vpop.f32.mrf.mxu1  ;;  %3181 = vmatmul.mubr.msk.bf16.gmra.mxu0 %vm226_vm3, %v3402_v37  ;;  %3291 = vmatmul.mubr.msk.bf16.gmra.mxu1 %vm226_vm3, %v3403_v40  ;;  %v3405_v37 = vld [vmem:[%s4757_s0 + $0x30c] ss:$0 sps:$4 sm:$0xff]  }
 0x199   :  { %4861 = vst [vmem:[#allocation50_spill] sm:$0xff] %v4339_v23  ;;  %4862 = vst [vmem:[#allocation51_spill] sm:$0xff] %v4341_v30  ;;  %3184 = vmatprep.mubr.msk.bf16.mxu0 %vm3409_vm2, %v4822_v48  ;;  %3294 = vmatprep.mubr.msk.bf16.mxu1 %vm3409_vm2, %v4822_v48  ;;  %v4863_v48 = vmax.f32 %v3763_v60, %v3766_v61 }
 0x19a   :  { %v2966_v6 = vpop.f32.mrf.mxu0  ;;  %v3076_v54 = vpop.f32.mrf.mxu1 }
 0x19b   :  { %v4365_v6 = vld [vmem:[%s4758_s2] ss:$0 sm:$0xff] }
 0x19c   :  { %v538_v0 = vpop.f32.mrf.mxu0  ;;  %v1018_v11 = vpop.f32.mrf.mxu1 }
 0x19e   :  { %v2967_v40 = vpop.f32.mrf.mxu0  ;;  %v3077_v36 = vpop.f32.mrf.mxu1 }
 0x1a0   :  { %v1352_v30 = vpop.f32.mrf.mxu0  ;;  %3185 = vmatmul.mubr.msk.bf16.gmra.mxu0 %vm226_vm3, %v3404_v62  ;;  %v1881_v23 = vpop.f32.mrf.mxu1  ;;  %3295 = vmatmul.mubr.msk.bf16.gmra.mxu1 %vm226_vm3, %v3405_v37  ;;  %v4864_v62 = vmax.f32 %v3775_v2, %v3777_v3 }
 0x1a1   :  { %v1550_v11 = vmax.f32 %v4863_v48, %v1352_v30 }
 0x1a2   :  { %v3090_v54 = vpop.f32.mrf.mxu0  ;;  %v3200_v0 = vpop.f32.mrf.mxu1 }
 0x1a3   :  { %v2079_v18 = vmax.f32 %v1550_v11, %v1881_v23  ;;  %v4865_v23 = vmax.f32 %v3787_v9, %v3789_v10 }
 0x1a4   :  { %v1355_v40 = vpop.f32.mrf.mxu0  ;;  %v1884_v36 = vpop.f32.mrf.mxu1 }
 0x1a5   :  { %v2135_v35 = vadd.f32 %v4365_v6, %v2079_v18  ;;  %v1551_v37 = vmax.f32 %v4864_v62, %v1355_v40 }
 0x1a6   :  { %v3091_v47 = vpop.f32.mrf.mxu0  ;;  %v3201_v25 = vpop.f32.mrf.mxu1 }
 0x1a7   :  { %vm2184_vm4 = vcmp.gt.f32.partialorder %v2135_v35, 0.0  ;;  %v2233_v60 = vmul.f32 0.01, %v2135_v35  ;;  %v2080_v61 = vmax.f32 %v1551_v37, %v1884_v36  ;;  %v4866_v36 = vmax.f32 %v3799_v14, %v3801_v15 }
 0x1a8   :  { %v1360_v30 = vpop.f32.mrf.mxu0  ;;  %v1889_v48 = vpop.f32.mrf.mxu1 }
 0x1a9   :  { %v2282_v42 = vsel %vm2184_vm4, %v2135_v35, %v2233_v60  ;;  %v2136_v54 = vadd.f32 %v4365_v6, %v2080_v61  ;;  %v1552_v11 = vmax.f32 %v4865_v23, %v1360_v30 }
 0x1aa   :  { %2332 = vst.msk [vmem:[%s4759_s3] sm:$0xff] %vm2331_vm5, %v2282_v42  ;;  %v3094_v2 = vpop.f32.mrf.mxu0  ;;  %v3204_v3 = vpop.f32.mrf.mxu1 }
 0x1ab   :  { %vm2185_vm6 = vcmp.gt.f32.partialorder %v2136_v54, 0.0  ;;  %v2234_v18 = vmul.f32 0.01, %v2136_v54  ;;  %v2081_v25 = vmax.f32 %v1552_v11, %v1889_v48 }
 0x1ac   :  { %v1363_v47 = vpop.f32.mrf.mxu0  ;;  %v1892_v0 = vpop.f32.mrf.mxu1 }
 0x1ad   :  { %v2283_v40 = vsel %vm2185_vm6, %v2136_v54, %v2234_v18  ;;  %v2137_v35 = vadd.f32 %v4365_v6, %v2081_v25  ;;  %v1553_v9 = vmax.f32 %v4866_v36, %v1363_v47  ;;  %v4867_v54 = vmax.f32 %v3811_v21, %v3813_v22 }
 0x1ae   :  { %2333 = vst.msk [vmem:[%s4759_s3 + $0x8] sm:$0xff] %vm2331_vm5, %v2283_v40  ;;  %v3095_v10 = vpop.f32.mrf.mxu0  ;;  %v3205_v42 = vpop.f32.mrf.mxu1 }
 0x1af   :  { %vm2186_vm7 = vcmp.gt.f32.partialorder %v2137_v35, 0.0  ;;  %v2235_v62 = vmul.f32 0.01, %v2137_v35  ;;  %v2082_v37 = vmax.f32 %v1553_v9, %v1892_v0  ;;  %v4868_v0 = vmax.f32 %v3823_v26, %v3825_v27 }
 0x1b0   :  { %v1368_v60 = vpop.f32.mrf.mxu0  ;;  %v1897_v61 = vpop.f32.mrf.mxu1 }
 0x1b1   :  { %v2284_v30 = vsel %vm2186_vm7, %v2137_v35, %v2235_v62  ;;  %v2138_v48 = vadd.f32 %v4365_v6, %v2082_v37  ;;  %v1554_v14 = vmax.f32 %v4867_v54, %v1368_v60  ;;  %v4869_v37 = vmax.f32 %v3835_v33, %v3837_v34 }
 0x1b2   :  { %2334 = vst.msk [vmem:[%s4759_s3 + $0x10] sm:$0xff] %vm2331_vm5, %v2284_v30  ;;  %v3098_v15 = vpop.f32.mrf.mxu0  ;;  %v3208_v23 = vpop.f32.mrf.mxu1 }
 0x1b3   :  { %vm2187_vm8 = vcmp.gt.f32.partialorder %v2138_v48, 0.0  ;;  %v2236_v11 = vmul.f32 0.01, %v2138_v48  ;;  %v2083_v2 = vmax.f32 %v1554_v14, %v1897_v61  ;;  %v4870_v23 = vmax.f32 %v3847_v38, %v3849_v39 }
 0x1b4   :  { %v1371_v3 = vpop.f32.mrf.mxu0  ;;  %v1900_v18 = vpop.f32.mrf.mxu1 }
 0x1b5   :  { %v2285_v25 = vsel %vm2187_vm8, %v2138_v48, %v2236_v11  ;;  %v2139_v47 = vadd.f32 %v4365_v6, %v2083_v2  ;;  %v1555_v21 = vmax.f32 %v4868_v0, %v1371_v3 }
 0x1b6   :  { %2335 = vst.msk [vmem:[%s4759_s3 + $0x18] sm:$0xff] %vm2331_vm5, %v2285_v25  ;;  %v3099_v22 = vpop.f32.mrf.mxu0  ;;  %v3209_v40 = vpop.f32.mrf.mxu1 }
 0x1b7   :  { %vm2188_vm9 = vcmp.gt.f32.partialorder %v2139_v47, 0.0  ;;  %v2237_v35 = vmul.f32 0.01, %v2139_v47  ;;  %v2084_v36 = vmax.f32 %v1555_v21, %v1900_v18  ;;  %v4871_v21 = vmax.f32 %v3859_v45, %v3861_v46 }
 0x1b8   :  { %v1376_v9 = vpop.f32.mrf.mxu0  ;;  %v1905_v10 = vpop.f32.mrf.mxu1 }
 0x1b9   :  { %v2286_v42 = vsel %vm2188_vm9, %v2139_v47, %v2237_v35  ;;  %v2140_v62 = vadd.f32 %v4365_v6, %v2084_v36  ;;  %v1556_v26 = vmax.f32 %v4869_v37, %v1376_v9 }
 0x1ba   :  { %2336 = vst.msk [vmem:[%s4759_s3 + $0x20] sm:$0xff] %vm2331_vm5, %v2286_v42  ;;  %v3102_v27 = vpop.f32.mrf.mxu0  ;;  %v3212_v60 = vpop.f32.mrf.mxu1 }
 0x1bb   :  { %vm2189_vm10 = vcmp.gt.f32.partialorder %v2140_v62, 0.0  ;;  %v2238_v61 = vmul.f32 0.01, %v2140_v62  ;;  %v2085_v30 = vmax.f32 %v1556_v26, %v1905_v10 }
 0x1bc   :  { %v1379_v48 = vpop.f32.mrf.mxu0  ;;  %v1908_v54 = vpop.f32.mrf.mxu1 }
 0x1bd   :  { %v2287_v14 = vsel %vm2189_vm10, %v2140_v62, %v2238_v61  ;;  %v2141_v15 = vadd.f32 %v4365_v6, %v2085_v30  ;;  %v1557_v33 = vmax.f32 %v4870_v23, %v1379_v48  ;;  %v4872_v62 = vmax.f32 %v3871_v50, %v3873_v51 }
 0x1be   :  { %2337 = vst.msk [vmem:[%s4759_s3 + $0x28] sm:$0xff] %vm2331_vm5, %v2287_v14  ;;  %v3103_v34 = vpop.f32.mrf.mxu0  ;;  %v3213_v11 = vpop.f32.mrf.mxu1 }
 0x1bf   :  { %vm2190_vm11 = vcmp.gt.f32.partialorder %v2141_v15, 0.0  ;;  %v2239_v2 = vmul.f32 0.01, %v2141_v15  ;;  %v2086_v3 = vmax.f32 %v1557_v33, %v1908_v54  ;;  %v4873_v54 = vmax.f32 %v3883_v57, %v3885_v58 }
 0x1c0   :  { %v1384_v18 = vpop.f32.mrf.mxu0  ;;  %v1913_v25 = vpop.f32.mrf.mxu1 }
 0x1c1   :  { %v2288_v47 = vsel %vm2190_vm11, %v2141_v15, %v2239_v2  ;;  %v2142_v0 = vadd.f32 %v4365_v6, %v2086_v3  ;;  %v1558_v38 = vmax.f32 %v4871_v21, %v1384_v18  ;;  %v4874_v3 = vmax.f32 %v3895_v4, %v3897_v5 }
 0x1c2   :  { %2338 = vst.msk [vmem:[%s4759_s3 + $0x30] sm:$0xff] %vm2331_vm5, %v2288_v47  ;;  %v3106_v39 = vpop.f32.mrf.mxu0  ;;  %v3216_v22 = vpop.f32.mrf.mxu1 }
 0x1c3   :  { %vm2191_vm12 = vcmp.gt.f32.partialorder %v2142_v0, 0.0  ;;  %v2240_v40 = vmul.f32 0.01, %v2142_v0  ;;  %v2087_v35 = vmax.f32 %v1558_v38, %v1913_v25  ;;  %v4875_v22 = vmax.f32 %v3907_v17, %v3909_v19 }
 0x1c4   :  { %v1387_v36 = vpop.f32.mrf.mxu0  ;;  %v1916_v9 = vpop.f32.mrf.mxu1 }
 0x1c5   :  { %v2289_v10 = vsel %vm2191_vm12, %v2142_v0, %v2240_v40  ;;  %v2143_v42 = vadd.f32 %v4365_v6, %v2087_v35  ;;  %v1559_v45 = vmax.f32 %v4872_v62, %v1387_v36 }
 0x1c6   :  { %2339 = vst.msk [vmem:[%s4759_s3 + $0x38] sm:$0xff] %vm2331_vm5, %v2289_v10  ;;  %v3107_v46 = vpop.f32.mrf.mxu0  ;;  %v3217_v37 = vpop.f32.mrf.mxu1 }
 0x1c7   :  { %vm2192_vm13 = vcmp.gt.f32.partialorder %v2143_v42, 0.0  ;;  %v2241_v26 = vmul.f32 0.01, %v2143_v42  ;;  %v2088_v27 = vmax.f32 %v1559_v45, %v1916_v9  ;;  %v4876_v45 = vmax.f32 %v3919_v28, %v3921_v29 }
 0x1c8   :  { %v1392_v60 = vpop.f32.mrf.mxu0  ;;  %v1921_v61 = vpop.f32.mrf.mxu1 }
 0x1c9   :  { %v2290_v30 = vsel %vm2192_vm13, %v2143_v42, %v2241_v26  ;;  %v2144_v48 = vadd.f32 %v4365_v6, %v2088_v27  ;;  %v1560_v50 = vmax.f32 %v4873_v54, %v1392_v60 }
 0x1ca   :  { %2340 = vst.msk [vmem:[%s4759_s3 + $0x40] sm:$0xff] %vm2331_vm5, %v2290_v30  ;;  %v3110_v51 = vpop.f32.mrf.mxu0  ;;  %v3220_v14 = vpop.f32.mrf.mxu1 }
 0x1cb   :  { %vm2193_vm14 = vcmp.gt.f32.partialorder %v2144_v48, 0.0  ;;  %v2242_v15 = vmul.f32 0.01, %v2144_v48  ;;  %v2089_v23 = vmax.f32 %v1560_v50, %v1921_v61 }
 0x1cc   :  { %v1395_v33 = vpop.f32.mrf.mxu0  ;;  %v1924_v34 = vpop.f32.mrf.mxu1 }
 0x1cd   :  { %v2291_v11 = vsel %vm2193_vm14, %v2144_v48, %v2242_v15  ;;  %v2145_v2 = vadd.f32 %v4365_v6, %v2089_v23  ;;  %v1561_v57 = vmax.f32 %v4874_v3, %v1395_v33  ;;  %v4877_v48 = vmax.f32 %v3931_v41, %v3933_v43 }
 0x1ce   :  { %2341 = vst.msk [vmem:[%s4759_s3 + $0x48] sm:$0xff] %vm2331_vm5, %v2291_v11  ;;  %v3111_v58 = vpop.f32.mrf.mxu0  ;;  %v3221_v18 = vpop.f32.mrf.mxu1 }
 0x1cf   :  { %vm2194_vm15 = vcmp.gt.f32.partialorder %v2145_v2, 0.0  ;;  %v2243_v25 = vmul.f32 0.01, %v2145_v2  ;;  %v2090_v47 = vmax.f32 %v1561_v57, %v1924_v34  ;;  %v4878_v34 = vmax.f32 %v3943_v52, %v3945_v53 }
 0x1d0   :  { %v1400_v0 = vpop.f32.mrf.mxu0  ;;  %v1929_v21 = vpop.f32.mrf.mxu1 }
 0x1d1   :  { %v2292_v38 = vsel %vm2194_vm15, %v2145_v2, %v2243_v25  ;;  %v2146_v39 = vadd.f32 %v4365_v6, %v2090_v47  ;;  %v1562_v4 = vmax.f32 %v4875_v22, %v1400_v0  ;;  %v4879_v47 = vmax.f32 %v3955_v8, %v3957_v13 }
 0x1d2   :  { %2342 = vst.msk [vmem:[%s4759_s3 + $0x50] sm:$0xff] %vm2331_vm5, %v2292_v38  ;;  %v3114_v5 = vpop.f32.mrf.mxu0  ;;  %v3224_v40 = vpop.f32.mrf.mxu1 }
 0x1d3   :  { %vm2195_vm0 = vcmp.gt.f32.partialorder %v2146_v39, 0.0  ;;  %v2244_v35 = vmul.f32 0.01, %v2146_v39  ;;  %v2091_v36 = vmax.f32 %v1562_v4, %v1929_v21  ;;  %v4880_v40 = vmax.f32 %v3967_v31, %v3969_v32 }
 0x1d4   :  { %v1403_v9 = vpop.f32.mrf.mxu0  ;;  %v1932_v10 = vpop.f32.mrf.mxu1 }
 0x1d5   :  { %v2293_v42 = vsel %vm2195_vm0, %v2146_v39, %v2244_v35  ;;  %v2147_v62 = vadd.f32 %v4365_v6, %v2091_v36  ;;  %v1563_v17 = vmax.f32 %v4876_v45, %v1403_v9 }
 0x1d6   :  { %2343 = vst.msk [vmem:[%s4759_s3 + $0x58] sm:$0xff] %vm2331_vm5, %v2293_v42  ;;  %v3115_v19 = vpop.f32.mrf.mxu0  ;;  %v3225_v46 = vpop.f32.mrf.mxu1 }
 0x1d7   :  { %vm2196_vm1 = vcmp.gt.f32.partialorder %v2147_v62, 0.0  ;;  %v2245_v37 = vmul.f32 0.01, %v2147_v62  ;;  %v2092_v26 = vmax.f32 %v1563_v17, %v1932_v10  ;;  %v4881_v17 = vmax.f32 %v3979_v56, %v3981_v1 }
 0x1d8   :  { %v1408_v27 = vpop.f32.mrf.mxu0  ;;  %v1937_v60 = vpop.f32.mrf.mxu1 }
 0x1d9   :  { %v2294_v61 = vsel %vm2196_vm1, %v2147_v62, %v2245_v37  ;;  %v2148_v30 = vadd.f32 %v4365_v6, %v2092_v26  ;;  %v1564_v28 = vmax.f32 %v4877_v48, %v1408_v27 }
 0x1da   :  { %2344 = vst.msk [vmem:[%s4759_s3 + $0x60] sm:$0xff] %vm2331_vm5, %v2294_v61  ;;  %v3118_v29 = vpop.f32.mrf.mxu0  ;;  %v3228_v54 = vpop.f32.mrf.mxu1 }
 0x1db   :  { %vm2197_vm2 = vcmp.gt.f32.partialorder %v2148_v30, 0.0  ;;  %v2246_v50 = vmul.f32 0.01, %v2148_v30  ;;  %v2093_v51 = vmax.f32 %v1564_v28, %v1937_v60 }
 0x1dc   :  { %v1411_v14 = vpop.f32.mrf.mxu0  ;;  %v1940_v15 = vpop.f32.mrf.mxu1 }
 0x1dd   :  { %v2295_v23 = vsel %vm2197_vm2, %v2148_v30, %v2246_v50  ;;  %v2149_v33 = vadd.f32 %v4365_v6, %v2093_v51  ;;  %v1565_v41 = vmax.f32 %v4878_v34, %v1411_v14  ;;  %v4882_v30 = vmax.f32 %v3991_v49, %v3993_v55 }
 0x1de   :  { %2345 = vst.msk [vmem:[%s4759_s3 + $0x68] sm:$0xff] %vm2331_vm5, %v2295_v23  ;;  %v3119_v43 = vpop.f32.mrf.mxu0  ;;  %v3229_v11 = vpop.f32.mrf.mxu1 }
 0x1df   :  { %vm2198_vm3 = vcmp.gt.f32.partialorder %v2149_v33, 0.0  ;;  %v2247_v2 = vmul.f32 0.01, %v2149_v33  ;;  %v2094_v3 = vmax.f32 %v1565_v41, %v1940_v15  ;;  %v4883_v15 = vmax.f32 %v4003_v63, %v4005_v24 }
 0x1e0   :  { %v1416_v57 = vpop.f32.mrf.mxu0  ;;  %v1945_v58 = vpop.f32.mrf.mxu1 }
 0x1e1   :  { %v2296_v18 = vsel %vm2198_vm3, %v2149_v33, %v2247_v2  ;;  %v2150_v25 = vadd.f32 %v4365_v6, %v2094_v3  ;;  %v1566_v52 = vmax.f32 %v4879_v47, %v1416_v57  ;;  %v4884_v3 = vmax.f32 %v4015_v16, %v4017_v44 }
 0x1e2   :  { %2346 = vst.msk [vmem:[%s4759_s3 + $0x70] sm:$0xff] %vm2331_vm5, %v2296_v18  ;;  %v3122_v53 = vpop.f32.mrf.mxu0  ;;  %v3232_v0 = vpop.f32.mrf.mxu1 }
 0x1e3   :  { %vm2199_vm4 = vcmp.gt.f32.partialorder %v2150_v25, 0.0  ;;  %v2248_v21 = vmul.f32 0.01, %v2150_v25  ;;  %v2095_v38 = vmax.f32 %v1566_v52, %v1945_v58  ;;  %v4885_v0 = vmax.f32 %v4027_v12, %v4029_v7 }
 0x1e4   :  { %v1419_v39 = vpop.f32.mrf.mxu0  ;;  %v1948_v22 = vpop.f32.mrf.mxu1 }
 0x1e5   :  { %v2297_v4 = vsel %vm2199_vm4, %v2150_v25, %v2248_v21  ;;  %v2151_v5 = vadd.f32 %v4365_v6, %v2095_v38  ;;  %v1567_v8 = vmax.f32 %v4880_v40, %v1419_v39 }
 0x1e6   :  { %2347 = vst.msk [vmem:[%s4759_s3 + $0x78] sm:$0xff] %vm2331_vm5, %v2297_v4  ;;  %v3123_v13 = vpop.f32.mrf.mxu0  ;;  %v3233_v35 = vpop.f32.mrf.mxu1 }
 0x1e7   :  { %vm2200_vm6 = vcmp.gt.f32.partialorder %v2151_v5, 0.0  ;;  %v2249_v36 = vmul.f32 0.01, %v2151_v5  ;;  %v2096_v9 = vmax.f32 %v1567_v8, %v1948_v22  ;;  %v4886_v8 = vmax.f32 %v4039_v20, %v4041_v59 }
 0x1e8   :  { %v1424_v10 = vpop.f32.mrf.mxu0  ;;  %v1953_v42 = vpop.f32.mrf.mxu1 }
 0x1e9   :  { %v2298_v62 = vsel %vm2200_vm6, %v2151_v5, %v2249_v36  ;;  %v2152_v45 = vadd.f32 %v4365_v6, %v2096_v9  ;;  %v1568_v31 = vmax.f32 %v4881_v17, %v1424_v10  ;;  %v4888_v17 = vld [vmem:[#allocation3_spill] sm:$0xff] }
 0x1ea   :  { %2348 = vst.msk [vmem:[%s4759_s3 + $0x80] sm:$0xff] %vm2331_vm5, %v2298_v62  ;;  %v3126_v32 = vpop.f32.mrf.mxu0  ;;  %v3236_v19 = vpop.f32.mrf.mxu1 }
 0x1eb   :  { %vm2201_vm7 = vcmp.gt.f32.partialorder %v2152_v45, 0.0  ;;  %v2250_v46 = vmul.f32 0.01, %v2152_v45  ;;  %v2097_v37 = vmax.f32 %v1568_v31, %v1953_v42 }
 0x1ec   :  { %v1427_v26 = vpop.f32.mrf.mxu0  ;;  %v1956_v27 = vpop.f32.mrf.mxu1 }
 0x1ed   :  { %v2299_v60 = vsel %vm2201_vm7, %v2152_v45, %v2250_v46  ;;  %v2153_v61 = vadd.f32 %v4365_v6, %v2097_v37  ;;  %v1569_v56 = vmax.f32 %v4882_v30, %v1427_v26  ;;  %v4887_v45 = vld [vmem:[#allocation2_spill] sm:$0xff]  ;;  %v4891_v30 = vld [vmem:[#allocation5_spill] sm:$0xff] }
 0x1ee   :  { %2349 = vst.msk [vmem:[%s4759_s3 + $0x88] sm:$0xff] %vm2331_vm5, %v2299_v60  ;;  %v3127_v1 = vpop.f32.mrf.mxu0  ;;  %v3237_v48 = vpop.f32.mrf.mxu1  ;;  %v4889_v31 = vmax.f32 %v4887_v45, %v4888_v17 }
 0x1ef   :  { %vm2202_vm8 = vcmp.gt.f32.partialorder %v2153_v61, 0.0  ;;  %v2251_v28 = vmul.f32 0.01, %v2153_v61  ;;  %v2098_v29 = vmax.f32 %v1569_v56, %v1956_v27 }
 0x1f0   :  { %v1432_v54 = vpop.f32.mrf.mxu0  ;;  %v1961_v50 = vpop.f32.mrf.mxu1 }
 0x1f1   :  { %v2300_v51 = vsel %vm2202_vm8, %v2153_v61, %v2251_v28  ;;  %v2154_v14 = vadd.f32 %v4365_v6, %v2098_v29  ;;  %v1570_v49 = vmax.f32 %v4883_v15, %v1432_v54  ;;  %v4890_v61 = vld [vmem:[#allocation4_spill] sm:$0xff] }
 0x1f2   :  { %2350 = vst.msk [vmem:[%s4759_s3 + $0x90] sm:$0xff] %vm2331_vm5, %v2300_v51  ;;  %v3130_v55 = vpop.f32.mrf.mxu0  ;;  %v3240_v23 = vpop.f32.mrf.mxu1  ;;  %v4892_v56 = vmax.f32 %v4890_v61, %v4891_v30 }
 0x1f3   :  { %vm2203_vm9 = vcmp.gt.f32.partialorder %v2154_v14, 0.0  ;;  %v2252_v33 = vmul.f32 0.01, %v2154_v14  ;;  %v2099_v34 = vmax.f32 %v1570_v49, %v1961_v50  ;;  %v4893_v49 = vld [vmem:[#allocation6_spill] sm:$0xff]  ;;  %v4894_v55 = vld [vmem:[#allocation7_spill] sm:$0xff] }
 0x1f4   :  { %v1435_v41 = vpop.f32.mrf.mxu0  ;;  %v1964_v43 = vpop.f32.mrf.mxu1  ;;  %v4895_v23 = vmax.f32 %v4893_v49, %v4894_v55 }
 0x1f5   :  { %v2301_v11 = vsel %vm2203_vm9, %v2154_v14, %v2252_v33  ;;  %v2155_v2 = vadd.f32 %v4365_v6, %v2099_v34  ;;  %v1571_v63 = vmax.f32 %v4884_v3, %v1435_v41 }
 0x1f6   :  { %2351 = vst.msk [vmem:[%s4759_s3 + $0x98] sm:$0xff] %vm2331_vm5, %v2301_v11  ;;  %v3131_v24 = vpop.f32.mrf.mxu0  ;;  %v3241_v57 = vpop.f32.mrf.mxu1 }
 0x1f7   :  { %vm2204_vm10 = vcmp.gt.f32.partialorder %v2155_v2, 0.0  ;;  %v2253_v58 = vmul.f32 0.01, %v2155_v2  ;;  %v2100_v18 = vmax.f32 %v1571_v63, %v1964_v43  ;;  %v4896_v57 = vld [vmem:[#allocation8_spill] sm:$0xff] }
 0x1f8   :  { %v1440_v25 = vpop.f32.mrf.mxu0  ;;  %v1969_v47 = vpop.f32.mrf.mxu1 }
 0x1f9   :  { %v2302_v52 = vsel %vm2204_vm10, %v2155_v2, %v2253_v58  ;;  %v2156_v53 = vadd.f32 %v4365_v6, %v2100_v18  ;;  %v1572_v44 = vmax.f32 %v4885_v0, %v1440_v25  ;;  %v4897_v58 = vld [vmem:[#allocation9_spill] sm:$0xff] }
 0x1fa   :  { %2352 = vst.msk [vmem:[%s4759_s3 + $0xa0] sm:$0xff] %vm2331_vm5, %v2302_v52  ;;  %v3134_v16 = vpop.f32.mrf.mxu0  ;;  %v3244_v21 = vpop.f32.mrf.mxu1  ;;  %v4898_v18 = vmax.f32 %v4896_v57, %v4897_v58 }
 0x1fb   :  { %vm2205_vm11 = vcmp.gt.f32.partialorder %v2156_v53, 0.0  ;;  %v2254_v38 = vmul.f32 0.01, %v2156_v53  ;;  %v2101_v39 = vmax.f32 %v1572_v44, %v1969_v47 }
 0x1fc   :  { %v1443_v22 = vpop.f32.mrf.mxu0  ;;  %v1972_v4 = vpop.f32.mrf.mxu1 }
 0x1fd   :  { %v2303_v5 = vsel %vm2205_vm11, %v2156_v53, %v2254_v38  ;;  %v2157_v40 = vadd.f32 %v4365_v6, %v2101_v39  ;;  %v1573_v12 = vmax.f32 %v4886_v8, %v1443_v22  ;;  %v4899_v39 = vld [vmem:[#allocation10_spill] sm:$0xff]  ;;  %v4900_v22 = vld [vmem:[#allocation11_spill] sm:$0xff] }
 0x1fe   :  { %2353 = vst.msk [vmem:[%s4759_s3 + $0xa8] sm:$0xff] %vm2331_vm5, %v2303_v5  ;;  %v3135_v7 = vpop.f32.mrf.mxu0  ;;  %v3245_v13 = vpop.f32.mrf.mxu1 }
 0x1ff   :  { %vm2206_vm12 = vcmp.gt.f32.partialorder %v2157_v40, 0.0  ;;  %v2255_v35 = vmul.f32 0.01, %v2157_v40  ;;  %v2102_v36 = vmax.f32 %v1573_v12, %v1972_v4  ;;  %v4901_v4 = vmax.f32 %v4899_v39, %v4900_v22 }
 0x200   :  { %v1448_v9 = vpop.f32.mrf.mxu0  ;;  %v1977_v10 = vpop.f32.mrf.mxu1 }
 0x201   :  { %v2304_v42 = vsel %vm2206_vm12, %v2157_v40, %v2255_v35  ;;  %v2158_v62 = vadd.f32 %v4365_v6, %v2102_v36  ;;  %v1574_v59 = vmax.f32 %v4889_v31, %v1448_v9 }
 0x202   :  { %2354 = vst.msk [vmem:[%s4759_s3 + $0xb0] sm:$0xff] %vm2331_vm5, %v2304_v42  ;;  %v3138_v20 = vpop.f32.mrf.mxu0  ;;  %v3248_v32 = vpop.f32.mrf.mxu1  ;;  %v4903_v42 = vld [vmem:[#allocation13_spill] sm:$0xff] }
 0x203   :  { %vm2207_vm13 = vcmp.gt.f32.partialorder %v2158_v62, 0.0  ;;  %v2256_v19 = vmul.f32 0.01, %v2158_v62  ;;  %v2103_v46 = vmax.f32 %v1574_v59, %v1977_v10  ;;  %v4902_v10 = vld [vmem:[#allocation12_spill] sm:$0xff] }
 0x204   :  { %v1451_v37 = vpop.f32.mrf.mxu0  ;;  %v1980_v26 = vpop.f32.mrf.mxu1 }
 0x205   :  { %v2305_v27 = vsel %vm2207_vm13, %v2158_v62, %v2256_v19  ;;  %v2159_v60 = vadd.f32 %v4365_v6, %v2103_v46  ;;  %v1575_v1 = vmax.f32 %v4892_v56, %v1451_v37  ;;  %v4904_v62 = vmax.f32 %v4902_v10, %v4903_v42 }
 0x206   :  { %2355 = vst.msk [vmem:[%s4759_s3 + $0xb8] sm:$0xff] %vm2331_vm5, %v2305_v27  ;;  %v3139_v48 = vpop.f32.mrf.mxu0  ;;  %v3249_v28 = vpop.f32.mrf.mxu1  ;;  %v4906_v27 = vld [vmem:[#allocation15_spill] sm:$0xff] }
 0x207   :  { %vm2208_vm14 = vcmp.gt.f32.partialorder %v2159_v60, 0.0  ;;  %v2257_v29 = vmul.f32 0.01, %v2159_v60  ;;  %v2104_v54 = vmax.f32 %v1575_v1, %v1980_v26  ;;  %v4905_v26 = vld [vmem:[#allocation14_spill] sm:$0xff] }
 0x208   :  { %v1456_v50 = vpop.f32.mrf.mxu0  ;;  %v1985_v51 = vpop.f32.mrf.mxu1 }
 0x209   :  { %v2306_v14 = vsel %vm2208_vm14, %v2159_v60, %v2257_v29  ;;  %v2160_v15 = vadd.f32 %v4365_v6, %v2104_v54  ;;  %v1576_v33 = vmax.f32 %v4895_v23, %v1456_v50  ;;  %v4907_v60 = vmax.f32 %v4905_v26, %v4906_v27 }
 0x20a   :  { %2356 = vst.msk [vmem:[%s4759_s3 + $0xc0] sm:$0xff] %vm2331_vm5, %v2306_v14  ;;  %v3142_v34 = vpop.f32.mrf.mxu0  ;;  %v3252_v41 = vpop.f32.mrf.mxu1  ;;  %v4909_v14 = vld [vmem:[#allocation17_spill] sm:$0xff] }
 0x20b   :  { %vm2209_vm15 = vcmp.gt.f32.partialorder %v2160_v15, 0.0  ;;  %v2258_v43 = vmul.f32 0.01, %v2160_v15  ;;  %v2105_v11 = vmax.f32 %v1576_v33, %v1985_v51  ;;  %v4908_v51 = vld [vmem:[#allocation16_spill] sm:$0xff] }
 0x20c   :  { %v1459_v2 = vpop.f32.mrf.mxu0  ;;  %v1988_v3 = vpop.f32.mrf.mxu1 }
 0x20d   :  { %v2307_v63 = vsel %vm2209_vm15, %v2160_v15, %v2258_v43  ;;  %v2161_v24 = vadd.f32 %v4365_v6, %v2105_v11  ;;  %v1577_v25 = vmax.f32 %v4898_v18, %v1459_v2  ;;  %v4910_v15 = vmax.f32 %v4908_v51, %v4909_v14 }
 0x20e   :  { %2357 = vst.msk [vmem:[%s4759_s3 + $0xc8] sm:$0xff] %vm2331_vm5, %v2307_v63  ;;  %v3143_v47 = vpop.f32.mrf.mxu0  ;;  %v3253_v52 = vpop.f32.mrf.mxu1  ;;  %v4912_v63 = vld [vmem:[#allocation19_spill] sm:$0xff] }
 0x20f   :  { %vm2210_vm0 = vcmp.gt.f32.partialorder %v2161_v24, 0.0  ;;  %v2259_v53 = vmul.f32 0.01, %v2161_v24  ;;  %v2106_v0 = vmax.f32 %v1577_v25, %v1988_v3  ;;  %v4911_v3 = vld [vmem:[#allocation18_spill] sm:$0xff] }
 0x210   :  { %v1464_v44 = vpop.f32.mrf.mxu0  ;;  %v1993_v16 = vpop.f32.mrf.mxu1 }
 0x211   :  { %v2308_v21 = vsel %vm2210_vm0, %v2161_v24, %v2259_v53  ;;  %v2162_v38 = vadd.f32 %v4365_v6, %v2106_v0  ;;  %v1578_v5 = vmax.f32 %v4901_v4, %v1464_v44  ;;  %v4913_v24 = vmax.f32 %v4911_v3, %v4912_v63 }
 0x212   :  { %2358 = vst.msk [vmem:[%s4759_s3 + $0xd0] sm:$0xff] %vm2331_vm5, %v2308_v21  ;;  %v3146_v40 = vpop.f32.mrf.mxu0  ;;  %v3256_v8 = vpop.f32.mrf.mxu1  ;;  %v4915_v21 = vld [vmem:[#allocation21_spill] sm:$0xff] }
 0x213   :  { %vm2211_vm1 = vcmp.gt.f32.partialorder %v2162_v38, 0.0  ;;  %v2260_v12 = vmul.f32 0.01, %v2162_v38  ;;  %v2107_v7 = vmax.f32 %v1578_v5, %v1993_v16  ;;  %v4914_v16 = vld [vmem:[#allocation20_spill] sm:$0xff] }
 0x214   :  { %v1467_v13 = vpop.f32.mrf.mxu0  ;;  %v1996_v35 = vpop.f32.mrf.mxu1 }
 0x215   :  { %v2309_v36 = vsel %vm2211_vm1, %v2162_v38, %v2260_v12  ;;  %v2163_v9 = vadd.f32 %v4365_v6, %v2107_v7  ;;  %v1579_v45 = vmax.f32 %v4904_v62, %v1467_v13  ;;  %v4916_v38 = vmax.f32 %v4914_v16, %v4915_v21 }
 0x216   :  { %2359 = vst.msk [vmem:[%s4759_s3 + $0xd8] sm:$0xff] %vm2331_vm5, %v2309_v36  ;;  %v3147_v17 = vpop.f32.mrf.mxu0  ;;  %v3257_v31 = vpop.f32.mrf.mxu1  ;;  %v4918_v36 = vld [vmem:[#allocation23_spill] sm:$0xff] }
 0x217   :  { %vm2212_vm2 = vcmp.gt.f32.partialorder %v2163_v9, 0.0  ;;  %v2261_v59 = vmul.f32 0.01, %v2163_v9  ;;  %v2108_v20 = vmax.f32 %v1579_v45, %v1996_v35  ;;  %v4917_v35 = vld [vmem:[#allocation22_spill] sm:$0xff] }
 0x218   :  { %v1472_v32 = vpop.f32.mrf.mxu0  ;;  %v2001_v19 = vpop.f32.mrf.mxu1 }
 0x219   :  { %v2310_v46 = vsel %vm2212_vm2, %v2163_v9, %v2261_v59  ;;  %v2164_v37 = vadd.f32 %v4365_v6, %v2108_v20  ;;  %v1580_v61 = vmax.f32 %v4907_v60, %v1472_v32  ;;  %v4919_v9 = vmax.f32 %v4917_v35, %v4918_v36 }
 0x21a   :  { %2360 = vst.msk [vmem:[%s4759_s3 + $0xe0] sm:$0xff] %vm2331_vm5, %v2310_v46  ;;  %v3150_v30 = vpop.f32.mrf.mxu0  ;;  %v3260_v56 = vpop.f32.mrf.mxu1  ;;  %v4921_v46 = vld [vmem:[#allocation25_spill] sm:$0xff] }
 0x21b   :  { %vm2213_vm3 = vcmp.gt.f32.partialorder %v2164_v37, 0.0  ;;  %v2262_v1 = vmul.f32 0.01, %v2164_v37  ;;  %v2109_v48 = vmax.f32 %v1580_v61, %v2001_v19  ;;  %v4920_v19 = vld [vmem:[#allocation24_spill] sm:$0xff] }
 0x21c   :  { %v1475_v28 = vpop.f32.mrf.mxu0  ;;  %v2004_v29 = vpop.f32.mrf.mxu1 }
 0x21d   :  { %v2311_v54 = vsel %vm2213_vm3, %v2164_v37, %v2262_v1  ;;  %v2165_v50 = vadd.f32 %v4365_v6, %v2109_v48  ;;  %v1581_v49 = vmax.f32 %v4910_v15, %v1475_v28  ;;  %v4922_v37 = vmax.f32 %v4920_v19, %v4921_v46 }
 0x21e   :  { %2361 = vst.msk [vmem:[%s4759_s3 + $0xe8] sm:$0xff] %vm2331_vm5, %v2311_v54  ;;  %v3151_v55 = vpop.f32.mrf.mxu0  ;;  %v3261_v23 = vpop.f32.mrf.mxu1  ;;  %v4924_v54 = vld [vmem:[#allocation27_spill] sm:$0xff] }
 0x21f   :  { %vm2214_vm4 = vcmp.gt.f32.partialorder %v2165_v50, 0.0  ;;  %v2263_v33 = vmul.f32 0.01, %v2165_v50  ;;  %v2110_v34 = vmax.f32 %v1581_v49, %v2004_v29  ;;  %v4923_v29 = vld [vmem:[#allocation26_spill] sm:$0xff] }
 0x220   :  { %v1480_v41 = vpop.f32.mrf.mxu0  ;;  %v2009_v43 = vpop.f32.mrf.mxu1 }
 0x221   :  { %v2312_v11 = vsel %vm2214_vm4, %v2165_v50, %v2263_v33  ;;  %v2166_v2 = vadd.f32 %v4365_v6, %v2110_v34  ;;  %v1582_v57 = vmax.f32 %v4913_v24, %v1480_v41  ;;  %v4925_v50 = vmax.f32 %v4923_v29, %v4924_v54 }
 0x222   :  { %2362 = vst.msk [vmem:[%s4759_s3 + $0xf0] sm:$0xff] %vm2331_vm5, %v2312_v11  ;;  %v3154_v58 = vpop.f32.mrf.mxu0  ;;  %v3264_v18 = vpop.f32.mrf.mxu1  ;;  %v4927_v11 = vld [vmem:[#allocation29_spill] sm:$0xff] }
 0x223   :  { %vm2215_vm6 = vcmp.gt.f32.partialorder %v2166_v2, 0.0  ;;  %v2264_v25 = vmul.f32 0.01, %v2166_v2  ;;  %v2111_v47 = vmax.f32 %v1582_v57, %v2009_v43  ;;  %v4926_v43 = vld [vmem:[#allocation28_spill] sm:$0xff] }
 0x224   :  { %v1483_v52 = vpop.f32.mrf.mxu0  ;;  %v2012_v53 = vpop.f32.mrf.mxu1 }
 0x225   :  { %v2313_v0 = vsel %vm2215_vm6, %v2166_v2, %v2264_v25  ;;  %v2167_v44 = vadd.f32 %v4365_v6, %v2111_v47  ;;  %v1583_v39 = vmax.f32 %v4916_v38, %v1483_v52  ;;  %v4928_v2 = vmax.f32 %v4926_v43, %v4927_v11 }
 0x226   :  { %2363 = vst.msk [vmem:[%s4759_s3 + $0xf8] sm:$0xff] %vm2331_vm5, %v2313_v0  ;;  %v3155_v22 = vpop.f32.mrf.mxu0  ;;  %v3265_v4 = vpop.f32.mrf.mxu1  ;;  %v4930_v0 = vld [vmem:[#allocation31_spill] sm:$0xff] }
 0x227   :  { %vm2216_vm7 = vcmp.gt.f32.partialorder %v2167_v44, 0.0  ;;  %v2265_v5 = vmul.f32 0.01, %v2167_v44  ;;  %v2112_v40 = vmax.f32 %v1583_v39, %v2012_v53  ;;  %v4929_v53 = vld [vmem:[#allocation30_spill] sm:$0xff] }
 0x228   :  { %v1488_v8 = vpop.f32.mrf.mxu0  ;;  %v2017_v12 = vpop.f32.mrf.mxu1 }
 0x229   :  { %v2314_v7 = vsel %vm2216_vm7, %v2167_v44, %v2265_v5  ;;  %v2168_v13 = vadd.f32 %v4365_v6, %v2112_v40  ;;  %v1584_v10 = vmax.f32 %v4919_v9, %v1488_v8  ;;  %v4931_v44 = vmax.f32 %v4929_v53, %v4930_v0 }
 0x22a   :  { %2364 = vst.msk [vmem:[%s4759_s3 + $0x100] sm:$0xff] %vm2331_vm5, %v2314_v7  ;;  %v3158_v42 = vpop.f32.mrf.mxu0  ;;  %v3268_v62 = vpop.f32.mrf.mxu1  ;;  %v4933_v7 = vld [vmem:[#allocation33_spill] sm:$0xff] }
 0x22b   :  { %vm2217_vm8 = vcmp.gt.f32.partialorder %v2168_v13, 0.0  ;;  %v2266_v45 = vmul.f32 0.01, %v2168_v13  ;;  %v2113_v17 = vmax.f32 %v1584_v10, %v2017_v12  ;;  %v4932_v12 = vld [vmem:[#allocation32_spill] sm:$0xff] }
 0x22c   :  { %v1491_v31 = vpop.f32.mrf.mxu0  ;;  %v2020_v59 = vpop.f32.mrf.mxu1 }
 0x22d   :  { %v2315_v20 = vsel %vm2217_vm8, %v2168_v13, %v2266_v45  ;;  %v2169_v32 = vadd.f32 %v4365_v6, %v2113_v17  ;;  %v1585_v26 = vmax.f32 %v4922_v37, %v1491_v31  ;;  %v4934_v13 = vmax.f32 %v4932_v12, %v4933_v7 }
 0x22e   :  { %2365 = vst.msk [vmem:[%s4759_s3 + $0x108] sm:$0xff] %vm2331_vm5, %v2315_v20  ;;  %v3159_v27 = vpop.f32.mrf.mxu0  ;;  %v3269_v60 = vpop.f32.mrf.mxu1  ;;  %v4936_v20 = vld [vmem:[#allocation35_spill] sm:$0xff] }
 0x22f   :  { %vm2218_vm9 = vcmp.gt.f32.partialorder %v2169_v32, 0.0  ;;  %v2267_v61 = vmul.f32 0.01, %v2169_v32  ;;  %v2114_v30 = vmax.f32 %v1585_v26, %v2020_v59  ;;  %v4935_v59 = vld [vmem:[#allocation34_spill] sm:$0xff] }
 0x230   :  { %v1496_v56 = vpop.f32.mrf.mxu0  ;;  %v2025_v1 = vpop.f32.mrf.mxu1 }
 0x231   :  { %v2316_v48 = vsel %vm2218_vm9, %v2169_v32, %v2267_v61  ;;  %v2170_v28 = vadd.f32 %v4365_v6, %v2114_v30  ;;  %v1586_v51 = vmax.f32 %v4925_v50, %v1496_v56  ;;  %v4937_v32 = vmax.f32 %v4935_v59, %v4936_v20 }
 0x232   :  { %2366 = vst.msk [vmem:[%s4759_s3 + $0x110] sm:$0xff] %vm2331_vm5, %v2316_v48  ;;  %v3162_v14 = vpop.f32.mrf.mxu0  ;;  %v3272_v15 = vpop.f32.mrf.mxu1  ;;  %v4939_v48 = vld [vmem:[#allocation37_spill] sm:$0xff] }
 0x233   :  { %vm2219_vm10 = vcmp.gt.f32.partialorder %v2170_v28, 0.0  ;;  %v2268_v49 = vmul.f32 0.01, %v2170_v28  ;;  %v2115_v55 = vmax.f32 %v1586_v51, %v2025_v1  ;;  %v4938_v1 = vld [vmem:[#allocation36_spill] sm:$0xff] }
 0x234   :  { %v1499_v23 = vpop.f32.mrf.mxu0  ;;  %v2028_v33 = vpop.f32.mrf.mxu1 }
 0x235   :  { %v2317_v34 = vsel %vm2219_vm10, %v2170_v28, %v2268_v49  ;;  %v2171_v41 = vadd.f32 %v4365_v6, %v2115_v55  ;;  %v1587_v3 = vmax.f32 %v4928_v2, %v1499_v23  ;;  %v4940_v28 = vmax.f32 %v4938_v1, %v4939_v48 }
 0x236   :  { %2367 = vst.msk [vmem:[%s4759_s3 + $0x118] sm:$0xff] %vm2331_vm5, %v2317_v34  ;;  %v3163_v63 = vpop.f32.mrf.mxu0  ;;  %v3273_v24 = vpop.f32.mrf.mxu1  ;;  %v4942_v34 = vld [vmem:[#allocation39_spill] sm:$0xff] }
 0x237   :  { %vm2220_vm11 = vcmp.gt.f32.partialorder %v2171_v41, 0.0  ;;  %v2269_v57 = vmul.f32 0.01, %v2171_v41  ;;  %v2116_v58 = vmax.f32 %v1587_v3, %v2028_v33  ;;  %v4941_v33 = vld [vmem:[#allocation38_spill] sm:$0xff] }
 0x238   :  { %v1504_v18 = vpop.f32.mrf.mxu0  ;;  %v2033_v25 = vpop.f32.mrf.mxu1 }
 0x239   :  { %v2318_v47 = vsel %vm2220_vm11, %v2171_v41, %v2269_v57  ;;  %v2172_v52 = vadd.f32 %v4365_v6, %v2116_v58  ;;  %v1588_v16 = vmax.f32 %v4931_v44, %v1504_v18  ;;  %v4943_v41 = vmax.f32 %v4941_v33, %v4942_v34 }
 0x23a   :  { %2368 = vst.msk [vmem:[%s4759_s3 + $0x120] sm:$0xff] %vm2331_vm5, %v2318_v47  ;;  %v3166_v21 = vpop.f32.mrf.mxu0  ;;  %v3276_v38 = vpop.f32.mrf.mxu1  ;;  %v4945_v47 = vld [vmem:[#allocation41_spill] sm:$0xff] }
 0x23b   :  { %vm2221_vm12 = vcmp.gt.f32.partialorder %v2172_v52, 0.0  ;;  %v2270_v39 = vmul.f32 0.01, %v2172_v52  ;;  %v2117_v22 = vmax.f32 %v1588_v16, %v2033_v25  ;;  %v4944_v25 = vld [vmem:[#allocation40_spill] sm:$0xff] }
 0x23c   :  { %v1507_v4 = vpop.f32.mrf.mxu0  ;;  %v2036_v5 = vpop.f32.mrf.mxu1 }
 0x23d   :  { %v2319_v40 = vsel %vm2221_vm12, %v2172_v52, %v2270_v39  ;;  %v2173_v8 = vadd.f32 %v4365_v6, %v2117_v22  ;;  %v1589_v35 = vmax.f32 %v4934_v13, %v1507_v4  ;;  %v4946_v52 = vmax.f32 %v4944_v25, %v4945_v47 }
 0x23e   :  { %2369 = vst.msk [vmem:[%s4759_s3 + $0x128] sm:$0xff] %vm2331_vm5, %v2319_v40  ;;  %v3167_v36 = vpop.f32.mrf.mxu0  ;;  %v3277_v9 = vpop.f32.mrf.mxu1  ;;  %v4948_v40 = vld [vmem:[#allocation43_spill] sm:$0xff] }
 0x23f   :  { %vm2222_vm13 = vcmp.gt.f32.partialorder %v2173_v8, 0.0  ;;  %v2271_v10 = vmul.f32 0.01, %v2173_v8  ;;  %v2118_v42 = vmax.f32 %v1589_v35, %v2036_v5  ;;  %v4947_v5 = vld [vmem:[#allocation42_spill] sm:$0xff] }
 0x240   :  { %v1512_v62 = vpop.f32.mrf.mxu0  ;;  %v2041_v45 = vpop.f32.mrf.mxu1 }
 0x241   :  { %v2320_v17 = vsel %vm2222_vm13, %v2173_v8, %v2271_v10  ;;  %v2174_v31 = vadd.f32 %v4365_v6, %v2118_v42  ;;  %v1590_v19 = vmax.f32 %v4937_v32, %v1512_v62  ;;  %v4949_v8 = vmax.f32 %v4947_v5, %v4948_v40 }
 0x242   :  { %2370 = vst.msk [vmem:[%s4759_s3 + $0x130] sm:$0xff] %vm2331_vm5, %v2320_v17  ;;  %v3170_v46 = vpop.f32.mrf.mxu0  ;;  %v3280_v37 = vpop.f32.mrf.mxu1  ;;  %v4951_v17 = vld [vmem:[#allocation45_spill] sm:$0xff] }
 0x243   :  { %vm2223_vm14 = vcmp.gt.f32.partialorder %v2174_v31, 0.0  ;;  %v2272_v26 = vmul.f32 0.01, %v2174_v31  ;;  %v2119_v27 = vmax.f32 %v1590_v19, %v2041_v45  ;;  %v4950_v45 = vld [vmem:[#allocation44_spill] sm:$0xff] }
 0x244   :  { %v1515_v60 = vpop.f32.mrf.mxu0  ;;  %v2044_v61 = vpop.f32.mrf.mxu1 }
 0x245   :  { %v2321_v30 = vsel %vm2223_vm14, %v2174_v31, %v2272_v26  ;;  %v2175_v56 = vadd.f32 %v4365_v6, %v2119_v27  ;;  %v1591_v29 = vmax.f32 %v4940_v28, %v1515_v60  ;;  %v4952_v31 = vmax.f32 %v4950_v45, %v4951_v17 }
 0x246   :  { %2371 = vst.msk [vmem:[%s4759_s3 + $0x138] sm:$0xff] %vm2331_vm5, %v2321_v30  ;;  %v3171_v54 = vpop.f32.mrf.mxu0  ;;  %v3281_v50 = vpop.f32.mrf.mxu1  ;;  %v4954_v30 = vld [vmem:[#allocation47_spill] sm:$0xff] }
 0x247   :  { %vm2224_vm15 = vcmp.gt.f32.partialorder %v2175_v56, 0.0  ;;  %v2273_v51 = vmul.f32 0.01, %v2175_v56  ;;  %v2120_v14 = vmax.f32 %v1591_v29, %v2044_v61  ;;  %v4953_v61 = vld [vmem:[#allocation46_spill] sm:$0xff] }
 0x248   :  { %v1520_v15 = vpop.f32.mrf.mxu0  ;;  %v2049_v49 = vpop.f32.mrf.mxu1 }
 0x249   :  { %v2322_v55 = vsel %vm2224_vm15, %v2175_v56, %v2273_v51  ;;  %v2176_v23 = vadd.f32 %v4365_v6, %v2120_v14  ;;  %v1592_v43 = vmax.f32 %v4943_v41, %v1520_v15  ;;  %v4955_v56 = vmax.f32 %v4953_v61, %v4954_v30 }
 0x24a   :  { %2372 = vst.msk [vmem:[%s4759_s3 + $0x140] sm:$0xff] %vm2331_vm5, %v2322_v55  ;;  %v3174_v11 = vpop.f32.mrf.mxu0  ;;  %v3284_v2 = vpop.f32.mrf.mxu1  ;;  %v4957_v55 = vld [vmem:[#allocation49_spill] sm:$0xff] }
 0x24b   :  { %vm2225_vm0 = vcmp.gt.f32.partialorder %v2176_v23, 0.0  ;;  %v2274_v3 = vmul.f32 0.01, %v2176_v23  ;;  %v2121_v63 = vmax.f32 %v1592_v43, %v2049_v49  ;;  %v4956_v49 = vld [vmem:[#allocation48_spill] sm:$0xff] }
 0x24c   :  { %v1523_v24 = vpop.f32.mrf.mxu0  ;;  %v2052_v57 = vpop.f32.mrf.mxu1 }
 0x24d   :  { %v2323_v58 = vsel %vm2225_vm0, %v2176_v23, %v2274_v3  ;;  %v2177_v18 = vadd.f32 %v4365_v6, %v2121_v63  ;;  %v1593_v53 = vmax.f32 %v4946_v52, %v1523_v24  ;;  %v4958_v23 = vmax.f32 %v4956_v49, %v4957_v55 }
 0x24e   :  { %2373 = vst.msk [vmem:[%s4759_s3 + $0x148] sm:$0xff] %vm2331_vm5, %v2323_v58  ;;  %v3175_v0 = vpop.f32.mrf.mxu0  ;;  %v3285_v44 = vpop.f32.mrf.mxu1  ;;  %v4960_v58 = vld [vmem:[#allocation51_spill] sm:$0xff] }
 0x24f   :  { %vm2226_vm1 = vcmp.gt.f32.partialorder %v2177_v18, 0.0  ;;  %v2275_v16 = vmul.f32 0.01, %v2177_v18  ;;  %v2122_v21 = vmax.f32 %v1593_v53, %v2052_v57  ;;  %v4959_v57 = vld [vmem:[#allocation50_spill] sm:$0xff] }
 0x250   :  { %v1528_v38 = vpop.f32.mrf.mxu0  ;;  %v2057_v39 = vpop.f32.mrf.mxu1 }
 0x251   :  { %v2324_v22 = vsel %vm2226_vm1, %v2177_v18, %v2275_v16  ;;  %v2178_v4 = vadd.f32 %v4365_v6, %v2122_v21  ;;  %v1594_v12 = vmax.f32 %v4949_v8, %v1528_v38  ;;  %v4961_v18 = vmax.f32 %v4959_v57, %v4960_v58 }
 0x252   :  { %2374 = vst.msk [vmem:[%s4759_s3 + $0x150] sm:$0xff] %vm2331_vm5, %v2324_v22  ;;  %v3178_v7 = vpop.f32.mrf.mxu0  ;;  %v3288_v13 = vpop.f32.mrf.mxu1 }
 0x253   :  { %vm2227_vm2 = vcmp.gt.f32.partialorder %v2178_v4, 0.0  ;;  %v2276_v35 = vmul.f32 0.01, %v2178_v4  ;;  %v2123_v36 = vmax.f32 %v1594_v12, %v2057_v39 }
 0x254   :  { %v1531_v9 = vpop.f32.mrf.mxu0  ;;  %v2060_v10 = vpop.f32.mrf.mxu1 }
 0x255   :  { %v2325_v42 = vsel %vm2227_vm2, %v2178_v4, %v2276_v35  ;;  %v2179_v62 = vadd.f32 %v4365_v6, %v2123_v36  ;;  %v1595_v59 = vmax.f32 %v4952_v31, %v1531_v9 }
 0x256   :  { %2375 = vst.msk [vmem:[%s4759_s3 + $0x158] sm:$0xff] %vm2331_vm5, %v2325_v42  ;;  %v3179_v20 = vpop.f32.mrf.mxu0  ;;  %v3289_v32 = vpop.f32.mrf.mxu1 }
 0x257   :  { %vm2228_vm3 = vcmp.gt.f32.partialorder %v2179_v62, 0.0  ;;  %v2277_v19 = vmul.f32 0.01, %v2179_v62  ;;  %v2124_v46 = vmax.f32 %v1595_v59, %v2060_v10 }
 0x258   :  { %v1536_v37 = vpop.f32.mrf.mxu0  ;;  %v2065_v26 = vpop.f32.mrf.mxu1 }
 0x259   :  { %v2326_v27 = vsel %vm2228_vm3, %v2179_v62, %v2277_v19  ;;  %v2180_v60 = vadd.f32 %v4365_v6, %v2124_v46  ;;  %v1596_v1 = vmax.f32 %v4955_v56, %v1536_v37  ;;  %v3406_v6 = vld [vmem:[%s4758_s2] ss:$0 sm:$0xff] }
 0x25a   :  { %2376 = vst.msk [vmem:[%s4759_s3 + $0x160] sm:$0xff] %vm2331_vm5, %v2326_v27  ;;  %v3182_v48 = vpop.f32.mrf.mxu0  ;;  %v3292_v28 = vpop.f32.mrf.mxu1 }
 0x25b   :  { %vm2229_vm4 = vcmp.gt.f32.partialorder %v2180_v60, 0.0  ;;  %v2278_v29 = vmul.f32 0.01, %v2180_v60  ;;  %v2125_v54 = vmax.f32 %v1596_v1, %v2065_v26 }
 0x25c   :  { %v1539_v50 = vpop.f32.mrf.mxu0  ;;  %v2068_v51 = vpop.f32.mrf.mxu1 }
 0x25d   :  { %v2327_v14 = vsel %vm2229_vm4, %v2180_v60, %v2278_v29  ;;  %v2181_v15 = vadd.f32 %v3406_v6, %v2125_v54  ;;  %v1597_v33 = vmax.f32 %v4958_v23, %v1539_v50 }
 0x25e   :  { %2377 = vst.msk [vmem:[%s4759_s3 + $0x168] sm:$0xff] %vm2331_vm5, %v2327_v14  ;;  %v3183_v34 = vpop.f32.mrf.mxu0  ;;  %v3293_v41 = vpop.f32.mrf.mxu1 }
 0x25f   :  { %vm2230_vm6 = vcmp.gt.f32.partialorder %v2181_v15, 0.0  ;;  %v2279_v43 = vmul.f32 0.01, %v2181_v15  ;;  %v2126_v11 = vmax.f32 %v1597_v33, %v2068_v51 }
 0x260   :  { %v1544_v2 = vpop.f32.mrf.mxu0  ;;  %v2073_v3 = vpop.f32.mrf.mxu1 }
 0x261   :  { %v2328_v63 = vsel %vm2230_vm6, %v2181_v15, %v2279_v43  ;;  %v2182_v24 = vadd.f32 %v3406_v6, %v2126_v11  ;;  %v1598_v25 = vmax.f32 %v4961_v18, %v1544_v2 }
 0x262   :  { %2378 = vst.msk [vmem:[%s4759_s3 + $0x170] sm:$0xff] %vm2331_vm5, %v2328_v63  ;;  %v3186_v47 = vpop.f32.mrf.mxu0  ;;  %v3296_v52 = vpop.f32.mrf.mxu1 }
 0x263   :  { %vm2231_vm7 = vcmp.gt.f32.partialorder %v2182_v24, 0.0  ;;  %v2280_v53 = vmul.f32 0.01, %v2182_v24  ;;  %v2127_v0 = vmax.f32 %v1598_v25, %v2073_v3 }
 0x264   :  { %v1547_v44 = vpop.f32.mrf.mxu0  ;;  %v2076_v16 = vpop.f32.mrf.mxu1 }
 0x265   :  { %v2329_v21 = vsel %vm2231_vm7, %v2182_v24, %v2280_v53  ;;  %v2183_v38 = vadd.f32 %v3406_v6, %v2127_v0 }
 0x266   :  { %2379 = vst.msk [vmem:[%s4759_s3 + $0x178] sm:$0xff] %vm2331_vm5, %v2329_v21  ;;  %v3187_v39 = vpop.f32.mrf.mxu0  ;;  %v3297_v22 = vpop.f32.mrf.mxu1 }
 0x267   :  { %vm2232_vm8 = vcmp.gt.f32.partialorder %v2183_v38, 0.0  ;;  %v2281_v4 = vmul.f32 0.01, %v2183_v38 }
 0x269   :  { %v2330_v5 = vsel %vm2232_vm8, %v2183_v38, %v2281_v4 }
 0x26a   :  { %2380 = vst.msk [vmem:[%s4759_s3 + $0x180] sm:$0xff] %vm2331_vm5, %v2330_v5 }

// kernel: cifar_cnn_forward.5
= control target key start
LH: loop header
LB: loop body
LE: loop exit
PB: predicated region body
PF: predicated region fallthrough
CT: control target
= control target key end

     0   :  { %v1869_v0 = vmov 0   ;;  %vm322_vm0 = vcmask 130048   ;;  %vm1353_vm1 = vcmask 261120   ;;  %s2557_s1 = inlined_call_operand.vmem [shape: bf16[400,32], index: 1, kind: input, shape index: {}]   ;;  %s2558_s0 = inlined_call_operand.vmem [shape: bf16[4,72,400], index: 0, kind: input, shape index: {}]   ;;  %s2559_s2 = inlined_call_operand.vmem [shape: f32[1,32], index: 2, kind: input, shape index: {}]   ;;  %s2560_s3 = inlined_call_operand.vmem [shape: f32[72,32], index: 3, kind: output, shape index: {}]  }
   0x1   :  { %410 = vmatprep.subr.bf16.mxu1 %v1869_v0  ;;  %v1894_v1 = vld [vmem:[%s2557_s1 + $0x78] sm:$0xff]   ;;  %v1911_v4 = vld [vmem:[%s2557_s1 + $0x70] sm:$0xff]   ;;  %v1929_v7 = vld [vmem:[%s2557_s1 + $0x68] sm:$0xff]  }
   0x2   :  { %v1899_v2 = vld [vmem:[%s2557_s1 + $0xb8] sm:$0xff]   ;;  %1547 = vmatprep.subr.bf16.mxu0 %v1894_v1  ;;  %v1918_v5 = vld [vmem:[%s2557_s1 + $0xb0] sm:$0xff]   ;;  %v1935_v8 = vld [vmem:[%s2557_s1 + $0xa8] sm:$0xff]  }
   0x3   :  { %v1905_v3 = vld [vmem:[%s2557_s1 + $0x38] sm:$0xff]   ;;  %411 = vmatpush1.bf16.msra.mxu1 %v1899_v2  ;;  %v1924_v6 = vld [vmem:[%s2557_s1 + $0x30] sm:$0xff]   ;;  %v1942_v9 = vld [vmem:[%s2557_s1 + $0x28] sm:$0xff]  }
   0x4   :  { %1548 = vmatpush3.bf16.msra.mxu0 %v1905_v3  ;;  %412 = vmatprep.subr.bf16.mxu1 %v1869_v0  ;;  %v1948_v10 = vld [vmem:[%s2557_s1 + $0x60] sm:$0xff]   ;;  %v1967_v13 = vld [vmem:[%s2557_s1 + $0x58] sm:$0xff]   ;;  %v1986_v16 = vld [vmem:[%s2557_s1 + $0x50] sm:$0xff]  }
   0x5   :  { %1549 = vmatprep.subr.bf16.mxu0 %v1911_v4  ;;  %v1954_v11 = vld [vmem:[%s2557_s1 + $0xa0] sm:$0xff]   ;;  %v1973_v14 = vld [vmem:[%s2557_s1 + $0x98] sm:$0xff]   ;;  %v1992_v17 = vld [vmem:[%s2557_s1 + $0x90] sm:$0xff]  }
   0x6   :  { %v1961_v12 = vld [vmem:[%s2557_s1 + $0x20] sm:$0xff]   ;;  %v1980_v15 = vld [vmem:[%s2557_s1 + $0x18] sm:$0xff]   ;;  %v1999_v18 = vld [vmem:[%s2557_s1 + $0x10] sm:$0xff]  }
   0x7   :  { %413 = vmatpush1.bf16.msra.mxu1 %v1918_v5  ;;  %v2005_v19 = vld [vmem:[%s2557_s1 + $0x48] sm:$0xff]   ;;  %v2023_v22 = vld [vmem:[%s2557_s1 + $0x40] sm:$0xff]   ;;  %v1433_v62 = vld [vmem:[%s2558_s0 + $0x110] sm:$0xff] }
   0x8   :  { %1550 = vmatpush3.bf16.msra.mxu0 %v1924_v6  ;;  %414 = vmatprep.subr.bf16.mxu1 %v1869_v0  ;;  %v2010_v20 = vld [vmem:[%s2557_s1 + $0x88] sm:$0xff]   ;;  %v1758_v23 = vld [vmem:[%s2558_s0 + $0x4] ss:$16 sps:$4 sm:$0xff]   ;;  %v1756_v27 = vld [vmem:[%s2558_s0] ss:$16 sps:$4 sm:$0xff]  }
   0x9   :  { %1551 = vmatprep.subr.bf16.mxu0 %v1929_v7  ;;  %v2016_v21 = vld [vmem:[%s2557_s1 + $0x8] sm:$0xff]   ;;  %v2033_v24 = vld [vmem:[%s2557_s1 + $0x80] sm:$0xff]   ;;  %370 = vmatprep.mubr.bf16.mxu0 %v1758_v23  ;;  %v1452_v23 = vcombine.high %v1433_v62, %v1433_v62 }
   0xa   :  { %v1762_v25 = vld [vmem:[%s2558_s0 + $0xc] ss:$16 sps:$4 sm:$0xff]   ;;  %v2043_v26 = vld [vmem:[%s2557_s1] sm:$0xff]   ;;  %v1760_v30 = vld [vmem:[%s2558_s0 + $0x8] ss:$16 sps:$4 sm:$0xff]  }
   0xb   :  { %415 = vmatpush1.bf16.msra.mxu1 %v1935_v8  ;;  %1412 = vmatprep.mubr.msk.bf16.mxu1 %vm322_vm0, %v1762_v25  ;;  %v2054_v28 = vld [vmem:[%s2557_s1 + $0xc0] sm:$0xff]   ;;  %v1766_v31 = vld [vmem:[%s2558_s0 + $0x2c] ss:$16 sps:$4 sm:$0xff]   ;;  %v1768_v34 = vld [vmem:[%s2558_s0 + $0x28] ss:$16 sps:$4 sm:$0xff]  }
   0xc   :  { %1552 = vmatpush3.bf16.msra.mxu0 %v1942_v9  ;;  %416 = vmatprep.subr.bf16.mxu1 %v1869_v0  ;;  %v1763_v29 = vld [vmem:[%s2558_s0 + $0x24] ss:$16 sps:$4 sm:$0xff]   ;;  %v1765_v32 = vld [vmem:[%s2558_s0 + $0x20] ss:$16 sps:$4 sm:$0xff]   ;;  %v1772_v35 = vld [vmem:[%s2558_s0 + $0x4c] ss:$16 sps:$4 sm:$0xff]  }
   0xd   :  { %1553 = vmatprep.subr.bf16.mxu0 %v1948_v10  ;;  %v1769_v33 = vld [vmem:[%s2558_s0 + $0x44] ss:$16 sps:$4 sm:$0xff]   ;;  %v1771_v36 = vld [vmem:[%s2558_s0 + $0x40] ss:$16 sps:$4 sm:$0xff]   ;;  %v1774_v38 = vld [vmem:[%s2558_s0 + $0x48] ss:$16 sps:$4 sm:$0xff]  }
   0xe   :  { %v1775_v37 = vld [vmem:[%s2558_s0 + $0x64] ss:$16 sps:$4 sm:$0xff]   ;;  %v1778_v39 = vld [vmem:[%s2558_s0 + $0x6c] ss:$16 sps:$4 sm:$0xff]   ;;  %v1777_v41 = vld [vmem:[%s2558_s0 + $0x60] ss:$16 sps:$4 sm:$0xff]  }
   0xf   :  { %417 = vmatpush1.bf16.msra.mxu1 %v1954_v11  ;;  %v81_v40 = vld [vmem:[%s2558_s0 + $0x80] sm:$0xff]  ;;  %v82_v43 = vld [vmem:[%s2558_s0 + $0x88] sm:$0xff]  ;;  %v1434_v25 = vld [vmem:[%s2558_s0 + $0x118] sm:$0xff] }
  0x10   :  { %1554 = vmatpush3.bf16.msra.mxu0 %v1961_v12  ;;  %418 = vmatprep.subr.bf16.mxu1 %v1869_v0  ;;  %v1384_v42 = vcombine.high %v81_v40, %v81_v40  ;;  %v1780_v44 = vld [vmem:[%s2558_s0 + $0x68] ss:$16 sps:$4 sm:$0xff]   ;;  %v1386_v45 = vcombine.high %v82_v43, %v82_v43  ;;  %v1383_v46 = vcombine.low %v81_v40, %v81_v40  ;;  %v1787_v47 = vld [vmem:[%s2558_s0 + $0x94] ss:$16 sps:$4 sm:$0xff]   ;;  %v1790_v49 = vld [vmem:[%s2558_s0 + $0x9c] ss:$16 sps:$4 sm:$0xff]  }
  0x11   :  { %1555 = vmatprep.subr.bf16.mxu0 %v1967_v13  ;;  %v1385_v48 = vcombine.low %v82_v43, %v82_v43  ;;  %v1785_v50 = vld [vmem:[%s2558_s0 + $0x90] ss:$16 sps:$4 sm:$0xff]   ;;  %v1791_v51 = vld [vmem:[%s2558_s0 + $0xb4] ss:$16 sps:$4 sm:$0xff]   ;;  %v1788_v52 = vld [vmem:[%s2558_s0 + $0x98] ss:$16 sps:$4 sm:$0xff]  }
  0x12   :  { %v1794_v53 = vld [vmem:[%s2558_s0 + $0xbc] ss:$16 sps:$4 sm:$0xff]   ;;  %v1793_v54 = vld [vmem:[%s2558_s0 + $0xb0] ss:$16 sps:$4 sm:$0xff]   ;;  %v1797_v55 = vld [vmem:[%s2558_s0 + $0xd4] ss:$16 sps:$4 sm:$0xff]  }
  0x13   :  { %419 = vmatpush1.bf16.msra.mxu1 %v1973_v14  ;;  %v1796_v56 = vld [vmem:[%s2558_s0 + $0xb8] ss:$16 sps:$4 sm:$0xff]   ;;  %v1800_v57 = vld [vmem:[%s2558_s0 + $0xdc] ss:$16 sps:$4 sm:$0xff]   ;;  %v1799_v58 = vld [vmem:[%s2558_s0 + $0xd0] ss:$16 sps:$4 sm:$0xff]  }
  0x14   :  { %1556 = vmatpush3.bf16.msra.mxu0 %v1980_v15  ;;  %420 = vmatprep.subr.bf16.mxu1 %v1869_v0  ;;  %v1803_v59 = vld [vmem:[%s2558_s0 + $0xf4] ss:$16 sps:$4 sm:$0xff]   ;;  %v1802_v60 = vld [vmem:[%s2558_s0 + $0xd8] ss:$16 sps:$4 sm:$0xff]   ;;  %v1806_v61 = vld [vmem:[%s2558_s0 + $0xfc] ss:$16 sps:$4 sm:$0xff]  }
  0x15   :  { %1557 = vmatprep.subr.bf16.mxu0 %v1986_v16  ;;  %v1805_v63 = vld [vmem:[%s2558_s0 + $0xf0] ss:$16 sps:$4 sm:$0xff]   ;;  %v1858_v40 = vld [vmem:[%s2558_s0 + $0x1f8] ss:$16 sps:$4 sm:$0xff]  }
  0x16   :  { %v1861_v43 = vld [vmem:[%s2558_s0 + $0x210] ss:$16 sps:$4 sm:$0xff]  }
  0x17   :  { %421 = vmatpush1.bf16.msra.mxu1 %v1992_v17 }
  0x18   :  { %1558 = vmatpush3.bf16.msra.mxu0 %v1999_v18  ;;  %422 = vmatprep.subr.bf16.mxu1 %v1869_v0 }
  0x19   :  { %1559 = vmatprep.subr.bf16.mxu0 %v2005_v19 }
  0x1b   :  { %423 = vmatpush1.bf16.msra.mxu1 %v2010_v20 }
  0x1c   :  { %1560 = vmatpush3.bf16.msra.mxu0 %v2016_v21  ;;  %424 = vmatprep.subr.bf16.mxu1 %v1869_v0 }
  0x1d   :  { %1561 = vmatprep.subr.bf16.mxu0 %v2023_v22 }
  0x1f   :  { %425 = vmatpush1.bf16.msra.mxu1 %v2033_v24 }
  0x20   :  { %1562 = vmatpush3.bf16.msra.mxu0 %v2043_v26  ;;  %440 = vmatprep.subr.bf16.mxu1 %v1869_v0 }
  0x21   :  { %1593 = vmatprep.subr.bf16.mxu0 %v1894_v1 }
  0x23   :  { %371 = vmatmul.mubr.bf16.vlgmr.msra.gmra.mxu0 %v1756_v27  ;;  %441 = vmatpush2.bf16.msra.mxu1 %v2054_v28  ;;  %v1808_v27 = vld [vmem:[%s2558_s0 + $0xf8] ss:$16 sps:$4 sm:$0xff]  }
  0x24   :  { %1594 = vmatpush3.bf16.msra.mxu0 %v1905_v3  ;;  %677 = vmatprep.subr.bf16.mxu1 %v1869_v0 }
  0x25   :  { %1595 = vmatprep.subr.bf16.mxu0 %v1911_v4  ;;  %378 = vmatprep.mubr.bf16.mxu0 %v1763_v29  ;;  %v1454_v29 = vcombine.high %v1434_v25, %v1434_v25 }
  0x26   :  { %443 = vmatmul.mubr.bf16.vlgmr.msra.gmra.mxu1 %v1760_v30  ;;  %v1451_v30 = vcombine.low %v1433_v62, %v1433_v62 }
  0x27   :  { %678 = vmatpush1.bf16.msra.mxu1 %v1899_v2  ;;  %1413 = vmatprep.mubr.msk.bf16.mxu1 %vm322_vm0, %v1766_v31  ;;  %v1815_v31 = vld [vmem:[%s2558_s0 + $0x124] ss:$16 sps:$4 sm:$0xff]  }
  0x28   :  { %1596 = vmatpush3.bf16.msra.mxu0 %v1924_v6  ;;  %679 = vmatprep.subr.bf16.mxu1 %v1869_v0 }
  0x29   :  { %1597 = vmatprep.subr.bf16.mxu0 %v1929_v7 }
  0x2b   :  { %379 = vmatmul.mubr.bf16.gmra.mxu0 %v1765_v32  ;;  %680 = vmatpush1.bf16.msra.mxu1 %v1918_v5  ;;  %v1453_v32 = vcombine.low %v1434_v25, %v1434_v25 }
  0x2c   :  { %1598 = vmatpush3.bf16.msra.mxu0 %v1942_v9  ;;  %681 = vmatprep.subr.bf16.mxu1 %v1869_v0 }
  0x2d   :  { %386 = vmatprep.mubr.bf16.mxu0 %v1769_v33  ;;  %1599 = vmatprep.subr.bf16.mxu0 %v1948_v10  ;;  %v1818_v33 = vld [vmem:[%s2558_s0 + $0x12c] ss:$16 sps:$4 sm:$0xff]  }
  0x2e   :  { %451 = vmatmul.mubr.bf16.gmra.mxu1 %v1768_v34  ;;  %v1813_v34 = vld [vmem:[%s2558_s0 + $0x120] ss:$16 sps:$4 sm:$0xff]  }
  0x2f   :  { %682 = vmatpush1.bf16.msra.mxu1 %v1935_v8  ;;  %1414 = vmatprep.mubr.msk.bf16.mxu1 %vm322_vm0, %v1772_v35  ;;  %v1816_v35 = vld [vmem:[%s2558_s0 + $0x128] ss:$16 sps:$4 sm:$0xff]  }
  0x30   :  { %1600 = vmatpush3.bf16.msra.mxu0 %v1961_v12  ;;  %683 = vmatprep.subr.bf16.mxu1 %v1869_v0 }
  0x31   :  { %1601 = vmatprep.subr.bf16.mxu0 %v1967_v13 }
  0x33   :  { %387 = vmatmul.mubr.bf16.gmra.mxu0 %v1771_v36  ;;  %684 = vmatpush1.bf16.msra.mxu1 %v1954_v11  ;;  %v1822_v36 = vld [vmem:[%s2558_s0 + $0x14c] ss:$16 sps:$4 sm:$0xff]  }
  0x34   :  { %1602 = vmatpush3.bf16.msra.mxu0 %v1980_v15  ;;  %685 = vmatprep.subr.bf16.mxu1 %v1869_v0 }
  0x35   :  { %394 = vmatprep.mubr.bf16.mxu0 %v1775_v37  ;;  %1603 = vmatprep.subr.bf16.mxu0 %v1986_v16  ;;  %v1821_v37 = vld [vmem:[%s2558_s0 + $0x140] ss:$16 sps:$4 sm:$0xff]  }
  0x36   :  { %459 = vmatmul.mubr.bf16.gmra.mxu1 %v1774_v38  ;;  %v1855_v38 = vld [vmem:[%s2558_s0 + $0x1f0] ss:$16 sps:$4 sm:$0xff]  }
  0x37   :  { %686 = vmatpush1.bf16.msra.mxu1 %v1973_v14  ;;  %1415 = vmatprep.mubr.msk.bf16.mxu1 %vm322_vm0, %v1778_v39  ;;  %v1859_v39 = vld [vmem:[%s2558_s0 + $0x214] ss:$16 sps:$4 sm:$0xff]  }
  0x38   :  { %1604 = vmatpush3.bf16.msra.mxu0 %v1999_v18  ;;  %687 = vmatprep.subr.bf16.mxu1 %v1869_v0 }
  0x39   :  { %1605 = vmatprep.subr.bf16.mxu0 %v2005_v19 }
  0x3b   :  { %395 = vmatmul.mubr.bf16.gmra.mxu0 %v1777_v41  ;;  %688 = vmatpush1.bf16.msra.mxu1 %v1992_v17  ;;  %v1862_v41 = vld [vmem:[%s2558_s0 + $0x21c] ss:$16 sps:$4 sm:$0xff]  }
  0x3c   :  { %402 = vmatprep.mubr.bf16.mxu0 %v1384_v42  ;;  %1606 = vmatpush3.bf16.msra.mxu0 %v2016_v21  ;;  %v1519_v42 = vld [vmem:[%s2558_s0 + $0x230] sm:$0xff] }
  0x3d   :  { %689 = vmatprep.subr.bf16.mxu1 %v1869_v0  ;;  %1607 = vmatprep.subr.bf16.mxu0 %v2023_v22 }
  0x3e   :  { %467 = vmatmul.mubr.bf16.gmra.mxu1 %v1780_v44  ;;  %v1538_v44 = vcombine.high %v1519_v42, %v1519_v42 }
  0x3f   :  { %690 = vmatpush1.bf16.msra.mxu1 %v2010_v20  ;;  %1416 = vmatprep.mubr.msk.bf16.mxu1 %vm322_vm0, %v1386_v45  ;;  %v1520_v45 = vld [vmem:[%s2558_s0 + $0x238] sm:$0xff] }
  0x40   :  { %691 = vmatprep.subr.bf16.mxu1 %v1869_v0  ;;  %1608 = vmatpush3.bf16.msra.mxu0 %v2043_v26 }
  0x41   :  { %1639 = vmatprep.subr.bf16.mxu0 %v1894_v1 }
  0x43   :  { %403 = vmatmul.mubr.bf16.gmra.mxu0 %v1383_v46  ;;  %692 = vmatpush1.bf16.msra.mxu1 %v2033_v24  ;;  %v1864_v46 = vld [vmem:[%s2558_s0 + $0x218] ss:$16 sps:$4 sm:$0xff]  }
  0x44   :  { %637 = vmatprep.mubr.bf16.mxu0 %v1787_v47  ;;  %707 = vmatprep.subr.bf16.mxu1 %v1869_v0  ;;  %v1540_v47 = vcombine.high %v1520_v45, %v1520_v45 }
  0x46   :  { %475 = vmatmul.mubr.bf16.gmra.mxu1 %v1385_v48  ;;  %v1537_v48 = vcombine.low %v1519_v42, %v1519_v42 }
  0x47   :  { %708 = vmatpush2.bf16.msra.mxu1 %v2054_v28  ;;  %1455 = vmatprep.mubr.msk.bf16.mxu1 %vm322_vm0, %v1790_v49  ;;  %v1539_v49 = vcombine.low %v1520_v45, %v1520_v45 }
  0x48   :  { %953 = vmatprep.subr.bf16.mxu1 %v1869_v0 }
  0x4b   :  { %638 = vmatmul.mubr.bf16.vlgmr.msra.gmra.mxu0 %v1785_v50 }
  0x4c   :  { %1640 = vmatpush3.bf16.msra.mxu0 %v1905_v3  ;;  %645 = vmatprep.mubr.bf16.mxu0 %v1791_v51 }
  0x4d   :  { %1641 = vmatprep.subr.bf16.mxu0 %v1911_v4 }
  0x4e   :  { %710 = vmatmul.mubr.bf16.vlgmr.msra.gmra.mxu1 %v1788_v52 }
  0x4f   :  { %954 = vmatpush1.bf16.msra.mxu1 %v1899_v2  ;;  %1456 = vmatprep.mubr.msk.bf16.mxu1 %vm322_vm0, %v1794_v53 }
  0x50   :  { %1642 = vmatpush3.bf16.msra.mxu0 %v1924_v6  ;;  %955 = vmatprep.subr.bf16.mxu1 %v1869_v0 }
  0x51   :  { %1643 = vmatprep.subr.bf16.mxu0 %v1929_v7 }
  0x53   :  { %646 = vmatmul.mubr.bf16.gmra.mxu0 %v1793_v54  ;;  %956 = vmatpush1.bf16.msra.mxu1 %v1918_v5 }
  0x54   :  { %1644 = vmatpush3.bf16.msra.mxu0 %v1942_v9  ;;  %957 = vmatprep.subr.bf16.mxu1 %v1869_v0 }
  0x55   :  { %653 = vmatprep.mubr.bf16.mxu0 %v1797_v55  ;;  %1645 = vmatprep.subr.bf16.mxu0 %v1948_v10 }
  0x56   :  { %718 = vmatmul.mubr.bf16.gmra.mxu1 %v1796_v56 }
  0x57   :  { %958 = vmatpush1.bf16.msra.mxu1 %v1935_v8  ;;  %1457 = vmatprep.mubr.msk.bf16.mxu1 %vm322_vm0, %v1800_v57 }
  0x58   :  { %1646 = vmatpush3.bf16.msra.mxu0 %v1961_v12  ;;  %959 = vmatprep.subr.bf16.mxu1 %v1869_v0 }
  0x59   :  { %1647 = vmatprep.subr.bf16.mxu0 %v1967_v13 }
  0x5b   :  { %654 = vmatmul.mubr.bf16.gmra.mxu0 %v1799_v58  ;;  %960 = vmatpush1.bf16.msra.mxu1 %v1954_v11 }
  0x5c   :  { %1648 = vmatpush3.bf16.msra.mxu0 %v1980_v15  ;;  %961 = vmatprep.subr.bf16.mxu1 %v1869_v0 }
  0x5d   :  { %661 = vmatprep.mubr.bf16.mxu0 %v1803_v59  ;;  %1649 = vmatprep.subr.bf16.mxu0 %v1986_v16 }
  0x5e   :  { %726 = vmatmul.mubr.bf16.gmra.mxu1 %v1802_v60 }
  0x5f   :  { %962 = vmatpush1.bf16.msra.mxu1 %v1973_v14  ;;  %1458 = vmatprep.mubr.msk.bf16.mxu1 %vm322_vm0, %v1806_v61 }
  0x60   :  { %1650 = vmatpush3.bf16.msra.mxu0 %v1999_v18  ;;  %963 = vmatprep.subr.bf16.mxu1 %v1869_v0 }
  0x61   :  { %1651 = vmatprep.subr.bf16.mxu0 %v2005_v19 }
  0x63   :  { %662 = vmatmul.mubr.bf16.gmra.mxu0 %v1805_v63  ;;  %964 = vmatpush1.bf16.msra.mxu1 %v1992_v17 }
  0x64   :  { %669 = vmatprep.mubr.bf16.mxu0 %v1452_v23  ;;  %1652 = vmatpush3.bf16.msra.mxu0 %v2016_v21 }
  0x65   :  { %965 = vmatprep.subr.bf16.mxu1 %v1869_v0  ;;  %1653 = vmatprep.subr.bf16.mxu0 %v2023_v22 }
  0x66   :  { %734 = vmatmul.mubr.bf16.gmra.mxu1 %v1808_v27 }
  0x67   :  { %966 = vmatpush1.bf16.msra.mxu1 %v2010_v20  ;;  %1459 = vmatprep.mubr.msk.bf16.mxu1 %vm322_vm0, %v1454_v29 }
  0x68   :  { %967 = vmatprep.subr.bf16.mxu1 %v1869_v0  ;;  %1654 = vmatpush3.bf16.msra.mxu0 %v2043_v26 }
  0x69   :  { %1685 = vmatprep.subr.bf16.mxu0 %v1894_v1  ;;  %v1819_v1 = vld [vmem:[%s2558_s0 + $0x144] ss:$16 sps:$4 sm:$0xff]  }
  0x6b   :  { %670 = vmatmul.mubr.bf16.gmra.mxu0 %v1451_v30  ;;  %968 = vmatpush1.bf16.msra.mxu1 %v2033_v24 }
  0x6c   :  { %913 = vmatprep.mubr.bf16.mxu0 %v1815_v31  ;;  %983 = vmatprep.subr.bf16.mxu1 %v1869_v0 }
  0x6e   :  { %742 = vmatmul.mubr.bf16.gmra.mxu1 %v1453_v32 }
  0x6f   :  { %984 = vmatpush2.bf16.msra.mxu1 %v2054_v28  ;;  %1498 = vmatprep.mubr.msk.bf16.mxu1 %vm322_vm0, %v1818_v33 }
  0x70   :  { %1229 = vmatprep.subr.bf16.mxu1 %v1869_v0 }
  0x73   :  { %914 = vmatmul.mubr.bf16.vlgmr.msra.gmra.mxu0 %v1813_v34 }
  0x74   :  { %1686 = vmatpush3.bf16.msra.mxu0 %v1905_v3  ;;  %921 = vmatprep.mubr.bf16.mxu0 %v1819_v1  ;;  %v1825_v3 = vld [vmem:[%s2558_s0 + $0x164] ss:$16 sps:$4 sm:$0xff]  }
  0x75   :  { %1687 = vmatprep.subr.bf16.mxu0 %v1911_v4  ;;  %v1828_v4 = vld [vmem:[%s2558_s0 + $0x16c] ss:$16 sps:$4 sm:$0xff]  }
  0x76   :  { %986 = vmatmul.mubr.bf16.vlgmr.msra.gmra.mxu1 %v1816_v35 }
  0x77   :  { %1230 = vmatpush1.bf16.msra.mxu1 %v1899_v2  ;;  %1499 = vmatprep.mubr.msk.bf16.mxu1 %vm322_vm0, %v1822_v36  ;;  %v1824_v2 = vld [vmem:[%s2558_s0 + $0x148] ss:$16 sps:$4 sm:$0xff]  }
  0x78   :  { %1688 = vmatpush3.bf16.msra.mxu0 %v1924_v6  ;;  %1231 = vmatprep.subr.bf16.mxu1 %v1869_v0  ;;  %v1827_v6 = vld [vmem:[%s2558_s0 + $0x160] ss:$16 sps:$4 sm:$0xff]  }
  0x79   :  { %1689 = vmatprep.subr.bf16.mxu0 %v1929_v7  ;;  %v1830_v7 = vld [vmem:[%s2558_s0 + $0x168] ss:$16 sps:$4 sm:$0xff]  }
  0x7b   :  { %922 = vmatmul.mubr.bf16.gmra.mxu0 %v1821_v37  ;;  %1232 = vmatpush1.bf16.msra.mxu1 %v1918_v5  ;;  %v1831_v5 = vld [vmem:[%s2558_s0 + $0x184] ss:$16 sps:$4 sm:$0xff]  }
  0x7c   :  { %1690 = vmatpush3.bf16.msra.mxu0 %v1942_v9  ;;  %1233 = vmatprep.subr.bf16.mxu1 %v1869_v0  ;;  %v1476_v9 = vld [vmem:[%s2558_s0 + $0x1a0] sm:$0xff] }
  0x7d   :  { %929 = vmatprep.mubr.bf16.mxu0 %v1825_v3  ;;  %1691 = vmatprep.subr.bf16.mxu0 %v1948_v10  ;;  %v1833_v10 = vld [vmem:[%s2558_s0 + $0x180] ss:$16 sps:$4 sm:$0xff]  }
  0x7e   :  { %994 = vmatmul.mubr.bf16.gmra.mxu1 %v1824_v2 }
  0x7f   :  { %1234 = vmatpush1.bf16.msra.mxu1 %v1935_v8  ;;  %1500 = vmatprep.mubr.msk.bf16.mxu1 %vm322_vm0, %v1828_v4  ;;  %v1834_v8 = vld [vmem:[%s2558_s0 + $0x18c] ss:$16 sps:$4 sm:$0xff]  }
  0x80   :  { %1692 = vmatpush3.bf16.msra.mxu0 %v1961_v12  ;;  %1235 = vmatprep.subr.bf16.mxu1 %v1869_v0  ;;  %v1477_v12 = vld [vmem:[%s2558_s0 + $0x1a8] sm:$0xff] }
  0x81   :  { %1693 = vmatprep.subr.bf16.mxu0 %v1967_v13  ;;  %v1836_v13 = vld [vmem:[%s2558_s0 + $0x188] ss:$16 sps:$4 sm:$0xff]  }
  0x83   :  { %930 = vmatmul.mubr.bf16.gmra.mxu0 %v1827_v6  ;;  %1236 = vmatpush1.bf16.msra.mxu1 %v1954_v11  ;;  %v1495_v11 = vcombine.high %v1476_v9, %v1476_v9 }
  0x84   :  { %1694 = vmatpush3.bf16.msra.mxu0 %v1980_v15  ;;  %1237 = vmatprep.subr.bf16.mxu1 %v1869_v0  ;;  %v1494_v15 = vcombine.low %v1476_v9, %v1476_v9 }
  0x85   :  { %937 = vmatprep.mubr.bf16.mxu0 %v1831_v5  ;;  %1695 = vmatprep.subr.bf16.mxu0 %v1986_v16  ;;  %v1843_v16 = vld [vmem:[%s2558_s0 + $0x1b4] ss:$16 sps:$4 sm:$0xff]  }
  0x86   :  { %1002 = vmatmul.mubr.bf16.gmra.mxu1 %v1830_v7 }
  0x87   :  { %1238 = vmatpush1.bf16.msra.mxu1 %v1973_v14  ;;  %1501 = vmatprep.mubr.msk.bf16.mxu1 %vm322_vm0, %v1834_v8  ;;  %v1497_v14 = vcombine.high %v1477_v12, %v1477_v12 }
  0x88   :  { %1696 = vmatpush3.bf16.msra.mxu0 %v1999_v18  ;;  %1239 = vmatprep.subr.bf16.mxu1 %v1869_v0  ;;  %v1846_v18 = vld [vmem:[%s2558_s0 + $0x1bc] ss:$16 sps:$4 sm:$0xff]  }
  0x89   :  { %1697 = vmatprep.subr.bf16.mxu0 %v2005_v19  ;;  %v1841_v19 = vld [vmem:[%s2558_s0 + $0x1b0] ss:$16 sps:$4 sm:$0xff]  }
  0x8b   :  { %938 = vmatmul.mubr.bf16.gmra.mxu0 %v1833_v10  ;;  %1240 = vmatpush1.bf16.msra.mxu1 %v1992_v17  ;;  %v1496_v17 = vcombine.low %v1477_v12, %v1477_v12 }
  0x8c   :  { %945 = vmatprep.mubr.bf16.mxu0 %v1495_v11  ;;  %1698 = vmatpush3.bf16.msra.mxu0 %v2016_v21  ;;  %v1844_v21 = vld [vmem:[%s2558_s0 + $0x1b8] ss:$16 sps:$4 sm:$0xff]  }
  0x8d   :  { %1241 = vmatprep.subr.bf16.mxu1 %v1869_v0  ;;  %1699 = vmatprep.subr.bf16.mxu0 %v2023_v22  ;;  %v1849_v22 = vld [vmem:[%s2558_s0 + $0x1d0] ss:$16 sps:$4 sm:$0xff]  }
  0x8e   :  { %1010 = vmatmul.mubr.bf16.gmra.mxu1 %v1836_v13 }
  0x8f   :  { %1242 = vmatpush1.bf16.msra.mxu1 %v2010_v20  ;;  %1502 = vmatprep.mubr.msk.bf16.mxu1 %vm322_vm0, %v1497_v14  ;;  %v1847_v20 = vld [vmem:[%s2558_s0 + $0x1d4] ss:$16 sps:$4 sm:$0xff]  }
  0x90   :  { %1243 = vmatprep.subr.bf16.mxu1 %v1869_v0  ;;  %1700 = vmatpush3.bf16.msra.mxu0 %v2043_v26  ;;  %v1852_v26 = vld [vmem:[%s2558_s0 + $0x1d8] ss:$16 sps:$4 sm:$0xff]  }
  0x93   :  { %946 = vmatmul.mubr.bf16.gmra.mxu0 %v1494_v15  ;;  %1244 = vmatpush1.bf16.msra.mxu1 %v2033_v24  ;;  %v1853_v24 = vld [vmem:[%s2558_s0 + $0x1f4] ss:$16 sps:$4 sm:$0xff]  }
  0x94   :  { %1189 = vmatprep.mubr.bf16.mxu0 %v1843_v16  ;;  %1259 = vmatprep.subr.bf16.mxu1 %v1869_v0  ;;  %v1850_v0 = vld [vmem:[%s2558_s0 + $0x1dc] ss:$16 sps:$4 sm:$0xff]  }
  0x96   :  { %1018 = vmatmul.mubr.bf16.gmra.mxu1 %v1496_v17 }
  0x97   :  { %1260 = vmatpush2.bf16.msra.mxu1 %v2054_v28  ;;  %1541 = vmatprep.mubr.msk.bf16.mxu1 %vm322_vm0, %v1846_v18  ;;  %v1856_v28 = vld [vmem:[%s2558_s0 + $0x1fc] ss:$16 sps:$4 sm:$0xff]  }
  0x9b   :  { %1190 = vmatmul.mubr.bf16.vlgmr.msra.gmra.mxu0 %v1841_v19 }
  0x9c   :  { %1197 = vmatprep.mubr.bf16.mxu0 %v1847_v20 }
  0x9e   :  { %1262 = vmatmul.mubr.bf16.vlgmr.msra.gmra.mxu1 %v1844_v21 }
  0x9f   :  { %1542 = vmatprep.mubr.msk.bf16.mxu1 %vm322_vm0, %v1850_v0 }
  0xa3   :  { %1198 = vmatmul.mubr.bf16.gmra.mxu0 %v1849_v22 }
  0xa4   :  { %1205 = vmatprep.mubr.bf16.mxu0 %v1853_v24 }
  0xa6   :  { %1270 = vmatmul.mubr.bf16.gmra.mxu1 %v1852_v26 }
  0xa7   :  { %1543 = vmatprep.mubr.msk.bf16.mxu1 %vm322_vm0, %v1856_v28 }
  0xab   :  { %1206 = vmatmul.mubr.bf16.gmra.mxu0 %v1855_v38 }
  0xac   :  { %1213 = vmatprep.mubr.bf16.mxu0 %v1859_v39 }
  0xae   :  { %1278 = vmatmul.mubr.bf16.gmra.mxu1 %v1858_v40 }
  0xaf   :  { %1544 = vmatprep.mubr.msk.bf16.mxu1 %vm322_vm0, %v1862_v41 }
  0xb3   :  { %1214 = vmatmul.mubr.bf16.gmra.mxu0 %v1861_v43 }
  0xb4   :  { %1221 = vmatprep.mubr.bf16.mxu0 %v1538_v44 }
  0xb6   :  { %1286 = vmatmul.mubr.bf16.gmra.mxu1 %v1864_v46 }
  0xb7   :  { %1545 = vmatprep.mubr.msk.bf16.mxu1 %vm322_vm0, %v1540_v47 }
  0xbb   :  { %1222 = vmatmul.mubr.bf16.gmra.mxu0 %v1537_v48 }
  0xbe   :  { %1294 = vmatmul.mubr.bf16.gmra.mxu1 %v1539_v49 }
  0xe3   :  { %v1563_v50 = vpop.f32.mrf.mxu0 }
  0xe5   :  { %v1564_v51 = vpop.f32.mrf.mxu0 }
  0xe6   :  { %v1565_v52 = vadd.f32 %v1564_v51, %v1563_v50  ;;  %v444_v53 = vpop.f32.mrf.mxu1 }
  0xe7   :  { %v1566_v54 = vpop.f32.mrf.mxu0 }
  0xe8   :  { %v2387_v55 = vadd.f32 %v1565_v52, %v444_v53  ;;  %v446_v56 = vpop.f32.mrf.mxu1 }
  0xe9   :  { %v1567_v57 = vpop.f32.mrf.mxu0 }
  0xea   :  { %v1568_v58 = vadd.f32 %v1567_v57, %v1566_v54  ;;  %v447_v59 = vpop.f32.mrf.mxu1 }
  0xeb   :  { %v1569_v60 = vpop.f32.mrf.mxu0 }
  0xec   :  { %v2389_v61 = vadd.f32 %v1568_v58, %v447_v59  ;;  %v449_v62 = vpop.f32.mrf.mxu1 }
  0xed   :  { %v1570_v63 = vpop.f32.mrf.mxu0 }
  0xee   :  { %v1571_v23 = vadd.f32 %v1570_v63, %v1569_v60  ;;  %v452_v25 = vpop.f32.mrf.mxu1 }
  0xef   :  { %v1572_v27 = vpop.f32.mrf.mxu0 }
  0xf0   :  { %v2391_v29 = vadd.f32 %v1571_v23, %v452_v25  ;;  %v454_v30 = vpop.f32.mrf.mxu1 }
  0xf1   :  { %v1573_v31 = vpop.f32.mrf.mxu0 }
  0xf2   :  { %v1574_v32 = vadd.f32 %v1573_v31, %v1572_v27  ;;  %v455_v33 = vpop.f32.mrf.mxu1 }
  0xf3   :  { %v1575_v34 = vpop.f32.mrf.mxu0 }
  0xf4   :  { %v2393_v1 = vadd.f32 %v1574_v32, %v455_v33  ;;  %v457_v35 = vpop.f32.mrf.mxu1 }
  0xf5   :  { %v1576_v36 = vpop.f32.mrf.mxu0 }
  0xf6   :  { %v1577_v37 = vadd.f32 %v1576_v36, %v1575_v34  ;;  %v460_v3 = vpop.f32.mrf.mxu1 }
  0xf7   :  { %v1578_v2 = vpop.f32.mrf.mxu0 }
  0xf8   :  { %v2395_v4 = vadd.f32 %v1577_v37, %v460_v3  ;;  %v462_v6 = vpop.f32.mrf.mxu1 }
  0xf9   :  { %v1579_v5 = vpop.f32.mrf.mxu0 }
  0xfa   :  { %v1580_v7 = vadd.f32 %v1579_v5, %v1578_v2  ;;  %v463_v8 = vpop.f32.mrf.mxu1 }
  0xfb   :  { %v1581_v9 = vpop.f32.mrf.mxu0 }
  0xfc   :  { %v2397_v10 = vadd.f32 %v1580_v7, %v463_v8  ;;  %v465_v11 = vpop.f32.mrf.mxu1 }
  0xfd   :  { %v1582_v12 = vpop.f32.mrf.mxu0 }
  0xfe   :  { %v1583_v13 = vadd.f32 %v1582_v12, %v1581_v9  ;;  %v468_v14 = vpop.f32.mrf.mxu1 }
  0xff   :  { %v1584_v15 = vpop.f32.mrf.mxu0 }
 0x100   :  { %v2399_v16 = vadd.f32 %v1583_v13, %v468_v14  ;;  %v470_v17 = vpop.f32.mrf.mxu1 }
 0x101   :  { %v1585_v18 = vpop.f32.mrf.mxu0 }
 0x102   :  { %v1586_v19 = vadd.f32 %v1585_v18, %v1584_v15  ;;  %v471_v20 = vpop.f32.mrf.mxu1 }
 0x103   :  { %v1587_v21 = vpop.f32.mrf.mxu0 }
 0x104   :  { %v2401_v0 = vadd.f32 %v1586_v19, %v471_v20  ;;  %v473_v22 = vpop.f32.mrf.mxu1 }
 0x105   :  { %v1588_v24 = vpop.f32.mrf.mxu0 }
 0x106   :  { %v1589_v26 = vadd.f32 %v1588_v24, %v1587_v21  ;;  %v476_v28 = vpop.f32.mrf.mxu1 }
 0x107   :  { %v1590_v38 = vpop.f32.mrf.mxu0 }
 0x108   :  { %v2403_v39 = vadd.f32 %v1589_v26, %v476_v28  ;;  %v478_v40 = vpop.f32.mrf.mxu1 }
 0x109   :  { %v1591_v41 = vpop.f32.mrf.mxu0 }
 0x10a   :  { %v479_v42 = vpop.f32.mrf.mxu1 }
 0x10b   :  { %v1609_v43 = vpop.f32.mrf.mxu0 }
 0x10c   :  { %v480_v44 = vpop.f32.mrf.mxu1 }
 0x10d   :  { %v1610_v45 = vpop.f32.mrf.mxu0 }
 0x10e   :  { %v1611_v46 = vadd.f32 %v1610_v45, %v1609_v43  ;;  %v711_v47 = vpop.f32.mrf.mxu1 }
 0x10f   :  { %v1612_v48 = vpop.f32.mrf.mxu0 }
 0x110   :  { %v2405_v49 = vadd.f32 %v1611_v46, %v711_v47  ;;  %v713_v50 = vpop.f32.mrf.mxu1 }
 0x111   :  { %v1613_v51 = vpop.f32.mrf.mxu0 }
 0x112   :  { %v749_v52 = vmax.f32 %v2387_v55, %v2405_v49  ;;  %v1614_v53 = vadd.f32 %v1613_v51, %v1612_v48  ;;  %v714_v54 = vpop.f32.mrf.mxu1 }
 0x113   :  { %v1615_v56 = vpop.f32.mrf.mxu0 }
 0x114   :  { %v2409_v57 = vadd.f32 %v1614_v53, %v714_v54  ;;  %v716_v58 = vpop.f32.mrf.mxu1 }
 0x115   :  { %v1616_v59 = vpop.f32.mrf.mxu0 }
 0x116   :  { %v750_v60 = vmax.f32 %v2389_v61, %v2409_v57  ;;  %v1617_v62 = vadd.f32 %v1616_v59, %v1615_v56  ;;  %v719_v63 = vpop.f32.mrf.mxu1 }
 0x117   :  { %v1618_v23 = vpop.f32.mrf.mxu0 }
 0x118   :  { %v2413_v25 = vadd.f32 %v1617_v62, %v719_v63  ;;  %v721_v27 = vpop.f32.mrf.mxu1 }
 0x119   :  { %v1619_v30 = vpop.f32.mrf.mxu0 }
 0x11a   :  { %v1620_v32 = vadd.f32 %v1619_v30, %v1618_v23  ;;  %v722_v33 = vpop.f32.mrf.mxu1 }
 0x11b   :  { %v1621_v34 = vpop.f32.mrf.mxu0 }
 0x11c   :  { %v2417_v35 = vadd.f32 %v1620_v32, %v722_v33  ;;  %v724_v36 = vpop.f32.mrf.mxu1 }
 0x11d   :  { %v1622_v37 = vpop.f32.mrf.mxu0 }
 0x11e   :  { %v1623_v2 = vadd.f32 %v1622_v37, %v1621_v34  ;;  %v727_v6 = vpop.f32.mrf.mxu1 }
 0x11f   :  { %v1624_v5 = vpop.f32.mrf.mxu0 }
 0x120   :  { %v2421_v7 = vadd.f32 %v1623_v2, %v727_v6  ;;  %v729_v8 = vpop.f32.mrf.mxu1 }
 0x121   :  { %v1625_v9 = vpop.f32.mrf.mxu0 }
 0x122   :  { %v1626_v12 = vadd.f32 %v1625_v9, %v1624_v5  ;;  %v730_v13 = vpop.f32.mrf.mxu1 }
 0x123   :  { %v1627_v14 = vpop.f32.mrf.mxu0 }
 0x124   :  { %v2425_v15 = vadd.f32 %v1626_v12, %v730_v13  ;;  %v732_v17 = vpop.f32.mrf.mxu1 }
 0x125   :  { %v1628_v18 = vpop.f32.mrf.mxu0 }
 0x126   :  { %v1629_v20 = vadd.f32 %v1628_v18, %v1627_v14  ;;  %v735_v21 = vpop.f32.mrf.mxu1 }
 0x127   :  { %v1630_v22 = vpop.f32.mrf.mxu0 }
 0x128   :  { %v2429_v24 = vadd.f32 %v1629_v20, %v735_v21  ;;  %v737_v26 = vpop.f32.mrf.mxu1 }
 0x129   :  { %v1631_v28 = vpop.f32.mrf.mxu0 }
 0x12a   :  { %v1632_v40 = vadd.f32 %v1631_v28, %v1630_v22  ;;  %v738_v41 = vpop.f32.mrf.mxu1 }
 0x12b   :  { %v1633_v42 = vpop.f32.mrf.mxu0 }
 0x12c   :  { %v2433_v43 = vadd.f32 %v1632_v40, %v738_v41  ;;  %v740_v44 = vpop.f32.mrf.mxu1 }
 0x12d   :  { %v1634_v45 = vpop.f32.mrf.mxu0 }
 0x12e   :  { %v1635_v47 = vadd.f32 %v1634_v45, %v1633_v42  ;;  %v743_v48 = vpop.f32.mrf.mxu1 }
 0x12f   :  { %v1636_v50 = vpop.f32.mrf.mxu0 }
 0x130   :  { %v2437_v51 = vadd.f32 %v1635_v47, %v743_v48  ;;  %v745_v53 = vpop.f32.mrf.mxu1 }
 0x131   :  { %v1637_v54 = vpop.f32.mrf.mxu0 }
 0x132   :  { %v746_v58 = vpop.f32.mrf.mxu1 }
 0x133   :  { %v1655_v59 = vpop.f32.mrf.mxu0 }
 0x134   :  { %v747_v62 = vpop.f32.mrf.mxu1 }
 0x135   :  { %v1656_v63 = vpop.f32.mrf.mxu0 }
 0x136   :  { %v987_v23 = vpop.f32.mrf.mxu1  ;;  %v1657_v62 = vadd.f32 %v1656_v63, %v1655_v59  ;;  %v2473_v59 = vld [vmem:[%s2559_s2] ss:$0 sm:$0xff] }
 0x137   :  { %v1658_v27 = vpop.f32.mrf.mxu0 }
 0x138   :  { %v989_v30 = vpop.f32.mrf.mxu1 }
 0x139   :  { %v1659_v32 = vpop.f32.mrf.mxu0 }
 0x13a   :  { %v990_v33 = vpop.f32.mrf.mxu1 }
 0x13b   :  { %v1661_v34 = vpop.f32.mrf.mxu0 }
 0x13c   :  { %v992_v36 = vpop.f32.mrf.mxu1 }
 0x13d   :  { %v1662_v37 = vpop.f32.mrf.mxu0 }
 0x13e   :  { %v995_v2 = vpop.f32.mrf.mxu1  ;;  %v1663_v3 = vadd.f32 %v1662_v37, %v1661_v34 }
 0x13f   :  { %v1664_v6 = vpop.f32.mrf.mxu0 }
 0x140   :  { %v997_v5 = vpop.f32.mrf.mxu1  ;;  %v996_v49 = vadd.f32 %v1663_v3, %v995_v2 }
 0x141   :  { %v1665_v8 = vpop.f32.mrf.mxu0 }
 0x142   :  { %v998_v9 = vpop.f32.mrf.mxu1 }
 0x143   :  { %v1667_v12 = vpop.f32.mrf.mxu0 }
 0x144   :  { %v1000_v13 = vpop.f32.mrf.mxu1 }
 0x145   :  { %v1668_v14 = vpop.f32.mrf.mxu0 }
 0x146   :  { %v2441_v17 = vpop.f32.mrf.mxu1 }
 0x147   :  { %v2443_v18 = vpop.f32.mrf.mxu0 }
 0x148   :  { %v1005_v20 = vpop.f32.mrf.mxu1 }
 0x149   :  { %v2445_v21 = vpop.f32.mrf.mxu0  ;;  %v988_v20 = vadd.f32 %v1657_v62, %v987_v23 }
 0x14a   :  { %v2447_v22 = vpop.f32.mrf.mxu1 }
 0x14b   :  { %v2449_v26 = vpop.f32.mrf.mxu0 }
 0x14c   :  { %v1008_v28 = vpop.f32.mrf.mxu1 }
 0x14d   :  { %v2451_v40 = vpop.f32.mrf.mxu0  ;;  %v1660_v28 = vadd.f32 %v1659_v32, %v1658_v27 }
 0x14e   :  { %v2453_v41 = vpop.f32.mrf.mxu1 }
 0x14f   :  { %v2455_v42 = vpop.f32.mrf.mxu0  ;;  %v991_v11 = vadd.f32 %v1660_v28, %v990_v33  ;;  %v1672_v28 = vadd.f32 %v2445_v21, %v2443_v18  ;;  %v1675_v21 = vadd.f32 %v2451_v40, %v2449_v26 }
 0x150   :  { %v1013_v44 = vpop.f32.mrf.mxu1 }
 0x151   :  { %v2457_v45 = vpop.f32.mrf.mxu0  ;;  %v1026_v55 = vmax.f32 %v750_v60, %v991_v11  ;;  %v1012_v26 = vadd.f32 %v1675_v21, %v2453_v41 }
 0x152   :  { %v2459_v47 = vpop.f32.mrf.mxu1 }
 0x153   :  { %v2461_v48 = vpop.f32.mrf.mxu0 }
 0x154   :  { %v1016_v50 = vpop.f32.mrf.mxu1 }
 0x155   :  { %v2463_v53 = vpop.f32.mrf.mxu0  ;;  %v1025_v50 = vmax.f32 %v749_v52, %v988_v20 }
 0x156   :  { %v2465_v54 = vpop.f32.mrf.mxu1 }
 0x157   :  { %v1682_v58 = vpop.f32.mrf.mxu0 }
 0x158   :  { %v1021_v30 = vpop.f32.mrf.mxu1 }
 0x159   :  { %v1683_v36 = vpop.f32.mrf.mxu0 }
 0x15a   :  { %v1022_v5 = vpop.f32.mrf.mxu1  ;;  %v1669_v36 = vadd.f32 %v1668_v14, %v1667_v12 }
 0x15b   :  { %v1701_v13 = vpop.f32.mrf.mxu0 }
 0x15c   :  { %v1023_v44 = vpop.f32.mrf.mxu1 }
 0x15d   :  { %v1702_v56 = vpop.f32.mrf.mxu0 }
 0x15e   :  { %v1703_v46 = vadd.f32 %v1702_v56, %v1701_v13  ;;  %v1263_v38 = vpop.f32.mrf.mxu1  ;;  %v1666_v56 = vadd.f32 %v1665_v8, %v1664_v6  ;;  %v2561_v8 = vmax.f32 %v2391_v29, %v2413_v25  ;;  %v2562_v29 = vmax.f32 %v2393_v1, %v2417_v35 }
 0x15f   :  { %v1704_v19 = vpop.f32.mrf.mxu0  ;;  %v1004_v13 = vadd.f32 %v1669_v36, %v2441_v17 }
 0x160   :  { %v1264_v31 = vadd.f32 %v1703_v46, %v1263_v38  ;;  %v1265_v58 = vpop.f32.mrf.mxu1  ;;  %v1027_v61 = vmax.f32 %v2561_v8, %v996_v49 }
 0x161   :  { %v1705_v63 = vpop.f32.mrf.mxu0 }
 0x162   :  { %v1301_v23 = vmax.f32 %v1025_v50, %v1264_v31  ;;  %v1706_v27 = vadd.f32 %v1705_v63, %v1704_v19  ;;  %v1266_v32 = vpop.f32.mrf.mxu1  ;;  %v999_v19 = vadd.f32 %v1666_v56, %v998_v9 }
 0x163   :  { %v1707_v62 = vpop.f32.mrf.mxu0 }
 0x164   :  { %v1317_v52 = vadd.f32 %v2473_v59, %v1301_v23  ;;  %v1267_v38 = vadd.f32 %v1706_v27, %v1266_v32  ;;  %v1268_v46 = vpop.f32.mrf.mxu1  ;;  %v1028_v25 = vmax.f32 %v2562_v29, %v999_v19  ;;  %v2563_v32 = vmax.f32 %v2395_v4, %v2421_v7 }
 0x165   :  { %v1708_v33 = vpop.f32.mrf.mxu0  ;;  %v2566_v29 = vmax.f32 %v2401_v0, %v2433_v43 }
 0x166   :  { %vm1326_vm2 = vcmp.gt.f32.partialorder %v1317_v52, 0.0  ;;  %v1335_v34 = vmul.f32 0.01, %v1317_v52  ;;  %v1302_v37 = vmax.f32 %v1026_v55, %v1267_v38  ;;  %v1709_v30 = vadd.f32 %v1708_v33, %v1707_v62  ;;  %v1271_v31 = vpop.f32.mrf.mxu1 }
 0x167   :  { %v1710_v6 = vpop.f32.mrf.mxu0  ;;  %v1029_v18 = vmax.f32 %v2563_v32, %v1004_v13  ;;  %v1007_v62 = vadd.f32 %v1672_v28, %v2447_v22  ;;  %v1678_v22 = vadd.f32 %v2457_v45, %v2455_v42 }
 0x168   :  { %v1344_v57 = vsel %vm1326_vm2, %v1317_v52, %v1335_v34  ;;  %v1318_v60 = vadd.f32 %v2473_v59, %v1302_v37  ;;  %v1272_v3 = vadd.f32 %v1709_v30, %v1271_v31  ;;  %v1273_v11 = vpop.f32.mrf.mxu1  ;;  %v2564_v37 = vmax.f32 %v2397_v10, %v2425_v15 }
 0x169   :  { %1354 = vst.msk [vmem:[%s2560_s3] sm:$0xff] %vm1353_vm1, %v1344_v57  ;;  %v1711_v2 = vpop.f32.mrf.mxu0  ;;  %v2565_v10 = vmax.f32 %v2399_v16, %v2429_v24  ;;  %v1015_v57 = vadd.f32 %v1678_v22, %v2459_v47 }
 0x16a   :  { %vm1327_vm3 = vcmp.gt.f32.partialorder %v1318_v60, 0.0  ;;  %v1336_v5 = vmul.f32 0.01, %v1318_v60  ;;  %v1303_v9 = vmax.f32 %v1027_v61, %v1272_v3  ;;  %v1712_v12 = vadd.f32 %v1711_v2, %v1710_v6  ;;  %v1274_v14 = vpop.f32.mrf.mxu1 }
 0x16b   :  { %v1713_v20 = vpop.f32.mrf.mxu0  ;;  %v1030_v30 = vmax.f32 %v2564_v37, %v1007_v62  ;;  %v1031_v15 = vmax.f32 %v2565_v10, %v1012_v26  ;;  %v1681_v3 = vadd.f32 %v2463_v53, %v2461_v48  ;;  %v1032_v48 = vmax.f32 %v2566_v29, %v1015_v57 }
 0x16c   :  { %v1345_v44 = vsel %vm1327_vm3, %v1318_v60, %v1336_v5  ;;  %v1319_v50 = vadd.f32 %v2473_v59, %v1303_v9  ;;  %v1275_v58 = vadd.f32 %v1712_v12, %v1274_v14  ;;  %v1276_v63 = vpop.f32.mrf.mxu1 }
 0x16d   :  { %1355 = vst.msk [vmem:[%s2560_s3 + $0x8] sm:$0xff] %vm1353_vm1, %v1345_v44  ;;  %v1714_v23 = vpop.f32.mrf.mxu0 }
 0x16e   :  { %vm1328_vm4 = vcmp.gt.f32.partialorder %v1319_v50, 0.0  ;;  %v1337_v1 = vmul.f32 0.01, %v1319_v50  ;;  %v1304_v35 = vmax.f32 %v1028_v25, %v1275_v58  ;;  %v1715_v27 = vadd.f32 %v1714_v23, %v1713_v20  ;;  %v1279_v17 = vpop.f32.mrf.mxu1 }
 0x16f   :  { %v1716_v56 = vpop.f32.mrf.mxu0  ;;  %v1020_v25 = vadd.f32 %v1681_v3, %v2465_v54  ;;  %v2567_v54 = vmax.f32 %v2403_v39, %v2437_v51 }
 0x170   :  { %v1346_v55 = vsel %vm1328_vm4, %v1319_v50, %v1337_v1  ;;  %v1320_v49 = vadd.f32 %v2473_v59, %v1304_v35  ;;  %v1280_v52 = vadd.f32 %v1715_v27, %v1279_v17  ;;  %v1281_v38 = vpop.f32.mrf.mxu1 }
 0x171   :  { %1356 = vst.msk [vmem:[%s2560_s3 + $0x10] sm:$0xff] %vm1353_vm1, %v1346_v55  ;;  %v1717_v46 = vpop.f32.mrf.mxu0  ;;  %v1033_v1 = vmax.f32 %v2567_v54, %v1020_v25 }
 0x172   :  { %vm1329_vm5 = vcmp.gt.f32.partialorder %v1320_v49, 0.0  ;;  %v1338_v4 = vmul.f32 0.01, %v1320_v49  ;;  %v1305_v7 = vmax.f32 %v1029_v18, %v1280_v52  ;;  %v1718_v33 = vadd.f32 %v1717_v46, %v1716_v56  ;;  %v1282_v34 = vpop.f32.mrf.mxu1 }
 0x173   :  { %v1719_v40 = vpop.f32.mrf.mxu0 }
 0x174   :  { %v1347_v31 = vsel %vm1329_vm5, %v1320_v49, %v1338_v4  ;;  %v1321_v19 = vadd.f32 %v2473_v59, %v1305_v7  ;;  %v1283_v36 = vadd.f32 %v1718_v33, %v1282_v34  ;;  %v1284_v6 = vpop.f32.mrf.mxu1 }
 0x175   :  { %1357 = vst.msk [vmem:[%s2560_s3 + $0x18] sm:$0xff] %vm1353_vm1, %v1347_v31  ;;  %v1720_v8 = vpop.f32.mrf.mxu0 }
 0x176   :  { %vm1330_vm6 = vcmp.gt.f32.partialorder %v1321_v19, 0.0  ;;  %v1339_v41 = vmul.f32 0.01, %v1321_v19  ;;  %v1306_v61 = vmax.f32 %v1030_v30, %v1283_v36  ;;  %v1721_v42 = vadd.f32 %v1720_v8, %v1719_v40  ;;  %v1287_v45 = vpop.f32.mrf.mxu1 }
 0x177   :  { %v1722_v60 = vpop.f32.mrf.mxu0 }
 0x178   :  { %v1348_v11 = vsel %vm1330_vm6, %v1321_v19, %v1339_v41  ;;  %v1322_v2 = vadd.f32 %v2473_v59, %v1306_v61  ;;  %v1288_v5 = vadd.f32 %v1721_v42, %v1287_v45  ;;  %v1289_v9 = vpop.f32.mrf.mxu1 }
 0x179   :  { %1358 = vst.msk [vmem:[%s2560_s3 + $0x20] sm:$0xff] %vm1353_vm1, %v1348_v11  ;;  %v1723_v12 = vpop.f32.mrf.mxu0 }
 0x17a   :  { %vm1331_vm7 = vcmp.gt.f32.partialorder %v1322_v2, 0.0  ;;  %v1340_v16 = vmul.f32 0.01, %v1322_v2  ;;  %v1307_v24 = vmax.f32 %v1031_v15, %v1288_v5  ;;  %v1724_v14 = vadd.f32 %v1723_v12, %v1722_v60  ;;  %v1290_v47 = vpop.f32.mrf.mxu1 }
 0x17b   :  { %v1725_v53 = vpop.f32.mrf.mxu0 }
 0x17c   :  { %v1349_v13 = vsel %vm1331_vm7, %v1322_v2, %v1340_v16  ;;  %v1323_v20 = vadd.f32 %v2473_v59, %v1307_v24  ;;  %v1291_v28 = vadd.f32 %v1724_v14, %v1290_v47  ;;  %v1292_v44 = vpop.f32.mrf.mxu1 }
 0x17d   :  { %1359 = vst.msk [vmem:[%s2560_s3 + $0x28] sm:$0xff] %vm1353_vm1, %v1349_v13  ;;  %v1726_v50 = vpop.f32.mrf.mxu0 }
 0x17e   :  { %vm1332_vm8 = vcmp.gt.f32.partialorder %v1323_v20, 0.0  ;;  %v1341_v58 = vmul.f32 0.01, %v1323_v20  ;;  %v1308_v63 = vmax.f32 %v1032_v48, %v1291_v28  ;;  %v1727_v23 = vadd.f32 %v1726_v50, %v1725_v53  ;;  %v1295_v0 = vpop.f32.mrf.mxu1 }
 0x17f   :  { %v1728_v43 = vpop.f32.mrf.mxu0 }
 0x180   :  { %v1350_v35 = vsel %vm1332_vm8, %v1323_v20, %v1341_v58  ;;  %v1324_v27 = vadd.f32 %v2473_v59, %v1308_v63  ;;  %v1296_v17 = vadd.f32 %v1727_v23, %v1295_v0  ;;  %v1297_v32 = vpop.f32.mrf.mxu1 }
 0x181   :  { %1360 = vst.msk [vmem:[%s2560_s3 + $0x30] sm:$0xff] %vm1353_vm1, %v1350_v35  ;;  %v1729_v18 = vpop.f32.mrf.mxu0 }
 0x182   :  { %vm1333_vm9 = vcmp.gt.f32.partialorder %v1324_v27, 0.0  ;;  %v1342_v21 = vmul.f32 0.01, %v1324_v27  ;;  %v1309_v56 = vmax.f32 %v1033_v1, %v1296_v17  ;;  %v1298_v62 = vpop.f32.mrf.mxu1 }
 0x184   :  { %v1351_v55 = vsel %vm1333_vm9, %v1324_v27, %v1342_v21  ;;  %v1325_v49 = vadd.f32 %v2473_v59, %v1309_v56  ;;  %v1299_v39 = vpop.f32.mrf.mxu1 }
 0x185   :  { %1361 = vst.msk [vmem:[%s2560_s3 + $0x38] sm:$0xff] %vm1353_vm1, %v1351_v55 }
 0x186   :  { %vm1334_vm10 = vcmp.gt.f32.partialorder %v1325_v49, 0.0  ;;  %v1343_v51 = vmul.f32 0.01, %v1325_v49 }
 0x188   :  { %v1352_v52 = vsel %vm1334_vm10, %v1325_v49, %v1343_v51 }
 0x189   :  { %1362 = vst.msk [vmem:[%s2560_s3 + $0x40] sm:$0xff] %vm1353_vm1, %v1352_v52 }

// kernel: cifar_cnn_forward.6
= control target key start
LH: loop header
LB: loop body
LE: loop exit
PB: predicated region body
PF: predicated region fallthrough
CT: control target
= control target key end

     0   :  { %vm190_vm0 = vcmask 261120   ;;  %vm723_vm1 = vcmask 523264   ;;  %vm726_vm5 = vcmask 517120   ;;  %s1282_s1 = inlined_call_operand.vmem [shape: bf16[288,64], index: 1, kind: input, shape index: {}]   ;;  %s1283_s0 = inlined_call_operand.vmem [shape: bf16[4,18,288], index: 0, kind: input, shape index: {}]   ;;  %s1284_s2 = inlined_call_operand.vmem [shape: f32[1,64], index: 2, kind: input, shape index: {}]   ;;  %s1285_s3 = inlined_call_operand.vmem [shape: f32[18,64], index: 3, kind: output, shape index: {}]  }
   0x1   :  { %v1030_v0 = vld [vmem:[%s1282_s1 + $0x78] sm:$0xff]   ;;  %v1035_v1 = vld [vmem:[%s1282_s1 + $0x88] sm:$0xff]   ;;  %v1047_v3 = vld [vmem:[%s1282_s1 + $0x70] sm:$0xff]  }
   0x2   :  { %801 = vmatprep.subr.bf16.mxu0 %v1030_v0  ;;  %v1041_v2 = vld [vmem:[%s1282_s1 + $0x38] sm:$0xff]   ;;  %929 = vmatprep.subr.bf16.mxu1 %v1035_v1  ;;  %v1054_v4 = vld [vmem:[%s1282_s1 + $0x80] sm:$0xff]   ;;  %v1060_v5 = vld [vmem:[%s1282_s1 + $0x30] sm:$0xff]  }
   0x3   :  { %802 = vmatpush3.bf16.msra.mxu0 %v1041_v2  ;;  %930 = vmatpush3.bf16.msra.mxu1 %v1035_v1  ;;  %v967_v6 = vld [vmem:[%s1283_s0 + $0x8] ss:$12 sps:$4 sm:$0xff]   ;;  %v969_v8 = vld [vmem:[%s1283_s0 + $0x20] ss:$0 sps:$4 sm:$0x11]   ;;  %v1102_v12 = vld [vmem:[%s1282_s1 + $0x58] sm:$0xff]  }
   0x4   :  { %803 = vmatprep.subr.bf16.mxu0 %v1047_v3  ;;  %931 = vmatprep.subr.bf16.mxu1 %v1054_v4  ;;  %v1069_v7 = vld [vmem:[%s1282_s1 + $0x68] sm:$0xff]   ;;  %v1087_v10 = vld [vmem:[%s1282_s1 + $0x60] sm:$0xff]   ;;  %v1109_v13 = vld [vmem:[%s1282_s1 + $0x18] sm:$0xff]  }
   0x5   :  { %v1079_v9 = vld [vmem:[%s1282_s1 + $0x28] sm:$0xff]   ;;  %933 = vmatprep.mubr.msk.bf16.mxu1 %vm190_vm0, %v967_v6  ;;  %v1095_v11 = vld [vmem:[%s1282_s1 + $0x20] sm:$0xff]   ;;  %v1116_v14 = vld [vmem:[%s1282_s1 + $0x50] sm:$0xff]  }
   0x6   :  { %v1123_v15 = vld [vmem:[%s1282_s1 + $0x10] sm:$0xff]   ;;  %v1133_v17 = vld [vmem:[%s1282_s1 + $0x48] sm:$0xff]   ;;  %v1150_v20 = vld [vmem:[%s1282_s1 + $0x40] sm:$0xff]  }
   0x7   :  { %804 = vmatpush3.bf16.msra.mxu0 %v1060_v5  ;;  %932 = vmatpush3.bf16.msra.mxu1 %v1054_v4  ;;  %v983_v16 = vld [vmem:[%s1283_s0 + $0x4] ss:$12 sps:$4 sm:$0xff]   ;;  %v987_v18 = vld [vmem:[%s1283_s0 + $0x28] ss:$12 sps:$4 sm:$0xff]   ;;  %v55_v22 = vld [vmem:[%s1283_s0 + $0x18] sm:$0x11] }
   0x8   :  { %805 = vmatprep.subr.bf16.mxu0 %v1069_v7  ;;  %833 = vmatprep.subr.bf16.mxu1 %v1030_v0  ;;  %v1143_v19 = vld [vmem:[%s1282_s1 + $0x8] sm:$0xff]   ;;  %v1157_v21 = vld [vmem:[%s1282_s1] sm:$0xff]   ;;  %v736_v24 = vcombine.high %v55_v22, %v55_v22  ;;  %v735_v27 = vcombine.low %v55_v22, %v55_v22  ;;  %v993_v32 = vld [vmem:[%s1283_s0 + $0x50] ss:$12 sps:$4 sm:$0xff]  }
   0x9   :  { %229 = vmatprep.mubr.bf16.mxu0 %v983_v16  ;;  %v981_v23 = vld [vmem:[%s1283_s0] ss:$12 sps:$4 sm:$0xff]   ;;  %v985_v26 = vld [vmem:[%s1283_s0 + $0x24] ss:$12 sps:$4 sm:$0xff]   ;;  %v995_v37 = vld [vmem:[%s1283_s0 + $0x48] ss:$12 sps:$4 sm:$0xff]  }
   0xa   :  { %934 = vmatmul.mubr.msk.bf16.vlgmr.msra.gmra.mxu1 %vm190_vm0, %v969_v8  ;;  %v762_v25 = vld [vmem:[%s1283_s0 + $0x3c] sm:$0x11]  ;;  %v990_v29 = vld [vmem:[%s1283_s0 + $0x2c] ss:$12 sps:$4 sm:$0xff]   ;;  %v790_v41 = vld [vmem:[%s1283_s0 + $0x84] sm:$0x11] }
   0xb   :  { %806 = vmatpush3.bf16.msra.mxu0 %v1079_v9  ;;  %834 = vmatpush3.bf16.msra.mxu1 %v1041_v2  ;;  %v768_v28 = vcombine.high %v762_v25, %v762_v25  ;;  %v767_v30 = vcombine.low %v762_v25, %v762_v25  ;;  %v992_v31 = vld [vmem:[%s1283_s0 + $0x44] ss:$0 sps:$4 sm:$0x11]   ;;  %v997_v33 = vld [vmem:[%s1283_s0 + $0x4c] ss:$12 sps:$4 sm:$0xff]   ;;  %v796_v44 = vcombine.high %v790_v41, %v790_v41 }
   0xc   :  { %807 = vmatprep.subr.bf16.mxu0 %v1087_v10  ;;  %835 = vmatprep.subr.bf16.mxu1 %v1047_v3  ;;  %v994_v34 = vld [vmem:[%s1283_s0 + $0x68] ss:$0 sps:$4 sm:$0x11]   ;;  %v1002_v35 = vld [vmem:[%s1283_s0 + $0x70] ss:$12 sps:$4 sm:$0xff]   ;;  %v795_v45 = vcombine.low %v790_v41, %v790_v41 }
   0xd   :  { %363 = vmatprep.mubr.bf16.mxu1 %v987_v18  ;;  %v776_v36 = vld [vmem:[%s1283_s0 + $0x60] sm:$0x11]  ;;  %v1000_v42 = vld [vmem:[%s1283_s0 + $0x6c] ss:$12 sps:$4 sm:$0xff]  }
   0xe   :  { %v782_v38 = vcombine.high %v776_v36, %v776_v36  ;;  %v781_v39 = vcombine.low %v776_v36, %v776_v36  ;;  %v1003_v40 = vld [vmem:[%s1283_s0 + $0x74] ss:$12 sps:$4 sm:$0xff]   ;;  %v1004_v43 = vld [vmem:[%s1283_s0 + $0x8c] ss:$0 sps:$4 sm:$0x11]  }
   0xf   :  { %808 = vmatpush3.bf16.msra.mxu0 %v1095_v11  ;;  %836 = vmatpush3.bf16.msra.mxu1 %v1060_v5 }
  0x10   :  { %809 = vmatprep.subr.bf16.mxu0 %v1102_v12  ;;  %837 = vmatprep.subr.bf16.mxu1 %v1069_v7 }
  0x13   :  { %810 = vmatpush3.bf16.msra.mxu0 %v1109_v13  ;;  %838 = vmatpush3.bf16.msra.mxu1 %v1079_v9 }
  0x14   :  { %811 = vmatprep.subr.bf16.mxu0 %v1116_v14  ;;  %839 = vmatprep.subr.bf16.mxu1 %v1087_v10 }
  0x17   :  { %812 = vmatpush3.bf16.msra.mxu0 %v1123_v15  ;;  %840 = vmatpush3.bf16.msra.mxu1 %v1095_v11 }
  0x18   :  { %813 = vmatprep.subr.bf16.mxu0 %v1133_v17  ;;  %841 = vmatprep.subr.bf16.mxu1 %v1102_v12 }
  0x1b   :  { %814 = vmatpush3.bf16.msra.mxu0 %v1143_v19  ;;  %842 = vmatpush3.bf16.msra.mxu1 %v1109_v13 }
  0x1c   :  { %815 = vmatprep.subr.bf16.mxu0 %v1150_v20  ;;  %843 = vmatprep.subr.bf16.mxu1 %v1116_v14 }
  0x1f   :  { %816 = vmatpush3.bf16.msra.mxu0 %v1157_v21  ;;  %844 = vmatpush3.bf16.msra.mxu1 %v1123_v15 }
  0x20   :  { %845 = vmatprep.subr.bf16.mxu1 %v1133_v17  ;;  %937 = vmatprep.subr.bf16.mxu0 %v1035_v1 }
  0x22   :  { %230 = vmatmul.mubr.bf16.vlgmr.msra.gmra.mxu0 %v981_v23 }
  0x23   :  { %846 = vmatpush3.bf16.msra.mxu1 %v1143_v19  ;;  %938 = vmatpush3.bf16.msra.mxu0 %v1035_v1 }
  0x24   :  { %847 = vmatprep.subr.bf16.mxu1 %v1150_v20  ;;  %237 = vmatprep.mubr.bf16.mxu0 %v736_v24 }
  0x25   :  { %939 = vmatprep.subr.bf16.mxu0 %v1054_v4 }
  0x27   :  { %848 = vmatpush3.bf16.msra.mxu1 %v1157_v21  ;;  %940 = vmatpush3.bf16.msra.mxu0 %v1054_v4 }
  0x28   :  { %865 = vmatprep.subr.bf16.mxu1 %v1030_v0  ;;  %945 = vmatprep.subr.bf16.mxu0 %v1035_v1 }
  0x2a   :  { %238 = vmatmul.mubr.bf16.gmra.mxu0 %v735_v27  ;;  %364 = vmatmul.mubr.bf16.vlgmr.msra.gmra.mxu1 %v985_v26 }
  0x2b   :  { %866 = vmatpush3.bf16.msra.mxu1 %v1041_v2  ;;  %371 = vmatprep.mubr.bf16.mxu1 %v768_v28 }
  0x2c   :  { %867 = vmatprep.subr.bf16.mxu1 %v1047_v3  ;;  %941 = vmatprep.mubr.msk.bf16.mxu0 %vm190_vm0, %v990_v29 }
  0x2f   :  { %868 = vmatpush3.bf16.msra.mxu1 %v1060_v5 }
  0x30   :  { %869 = vmatprep.subr.bf16.mxu1 %v1069_v7 }
  0x32   :  { %372 = vmatmul.mubr.bf16.gmra.mxu1 %v767_v30  ;;  %942 = vmatmul.mubr.msk.bf16.vlgmr.msra.gmra.mxu0 %vm190_vm0, %v992_v31 }
  0x33   :  { %946 = vmatpush3.bf16.msra.mxu0 %v1035_v1  ;;  %870 = vmatpush3.bf16.msra.mxu1 %v1079_v9 }
  0x34   :  { %947 = vmatprep.subr.bf16.mxu0 %v1054_v4  ;;  %871 = vmatprep.subr.bf16.mxu1 %v1087_v10 }
  0x35   :  { %949 = vmatprep.mubr.msk.bf16.mxu0 %vm190_vm0, %v993_v32  ;;  %500 = vmatprep.mubr.bf16.mxu1 %v997_v33 }
  0x37   :  { %948 = vmatpush3.bf16.msra.mxu0 %v1054_v4  ;;  %872 = vmatpush3.bf16.msra.mxu1 %v1095_v11 }
  0x38   :  { %897 = vmatprep.subr.bf16.mxu0 %v1030_v0  ;;  %873 = vmatprep.subr.bf16.mxu1 %v1102_v12 }
  0x3a   :  { %950 = vmatmul.mubr.msk.bf16.vlgmr.msra.gmra.mxu0 %vm190_vm0, %v994_v34 }
  0x3b   :  { %898 = vmatpush3.bf16.msra.mxu0 %v1041_v2  ;;  %874 = vmatpush3.bf16.msra.mxu1 %v1109_v13 }
  0x3c   :  { %899 = vmatprep.subr.bf16.mxu0 %v1047_v3  ;;  %875 = vmatprep.subr.bf16.mxu1 %v1116_v14 }
  0x3d   :  { %637 = vmatprep.mubr.bf16.mxu0 %v1002_v35 }
  0x3f   :  { %900 = vmatpush3.bf16.msra.mxu0 %v1060_v5  ;;  %876 = vmatpush3.bf16.msra.mxu1 %v1123_v15 }
  0x40   :  { %901 = vmatprep.subr.bf16.mxu0 %v1069_v7  ;;  %877 = vmatprep.subr.bf16.mxu1 %v1133_v17 }
  0x43   :  { %902 = vmatpush3.bf16.msra.mxu0 %v1079_v9  ;;  %878 = vmatpush3.bf16.msra.mxu1 %v1143_v19 }
  0x44   :  { %903 = vmatprep.subr.bf16.mxu0 %v1087_v10  ;;  %879 = vmatprep.subr.bf16.mxu1 %v1150_v20 }
  0x47   :  { %904 = vmatpush3.bf16.msra.mxu0 %v1095_v11  ;;  %880 = vmatpush3.bf16.msra.mxu1 %v1157_v21 }
  0x48   :  { %905 = vmatprep.subr.bf16.mxu0 %v1102_v12  ;;  %953 = vmatprep.subr.bf16.mxu1 %v1035_v1 }
  0x4a   :  { %501 = vmatmul.mubr.bf16.vlgmr.msra.gmra.mxu1 %v995_v37 }
  0x4b   :  { %906 = vmatpush3.bf16.msra.mxu0 %v1109_v13  ;;  %954 = vmatpush3.bf16.msra.mxu1 %v1035_v1 }
  0x4c   :  { %907 = vmatprep.subr.bf16.mxu0 %v1116_v14  ;;  %508 = vmatprep.mubr.bf16.mxu1 %v782_v38 }
  0x4d   :  { %955 = vmatprep.subr.bf16.mxu1 %v1054_v4 }
  0x4f   :  { %908 = vmatpush3.bf16.msra.mxu0 %v1123_v15  ;;  %956 = vmatpush3.bf16.msra.mxu1 %v1054_v4 }
  0x50   :  { %909 = vmatprep.subr.bf16.mxu0 %v1133_v17 }
  0x52   :  { %509 = vmatmul.mubr.bf16.gmra.mxu1 %v781_v39 }
  0x53   :  { %910 = vmatpush3.bf16.msra.mxu0 %v1143_v19  ;;  %957 = vmatprep.mubr.msk.bf16.mxu1 %vm190_vm0, %v1003_v40 }
  0x54   :  { %911 = vmatprep.subr.bf16.mxu0 %v1150_v20 }
  0x57   :  { %912 = vmatpush3.bf16.msra.mxu0 %v1157_v21 }
  0x5a   :  { %638 = vmatmul.mubr.bf16.vlgmr.msra.gmra.mxu0 %v1000_v42  ;;  %958 = vmatmul.mubr.msk.bf16.vlgmr.msra.gmra.mxu1 %vm190_vm0, %v1004_v43 }
  0x5b   :  { %645 = vmatprep.mubr.bf16.mxu0 %v796_v44  ;;  %v800_v44 = vld [vmem:[%s1284_s2] ss:$0 sm:$0xff] }
  0x62   :  { %646 = vmatmul.mubr.bf16.gmra.mxu0 %v795_v45 }
  0xca   :  { %v1265_v46 = vpop.f32.mrf.mxu1 }
  0xcc   :  { %v279_v47 = vpop.f32.mrf.mxu1 }
  0xce   :  { %v936_v48 = vpop.f32.mrf.mxu1 }
  0xd0   :  { %v282_v52 = vpop.f32.mrf.mxu1 }
  0xe2   :  { %v817_v49 = vpop.f32.mrf.mxu0 }
  0xe4   :  { %v818_v50 = vpop.f32.mrf.mxu0 }
  0xe5   :  { %v819_v16 = vadd.f32 %v818_v50, %v817_v49 }
  0xe6   :  { %v820_v51 = vpop.f32.mrf.mxu0 }
  0xe7   :  { %v280_v25 = vadd.f32 %v819_v16, %v279_v47 }
  0xe8   :  { %v821_v53 = vpop.f32.mrf.mxu0 }
  0xe9   :  { %v822_v22 = vadd.f32 %v821_v53, %v820_v51 }
  0xea   :  { %v823_v54 = vpop.f32.mrf.mxu0  ;;  %v849_v55 = vpop.f32.mrf.mxu1 }
  0xeb   :  { %v283_v35 = vadd.f32 %v822_v22, %v282_v52 }
  0xec   :  { %v824_v56 = vpop.f32.mrf.mxu0  ;;  %v850_v57 = vpop.f32.mrf.mxu1 }
  0xed   :  { %v851_v17 = vadd.f32 %v850_v57, %v849_v55  ;;  %v825_v36 = vadd.f32 %v824_v56, %v823_v54 }
  0xee   :  { %v826_v58 = vpop.f32.mrf.mxu0  ;;  %v852_v59 = vpop.f32.mrf.mxu1 }
  0xef   :  { %v288_v51 = vadd.f32 %v1265_v46, %v825_v36 }
  0xf0   :  { %v827_v60 = vpop.f32.mrf.mxu0  ;;  %v853_v61 = vpop.f32.mrf.mxu1 }
  0xf1   :  { %v854_v26 = vadd.f32 %v853_v61, %v852_v59 }
  0xf2   :  { %v855_v62 = vpop.f32.mrf.mxu1  ;;  %v943_v63 = vpop.f32.mrf.mxu0 }
  0xf4   :  { %v856_v0 = vpop.f32.mrf.mxu1  ;;  %v413_v1 = vpop.f32.mrf.mxu0 }
  0xf5   :  { %v414_v21 = vadd.f32 %v851_v17, %v413_v1  ;;  %v857_v29 = vadd.f32 %v856_v0, %v855_v62 }
  0xf6   :  { %v944_v2 = vpop.f32.mrf.mxu0  ;;  %v858_v3 = vpop.f32.mrf.mxu1 }
  0xf7   :  { %v427_v32 = vmax.f32 %v280_v25, %v414_v21  ;;  %v422_v43 = vadd.f32 %v943_v63, %v857_v29 }
  0xf8   :  { %v416_v4 = vpop.f32.mrf.mxu0  ;;  %v859_v5 = vpop.f32.mrf.mxu1 }
  0xf9   :  { %v417_v33 = vadd.f32 %v854_v26, %v416_v4  ;;  %v429_v57 = vmax.f32 %v288_v51, %v422_v43 }
  0xfa   :  { %v951_v6 = vpop.f32.mrf.mxu0 }
  0xfb   :  { %v428_v48 = vmax.f32 %v283_v35, %v417_v33 }
  0xfc   :  { %v550_v7 = vpop.f32.mrf.mxu0 }
  0xfe   :  { %v952_v8 = vpop.f32.mrf.mxu0 }
 0x100   :  { %v553_v19 = vpop.f32.mrf.mxu0 }
 0x10a   :  { %v881_v9 = vpop.f32.mrf.mxu1 }
 0x10c   :  { %v882_v10 = vpop.f32.mrf.mxu1 }
 0x10d   :  { %v883_v18 = vadd.f32 %v882_v10, %v881_v9 }
 0x10e   :  { %v884_v11 = vpop.f32.mrf.mxu1 }
 0x10f   :  { %v551_v27 = vadd.f32 %v883_v18, %v550_v7 }
 0x110   :  { %v885_v12 = vpop.f32.mrf.mxu1 }
 0x111   :  { %v886_v28 = vadd.f32 %v885_v12, %v884_v11  ;;  %v564_v41 = vmax.f32 %v427_v32, %v551_v27 }
 0x112   :  { %v887_v13 = vpop.f32.mrf.mxu1 }
 0x113   :  { %v554_v39 = vadd.f32 %v886_v28, %v553_v19 }
 0x114   :  { %v888_v14 = vpop.f32.mrf.mxu1 }
 0x115   :  { %v889_v40 = vadd.f32 %v888_v14, %v887_v13  ;;  %v565_v55 = vmax.f32 %v428_v48, %v554_v39 }
 0x116   :  { %v890_v15 = vpop.f32.mrf.mxu1 }
 0x117   :  { %v559_v53 = vadd.f32 %v951_v6, %v889_v40 }
 0x118   :  { %v891_v20 = vpop.f32.mrf.mxu1 }
 0x119   :  { %v566_v63 = vmax.f32 %v429_v57, %v559_v53 }
 0x11a   :  { %v913_v23 = vpop.f32.mrf.mxu0  ;;  %v959_v24 = vpop.f32.mrf.mxu1 }
 0x11c   :  { %v914_v30 = vpop.f32.mrf.mxu0  ;;  %v687_v31 = vpop.f32.mrf.mxu1 }
 0x11d   :  { %v915_v34 = vadd.f32 %v914_v30, %v913_v23 }
 0x11e   :  { %v916_v37 = vpop.f32.mrf.mxu0  ;;  %v960_v38 = vpop.f32.mrf.mxu1 }
 0x11f   :  { %v688_v42 = vadd.f32 %v915_v34, %v687_v31 }
 0x120   :  { %v917_v45 = vpop.f32.mrf.mxu0  ;;  %v690_v47 = vpop.f32.mrf.mxu1 }
 0x121   :  { %v701_v49 = vmax.f32 %v564_v41, %v688_v42  ;;  %v918_v50 = vadd.f32 %v917_v45, %v916_v37 }
 0x122   :  { %v919_v52 = vpop.f32.mrf.mxu0 }
 0x123   :  { %v711_v54 = vadd.f32 %v800_v44, %v701_v49  ;;  %v691_v56 = vadd.f32 %v918_v50, %v690_v47 }
 0x124   :  { %v920_v58 = vpop.f32.mrf.mxu0 }
 0x125   :  { %vm714_vm2 = vcmp.gt.f32.partialorder %v711_v54, 0.0  ;;  %v717_v59 = vmul.f32 0.01, %v711_v54  ;;  %v702_v60 = vmax.f32 %v565_v55, %v691_v56  ;;  %v921_v61 = vadd.f32 %v920_v58, %v919_v52 }
 0x126   :  { %v922_v62 = vpop.f32.mrf.mxu0 }
 0x127   :  { %v720_v0 = vsel %vm714_vm2, %v711_v54, %v717_v59  ;;  %v712_v1 = vadd.f32 %v800_v44, %v702_v60  ;;  %v696_v2 = vadd.f32 %v959_v24, %v921_v61 }
 0x128   :  { %724 = vst.msk [vmem:[%s1285_s3] sm:$0xff] %vm723_vm1, %v720_v0  ;;  %v923_v46 = vpop.f32.mrf.mxu0 }
 0x129   :  { %vm715_vm3 = vcmp.gt.f32.partialorder %v712_v1, 0.0  ;;  %v718_v3 = vmul.f32 0.01, %v712_v1  ;;  %v703_v4 = vmax.f32 %v566_v63, %v696_v2 }
 0x12b   :  { %v721_v5 = vsel %vm715_vm3, %v712_v1, %v718_v3  ;;  %v713_v6 = vadd.f32 %v800_v44, %v703_v4 }
 0x12c   :  { %725 = vst.msk [vmem:[%s1285_s3 + $0x8] sm:$0xff] %vm723_vm1, %v721_v5 }
 0x12d   :  { %vm716_vm4 = vcmp.gt.f32.partialorder %v713_v6, 0.0  ;;  %v719_v7 = vmul.f32 0.01, %v713_v6 }
 0x12f   :  { %v722_v8 = vsel %vm716_vm4, %v713_v6, %v719_v7 }
 0x130   :  { %727 = vst.msk [vmem:[%s1285_s3 + $0x10] sm:$0x3] %vm726_vm5, %v722_v8 }

// kernel: cifar_cnn_forward.7
= control target key start
LH: loop header
LB: loop body
LE: loop exit
PB: predicated region body
PF: predicated region fallthrough
CT: control target
= control target key end

     0   :  { %14 = vsyncpa [#allocation3], 0  ;;  %v116_v29 = vlaneseq  ;;  %v1273_v32 = vmov 1966171168   ;;  %v1274_v36 = vmov 0.0   ;;  %vm1275_vm0 = vmmov 0   ;;  %s1582_s0 = inlined_call_operand.vmem [shape: bf16[2,576], index: 0, kind: input, shape index: {}]   ;;  %s1583_s1 = inlined_call_operand.vmem [shape: bf16[576,128], index: 1, kind: input, shape index: {}]   ;;  %s1584_s2 = inlined_call_operand.vmem [shape: f32[1,128], index: 2, kind: input, shape index: {}]   ;;  %s1585_s3 = inlined_call_operand.vmem [shape: bf16[128,10], index: 3, kind: input, shape index: {}]   ;;  %s1586_s4 = inlined_call_operand.vmem [shape: bf16[128,256], index: 4, kind: input, shape index: {}]   ;;  %s1587_s5 = inlined_call_operand.vmem [shape: bf16[256,128], index: 5, kind: input, shape index: {}]   ;;  %s1588_s6 = inlined_call_operand.vmem [shape: f32[1,128], index: 6, kind: input, shape index: {}]   ;;  %s1589_s7 = inlined_call_operand.hbm [shape: f32[2,10], index: 7, kind: output, shape index: {0}]   ;;  %s1590_s8 = inlined_call_operand.hbm [shape: f32[2,128], index: 8, kind: output, shape index: {1}]  }
   0x1   :  { %v1144_v0 = vld [vmem:[%s1583_s1 + $0x78] sm:$0xff]   ;;  %v1148_v4 = vld [vmem:[%s1583_s1 + $0x70] sm:$0xff]   ;;  %v1152_v8 = vld [vmem:[%s1583_s1 + $0x68] sm:$0xff]   ;;  %v114_v33 = vunpack.c.l.s4 %v1273_v32  ;;  %vm371_vm1 = vcmask 523264  }
   0x2   :  { %v1145_v1 = vld [vmem:[%s1583_s1 + $0x38] sm:$0xff]   ;;  %1026 = vmatprep.subr.bf16.mxu0 %v1144_v0  ;;  %v1149_v5 = vld [vmem:[%s1583_s1 + $0x30] sm:$0xff]   ;;  %v1153_v9 = vld [vmem:[%s1583_s1 + $0x28] sm:$0xff]   ;;  %v117_v34 = vshrl.u32 %v116_v29, 7 }
   0x3   :  { %v1146_v2 = vld [vmem:[%s1583_s1 + $0xf8] sm:$0xff]   ;;  %1027 = vmatpush3.bf16.msra.mxu0 %v1145_v1  ;;  %v1150_v6 = vld [vmem:[%s1583_s1 + $0xf0] sm:$0xff]   ;;  %v1154_v10 = vld [vmem:[%s1583_s1 + $0xe8] sm:$0xff]   ;;  %v115_v37 = vunpack.c.0.s8 %v114_v33 }
   0x4   :  { %v1147_v3 = vld [vmem:[%s1583_s1 + $0xb8] sm:$0xff]   ;;  %1048 = vmatprep.subr.bf16.mxu1 %v1146_v2  ;;  %1028 = vmatprep.subr.bf16.mxu0 %v1148_v4  ;;  %v1151_v7 = vld [vmem:[%s1583_s1 + $0xb0] sm:$0xff]   ;;  %v1155_v11 = vld [vmem:[%s1583_s1 + $0xa8] sm:$0xff]  }
   0x5   :  { %1049 = vmatpush3.bf16.msra.mxu1 %v1147_v3  ;;  %v1156_v12 = vld [vmem:[%s1583_s1 + $0x60] sm:$0xff]   ;;  %v1160_v16 = vld [vmem:[%s1583_s1 + $0x58] sm:$0xff]   ;;  %v1164_v20 = vld [vmem:[%s1583_s1 + $0x50] sm:$0xff]   ;;  %v118_v39 = vsub.s32 %v115_v37, %v117_v34 }
   0x6   :  { %1050 = vmatprep.subr.bf16.mxu1 %v1150_v6  ;;  %v1157_v13 = vld [vmem:[%s1583_s1 + $0x20] sm:$0xff]   ;;  %v1161_v17 = vld [vmem:[%s1583_s1 + $0x18] sm:$0xff]   ;;  %v1165_v21 = vld [vmem:[%s1583_s1 + $0x10] sm:$0xff]  }
   0x7   :  { %1029 = vmatpush3.bf16.msra.mxu0 %v1149_v5  ;;  %v1158_v14 = vld [vmem:[%s1583_s1 + $0xe0] sm:$0xff]   ;;  %v1162_v18 = vld [vmem:[%s1583_s1 + $0xd8] sm:$0xff]   ;;  %v1166_v22 = vld [vmem:[%s1583_s1 + $0xd0] sm:$0xff]  }
   0x8   :  { %1030 = vmatprep.subr.bf16.mxu0 %v1152_v8  ;;  %v1159_v15 = vld [vmem:[%s1583_s1 + $0xa0] sm:$0xff]   ;;  %v1163_v19 = vld [vmem:[%s1583_s1 + $0x98] sm:$0xff]   ;;  %v1167_v23 = vld [vmem:[%s1583_s1 + $0x90] sm:$0xff]  }
   0x9   :  { %1051 = vmatpush3.bf16.msra.mxu1 %v1151_v7  ;;  %v1168_v24 = vld [vmem:[%s1583_s1 + $0x48] sm:$0xff]   ;;  %v1172_v28 = vld [vmem:[%s1583_s1 + $0x40] sm:$0xff]   ;;  %v1177_v44 = vld [vmem:[%s1583_s1 + $0x118] sm:$0xff]  }
   0xa   :  { %1052 = vmatprep.subr.bf16.mxu1 %v1154_v10  ;;  %v1169_v25 = vld [vmem:[%s1583_s1 + $0x8] sm:$0xff]   ;;  %v1173_v30 = vld [vmem:[%s1583_s1] sm:$0xff]   ;;  %v1184_v46 = vld [vmem:[%s1585_s3 + $0x38] sm:$0xff]  }
   0xb   :  { %1031 = vmatpush3.bf16.msra.mxu0 %v1153_v9  ;;  %v1170_v26 = vld [vmem:[%s1583_s1 + $0xc8] sm:$0xff]   ;;  %v1174_v31 = vld [vmem:[%s1583_s1 + $0xc0] sm:$0xff]   ;;  %v1178_v48 = vld [vmem:[%s1583_s1 + $0x110] sm:$0xff]  }
   0xc   :  { %1032 = vmatprep.subr.bf16.mxu0 %v1156_v12  ;;  %v1171_v27 = vld [vmem:[%s1583_s1 + $0x88] sm:$0xff]   ;;  %v1176_v35 = vld [vmem:[%s1583_s1 + $0x80] sm:$0xff]   ;;  %v1188_v49 = vld [vmem:[%s1585_s3 + $0x30] sm:$0xff]  }
   0xd   :  { %1053 = vmatpush3.bf16.msra.mxu1 %v1155_v11  ;;  %v31_v38 = vld [vmem:[%s1582_s0] sm:$0x1f]  ;;  %v1179_v50 = vld [vmem:[%s1583_s1 + $0x108] sm:$0xff]   ;;  %v1183_v55 = vld [vmem:[%s1586_s4 + $0x74] ss:$8 sps:$4 sm:$0xff]  }
   0xe   :  { %1054 = vmatprep.subr.bf16.mxu1 %v1158_v14  ;;  %v119_v40 = vrot.slane %v31_v38, %v118_v39  ;;  %v112_v51 = vcombine.high %v31_v38, %v31_v38  ;;  %v1192_v52 = vld [vmem:[%s1585_s3 + $0x28] sm:$0xff]   ;;  %v1180_v53 = vld [vmem:[%s1583_s1 + $0x100] sm:$0xff]   ;;  %v1181_v56 = vld [vmem:[%s1586_s4 + $0x70] ss:$8 sps:$4 sm:$0xff]  }
   0xf   :  { %1033 = vmatpush3.bf16.msra.mxu0 %v1157_v13  ;;  %v1187_v58 = vld [vmem:[%s1586_s4 + $0x64] ss:$8 sps:$4 sm:$0xff]  }
  0x10   :  { %1034 = vmatprep.subr.bf16.mxu0 %v1160_v16  ;;  %v127_v41 = vcombine.high %v119_v40, %v119_v40  ;;  %v134_v42 = vrot.slane %v119_v40, %v118_v39  ;;  %v126_v54 = vrot.slane %v112_v51, %v118_v39 }
  0x11   :  { %1055 = vmatpush3.bf16.msra.mxu1 %v1159_v15 }
  0x12   :  { %1056 = vmatprep.subr.bf16.mxu1 %v1162_v18  ;;  %v148_v43 = vrot.slane %v127_v41, %v118_v39  ;;  %v149_v45 = vcombine.high %v134_v42, %v134_v42  ;;  %v141_v57 = vrot.slane %v126_v54, %v118_v39 }
  0x13   :  { %1035 = vmatpush3.bf16.msra.mxu0 %v1161_v17 }
  0x14   :  { %1036 = vmatprep.subr.bf16.mxu0 %v1164_v20  ;;  %407 = vmatprep.mubr.bf16.mxu0 %v148_v43  ;;  %v150_v47 = vcombine.high %v148_v43, %v148_v43 }
  0x15   :  { %1057 = vmatpush3.bf16.msra.mxu1 %v1163_v19 }
  0x16   :  { %1058 = vmatprep.subr.bf16.mxu1 %v1166_v22  ;;  %447 = vmatprep.mubr.bf16.mxu1 %v150_v47 }
  0x17   :  { %1037 = vmatpush3.bf16.msra.mxu0 %v1165_v21 }
  0x18   :  { %1038 = vmatprep.subr.bf16.mxu0 %v1168_v24 }
  0x19   :  { %1059 = vmatpush3.bf16.msra.mxu1 %v1167_v23 }
  0x1a   :  { %1060 = vmatprep.subr.bf16.mxu1 %v1170_v26 }
  0x1b   :  { %1039 = vmatpush3.bf16.msra.mxu0 %v1169_v25 }
  0x1c   :  { %1040 = vmatprep.subr.bf16.mxu0 %v1172_v28 }
  0x1d   :  { %1061 = vmatpush3.bf16.msra.mxu1 %v1171_v27 }
  0x1e   :  { %1062 = vmatprep.subr.bf16.mxu1 %v1174_v31 }
  0x1f   :  { %1041 = vmatpush3.bf16.msra.mxu0 %v1173_v30 }
  0x20   :  { %1106 = vmatprep.subr.bf16.mxu0 %v1274_v36 }
  0x21   :  { %1063 = vmatpush3.bf16.msra.mxu1 %v1176_v35 }
  0x22   :  { %1118 = vmatprep.subr.bf16.mxu1 %v1274_v36  ;;  %408 = vmatmul.mubr.bf16.vlgmr.msra.gmra.mxu0 %v134_v42 }
  0x23   :  { %1107 = vmatpush3.bf16.msra.mxu0 %v1177_v44  ;;  %1114 = vmatprep.mubr.msk.bf16.mxu0 %vm1275_vm0, %v1274_v36 }
  0x24   :  { %448 = vmatmul.mubr.bf16.vlgmr.msra.gmra.mxu1 %v149_v45  ;;  %1108 = vmatprep.subr.bf16.mxu0 %v1274_v36 }
  0x25   :  { %1119 = vmatpush3.bf16.msra.mxu1 %v1184_v46  ;;  %1134 = vmatprep.mubr.msk.bf16.mxu1 %vm1275_vm0, %v1274_v36 }
  0x26   :  { %1120 = vmatprep.subr.bf16.mxu1 %v1274_v36 }
  0x27   :  { %1109 = vmatpush3.bf16.msra.mxu0 %v1178_v48 }
  0x28   :  { %1110 = vmatprep.subr.bf16.mxu0 %v1274_v36 }
  0x29   :  { %1121 = vmatpush3.bf16.msra.mxu1 %v1188_v49 }
  0x2a   :  { %1122 = vmatprep.subr.bf16.mxu1 %v1274_v36 }
  0x2b   :  { %1111 = vmatpush3.bf16.msra.mxu0 %v1179_v50 }
  0x2c   :  { %1112 = vmatprep.subr.bf16.mxu0 %v1274_v36 }
  0x2d   :  { %1123 = vmatpush3.bf16.msra.mxu1 %v1192_v52 }
  0x2e   :  { %1124 = vmatprep.subr.bf16.mxu1 %v1274_v36 }
  0x2f   :  { %1113 = vmatpush3.bf16.msra.mxu0 %v1180_v53 }
  0x30   :  { %698 = vmatprep.subr.bf16.mxu0 %v1183_v55 }
  0x32   :  { %1115 = vmatmul.mubr.msk.bf16.vlgmr.msra.gmra.mxu0 %vm371_vm1, %v141_v57 }
  0x33   :  { %15 = vsyncpa [#allocation5], 0  ;;  %699 = vmatpush1.bf16.msra.mxu0 %v1181_v56  ;;  %v1185_v59 = vld [vmem:[%s1586_s4 + $0x60] ss:$8 sps:$4 sm:$0xff]   ;;  %v1191_v60 = vld [vmem:[%s1586_s4 + $0x54] ss:$8 sps:$4 sm:$0xff]  }
  0x34   :  { %700 = vmatprep.subr.bf16.mxu0 %v1187_v58  ;;  %v1189_v61 = vld [vmem:[%s1586_s4 + $0x50] ss:$8 sps:$4 sm:$0xff]   ;;  %v1195_v62 = vld [vmem:[%s1586_s4 + $0x44] ss:$8 sps:$4 sm:$0xff]   ;;  %v1193_v63 = vld [vmem:[%s1586_s4 + $0x40] ss:$8 sps:$4 sm:$0xff]  }
  0x35   :  { %v1196_v0 = vld [vmem:[%s1585_s3 + $0x20] sm:$0xff]   ;;  %v1199_v1 = vld [vmem:[%s1586_s4 + $0x34] ss:$8 sps:$4 sm:$0xff]   ;;  %v1197_v2 = vld [vmem:[%s1586_s4 + $0x30] ss:$8 sps:$4 sm:$0xff]   ;;  %v1276_v13 = vmov 0  }
  0x36   :  { %1125 = vmatpush3.bf16.msra.mxu1 %v1196_v0  ;;  %v1200_v3 = vld [vmem:[%s1585_s3 + $0x18] sm:$0xff]   ;;  %v1201_v4 = vld [vmem:[%s1586_s4 + $0x20] ss:$8 sps:$4 sm:$0xff]   ;;  %v1203_v5 = vld [vmem:[%s1586_s4 + $0x24] ss:$8 sps:$4 sm:$0xff]   ;;  %730 = vmatprep.mubr.bf16.mxu0 %v1276_v13  ;;  %vm600_vm2 = vcmask 74752  }
  0x37   :  { %701 = vmatpush1.bf16.msra.mxu0 %v1185_v59  ;;  %1126 = vmatprep.subr.bf16.mxu1 %v1274_v36  ;;  %v1204_v6 = vld [vmem:[%s1585_s3 + $0x10] sm:$0xff]   ;;  %v1208_v9 = vld [vmem:[%s1585_s3 + $0x8] sm:$0xff]   ;;  %v1212_v12 = vld [vmem:[%s1585_s3] sm:$0xff]   ;;  %s1277_s17 = smov [#allocation2]  }
  0x38   :  { %702 = vmatprep.subr.bf16.mxu0 %v1191_v60  ;;  %v1207_v7 = vld [vmem:[%s1586_s4 + $0x14] ss:$8 sps:$4 sm:$0xff]   ;;  %v1205_v8 = vld [vmem:[%s1586_s4 + $0x10] ss:$8 sps:$4 sm:$0xff]   ;;  %v1211_v10 = vld [vmem:[%s1586_s4 + $0x4] ss:$8 sps:$4 sm:$0xff]  }
  0x39   :  { %v1209_v11 = vld [vmem:[%s1586_s4] ss:$8 sps:$4 sm:$0xff]   ;;  %v1213_v14 = vld [vmem:[%s1587_s5 + $0x78] sm:$0xff]   ;;  %v1215_v33 = vld [vmem:[%s1587_s5 + $0x70] sm:$0xff]  }
  0x3a   :  { %1127 = vmatpush3.bf16.msra.mxu1 %v1200_v3  ;;  %v947_v23 = vld [vmem:[%s1584_s2] ss:$0 sm:$0xff]  ;;  %v1214_v31 = vld [vmem:[%s1587_s5 + $0x38] sm:$0xff]   ;;  %v1217_v37 = vld [vmem:[%s1587_s5 + $0x68] sm:$0xff]  }
  0x3b   :  { %703 = vmatpush1.bf16.msra.mxu0 %v1189_v61  ;;  %1128 = vmatprep.subr.bf16.mxu1 %v1274_v36  ;;  %v1218_v38 = vld [vmem:[%s1587_s5 + $0x28] sm:$0xff]   ;;  %v1219_v39 = vld [vmem:[%s1587_s5 + $0x60] sm:$0xff]   ;;  %v1221_v41 = vld [vmem:[%s1587_s5 + $0x58] sm:$0xff]  }
  0x3c   :  { %704 = vmatprep.subr.bf16.mxu0 %v1195_v62  ;;  %v1220_v40 = vld [vmem:[%s1587_s5 + $0x20] sm:$0xff]   ;;  %v1222_v42 = vld [vmem:[%s1587_s5 + $0x18] sm:$0xff]   ;;  %v1223_v43 = vld [vmem:[%s1587_s5 + $0x50] sm:$0xff]  }
  0x3d   :  { %v1224_v44 = vld [vmem:[%s1587_s5 + $0x10] sm:$0xff]   ;;  %v1225_v45 = vld [vmem:[%s1587_s5 + $0x48] sm:$0xff]   ;;  %v1227_v47 = vld [vmem:[%s1587_s5 + $0x40] sm:$0xff]  }
  0x3e   :  { %1129 = vmatpush3.bf16.msra.mxu1 %v1204_v6  ;;  %v1226_v46 = vld [vmem:[%s1587_s5 + $0x8] sm:$0xff]   ;;  %v1228_v48 = vld [vmem:[%s1587_s5] sm:$0xff]  }
  0x3f   :  { %705 = vmatpush1.bf16.msra.mxu0 %v1193_v63  ;;  %1130 = vmatprep.subr.bf16.mxu1 %v1274_v36 }
  0x40   :  { %706 = vmatprep.subr.bf16.mxu0 %v1199_v1 }
  0x42   :  { %1131 = vmatpush3.bf16.msra.mxu1 %v1208_v9 }
  0x43   :  { %707 = vmatpush1.bf16.msra.mxu0 %v1197_v2  ;;  %1132 = vmatprep.subr.bf16.mxu1 %v1274_v36  ;;  %v1216_v36 = vld [vmem:[%s1587_s5 + $0x30] sm:$0xff]   ;;  %s925_s5 = sshll.u32 %s1277_s17, 4  ;;  %s926_s5 = int_to_ptr.vmem [resolvable:$true] %s925_s5 }
  0x44   :  { %708 = vmatprep.subr.bf16.mxu0 %v1203_v5  ;;  %s1229_s2 = scalar_lea.vmem %s926_s5, 32  ;;  %p1234_p1 = scmp.lt.s32.totalorder %s926_s5, %s926_s5 }
  0x45   :  { %p1230_p0 = scmp.ne.s32.totalorder %s926_s5, %s1229_s2  ;;  %p1235_p2 = scmp.lt.s32.totalorder %s1229_s2, %s1229_s2 }
  0x46   :  { %1133 = vmatpush3.bf16.msra.mxu1 %v1212_v12 }
  0x47   :  { %709 = vmatpush1.bf16.msra.mxu0 %v1201_v4  ;;  %1084 = vmatprep.subr.bf16.mxu1 %v1213_v14  ;;  %p1236_p3 = por %p1235_p2, %p1234_p1 }
  0x48   :  { %710 = vmatprep.subr.bf16.mxu0 %v1207_v7 }
  0x49   :  { %p1237_p4 = pnand %p1236_p3, %p1230_p0 }
  0x4b   :  { %711 = vmatpush1.bf16.msra.mxu0 %v1205_v8 }
  0x4c   :  { %712 = vmatprep.subr.bf16.mxu0 %v1211_v10 }
  0x4f   :  { %713 = vmatpush1.bf16.msra.mxu0 %v1209_v11 }
  0xe2   :  { %v1042_v15 = vpop.f32.mrf.mxu0 }
  0xe4   :  { %v1043_v16 = vpop.f32.mrf.mxu0  ;;  %v1064_v17 = vpop.f32.mrf.mxu1 }
  0xe5   :  { %v1044_v22 = vadd.f32 %v1043_v16, %v1042_v15 }
  0xe6   :  { %v1045_v18 = vpop.f32.mrf.mxu0  ;;  %v1065_v19 = vpop.f32.mrf.mxu1 }
  0xe7   :  { %v410_v25 = vadd.f32 %v1044_v22, %v947_v23  ;;  %v1066_v26 = vadd.f32 %v1065_v19, %v1064_v17 }
  0xe8   :  { %v1046_v20 = vpop.f32.mrf.mxu0  ;;  %v1067_v21 = vpop.f32.mrf.mxu1 }
  0xe9   :  { %v450_v27 = vadd.f32 %v1066_v26, %v410_v25 }
  0xea   :  { %v1068_v24 = vpop.f32.mrf.mxu1 }
  0xf2   :  { %v489_v28 = vpop.f32.mrf.mxu0 }
  0xf3   :  { %v490_v29 = vadd.f32 %v489_v28, %v450_v27 }
  0xf4   :  { %v1116_v30 = vpop.f32.mrf.mxu0 }
  0xf5   :  { %v495_v32 = vpack.c.bf16 %v490_v29, %v490_v29 }
  0xf6   :  { %v492_v34 = vpop.f32.mrf.mxu0 }
  0xf7   :  { %1135 = vmatmul.mubr.bf16.vlgmr.msra.gmra.mxu1 %v495_v32  ;;  %731 = vmatmul.mubr.bf16.vlgmr.msra.gmra.mxu0 %v495_v32 }
  0xf8   :  { %v1117_v35 = vpop.f32.mrf.mxu0  ;;  %1085 = vmatpush3.bf16.msra.mxu1 %v1214_v31 }
  0xf9   :  { %1086 = vmatprep.subr.bf16.mxu1 %v1215_v33 }
  0xfc   :  { %1087 = vmatpush3.bf16.msra.mxu1 %v1216_v36 }
  0xfd   :  { %1088 = vmatprep.subr.bf16.mxu1 %v1217_v37 }
 0x100   :  { %1089 = vmatpush3.bf16.msra.mxu1 %v1218_v38 }
 0x101   :  { %1090 = vmatprep.subr.bf16.mxu1 %v1219_v39 }
 0x104   :  { %1091 = vmatpush3.bf16.msra.mxu1 %v1220_v40 }
 0x105   :  { %1092 = vmatprep.subr.bf16.mxu1 %v1221_v41 }
 0x108   :  { %1093 = vmatpush3.bf16.msra.mxu1 %v1222_v42 }
 0x109   :  { %1094 = vmatprep.subr.bf16.mxu1 %v1223_v43 }
 0x10c   :  { %1095 = vmatpush3.bf16.msra.mxu1 %v1224_v44 }
 0x10d   :  { %1096 = vmatprep.subr.bf16.mxu1 %v1225_v45 }
 0x110   :  { %1097 = vmatpush3.bf16.msra.mxu1 %v1226_v46 }
 0x111   :  { %1098 = vmatprep.subr.bf16.mxu1 %v1227_v47 }
 0x114   :  { %1099 = vmatpush3.bf16.msra.mxu1 %v1228_v48 }
 0x1b7   :  { %v594_v49 = vpop.f32.mrf.mxu1  ;;  %v732_v50 = vpop.f32.mrf.mxu0 }
 0x1b8   :  { %601 = vst.msk [vmem:[#allocation2] sm:$0x3] %vm600_vm2, %v594_v49  ;;  %v739_v51 = vmax.f32 %v732_v50, 0.0 }
 0x1b9   :  { %v1136_v52 = vpop.f32.mrf.mxu1  ;;  %v734_v53 = vpop.f32.mrf.mxu0 }
 0x1ba   :  { %v740_v54 = vmax.f32 %v734_v53, 0.0  ;;  %v741_v58 = vpack.c.bf16 %v739_v51, %v739_v51 }
 0x1bb   :  { %v597_v55 = vpop.f32.mrf.mxu1  ;;  %v736_v56 = vpop.f32.mrf.mxu0 }
 0x1bc   :  { %v742_v57 = vpack.c.bf16 %v740_v54, %v740_v54 }
 0x1bd   :  { %v1137_v59 = vpop.f32.mrf.mxu1  ;;  %v737_v60 = vpop.f32.mrf.mxu0 }
 0x1be   :  { %910 = vmatprep.mubr.bf16.mxu1 %v742_v57 }
 0x1bf   :  { %911 = vmatmul.mubr.bf16.vlgmr.msra.gmra.mxu1 %v741_v58 }
 0x1c0   :  { %1240 = shalt.err (!%p1237_p4)
}
 0x1c1   :  { %928 = dma.vmem_to_hbm [thread:$0]  %s926_s5, 32, %s1589_s7, [#allocation3]   ;;  %v1009_v63 = vld [vmem:[%s1588_s6] ss:$0 sm:$0xff] }
 0x1c2   :  { %s1278_s22 = smov [#allocation4]  }
 0x1c3   :  { %s935_s23 = sshll.u32 %s1278_s22, 4  ;;  %s936_s23 = int_to_ptr.vmem [resolvable:$true] %s935_s23 }
 0x1c4   :  { %s1249_s1 = scalar_lea.vmem %s936_s23, 32  ;;  %p1254_p6 = scmp.lt.s32.totalorder %s936_s23, %s936_s23 }
 0x1c5   :  { %p1250_p5 = scmp.ne.s32.totalorder %s936_s23, %s1249_s1  ;;  %p1255_p7 = scmp.lt.s32.totalorder %s1249_s1, %s1249_s1 }
 0x1c7   :  { %p1256_p8 = por %p1255_p7, %p1254_p6 }
 0x1c9   :  { %p1257_p9 = pnand %p1256_p8, %p1250_p5 }
 0x27f   :  { %v1100_v61 = vpop.f32.mrf.mxu1 }
 0x281   :  { %v1101_v62 = vpop.f32.mrf.mxu1 }
 0x282   :  { %v1102_v0 = vadd.f32 %v1101_v62, %v1100_v61 }
 0x283   :  { %v1103_v1 = vpop.f32.mrf.mxu1 }
 0x284   :  { %v913_v2 = vadd.f32 %v1102_v0, %v1009_v63 }
 0x285   :  { %v1104_v3 = vpop.f32.mrf.mxu1 }
 0x286   :  { %918 = vst [vmem:[#allocation4] sm:$0x3] %v913_v2 }
 0x287   :  { %1260 = shalt.err (!%p1257_p9)
}
 0x288   :  { %938 = dma.vmem_to_hbm [thread:$0]  %s936_s23, 32, %s1590_s8, [#allocation5]  }
 0x289   :  { %1269 = dma.done.wait [#allocation3], 32  }
 0x28a   :  { %1270 = vsyncadd [#allocation3], 4294967264 }
 0x28b   :  { %1271 = dma.done.wait [#allocation5], 32  }
 0x28c   :  { %1272 = vsyncadd [#allocation5], 4294967264 }
 0x28d   :  { %945 = vsyncpa [#allocation3], 1 }
 0x28e   :  { %946 = vsyncpa [#allocation5], 1 }

</bundles_post_ra>
